<compile_context>
chip_gen: v5e
topology: v5e:2x2
jax: 0.10.0
libtpu: 0.0.40
codegen_flags: <defaults>
</compile_context>

<pallas_src>
import functools

import jax
import jax.numpy as jnp
from jax import lax
from jax.experimental import pallas as pl
from jax.experimental.pallas import tpu as pltpu

EPS = 1e-5


def _vmem_limit_bytes():
    """Scoped VMEM limit per chip generation (review guidance)."""
    try:
        cap = int(pltpu.get_tpu_info().vmem_capacity_bytes)
        # ~75% of physical: 128 MiB (v5e/v6e) -> 96 MiB, 64 MiB (v7x) -> 48 MiB.
        return min(cap * 3 // 4, 96 * 1024 * 1024)
    except Exception:
        return 64 * 1024 * 1024


def _im2col3x3(xp, H, W, C):
    """xp: (H+2, W+2, C) zero-padded image -> (H*W, 9*C) im2col patch (same dtype)."""
    taps = [xp[kh:kh + H, kw:kw + W, :].reshape(H * W, C)
            for kh in range(3) for kw in range(3)]
    return jnp.concatenate(taps, axis=-1)


def basic_block_kernel(x_ref, w1_ref, b1_ref, w2_ref, b2_ref, o_ref,
                       xpad_ref, mpad_ref, *, H, W, Cin, Cmid, has_downsample):
    # Re-zero only the 1-px halo border each step (the interior is fully
    # rewritten below).  Kept per-step for multi-TensorCore correctness; cost is
    # ~2*(H+W) tiny masked stores per step.
    for ref, c in ((xpad_ref, Cin), (mpad_ref, Cmid)):
        zrow = jnp.zeros((1, W + 2, c), jnp.bfloat16)
        zcol = jnp.zeros((H + 2, 1, c), jnp.bfloat16)
        ref[0:1, :, :] = zrow
        ref[H + 1:H + 2, :, :] = zrow
        ref[:, 0:1, :] = zcol
        ref[:, W + 1:W + 2, :] = zcol

    x_nhwc = x_ref[0]                                          # (H, W, Cin) f32

    # ---- conv1 (3x3, pad 1) + folded bn1 + relu : one im2col matmul on the MXU.
    # bf16 halo scratch: single cast at the interior write; im2col stays bf16.
    xpad_ref[1:H + 1, 1:W + 1, :] = x_nhwc.astype(jnp.bfloat16)
    patch1 = _im2col3x3(xpad_ref[...], H, W, Cin)              # bf16 (H*W, 9*Cin)
    acc1 = jnp.dot(patch1, w1_ref[...], preferred_element_type=jnp.float32)
    out1 = jnp.maximum(acc1 + b1_ref[...], 0.0)                # (H*W, Cmid) f32
    # Dropout2d: identity in eval mode.

    # ---- conv2 (3x3, pad 1) + folded bn2 (+ fused 1x1 downsample branch).
    mpad_ref[1:H + 1, 1:W + 1, :] = out1.reshape(H, W, Cmid).astype(jnp.bfloat16)
    patch2 = _im2col3x3(mpad_ref[...], H, W, Cmid)             # bf16 (H*W, 9*Cmid)
    if has_downsample:
        # Downsample fused along K: wrapper stacked wd under w2 and summed the
        # folded-BN shifts, so one matmul yields conv2 + downsample pre-summed.
        x2d = x_nhwc.reshape(H * W, Cin).astype(jnp.bfloat16)
        patch2 = jnp.concatenate([patch2, x2d], axis=-1)       # (H*W, 9*Cmid+Cin)
    acc2 = jnp.dot(patch2, w2_ref[...], preferred_element_type=jnp.float32)
    out2 = acc2 + b2_ref[...]
    if not has_downsample:
        out2 = out2 + x_nhwc.reshape(H * W, Cin)               # exact f32 identity

    # ---- final relu; flat (H*W, Cmid) store.
    o_ref[0] = jnp.maximum(out2, 0.0).astype(o_ref.dtype)


def basic_block_forward_nhwc(x_nhwc, params, *, out_dtype=jnp.float32):
    """NHWC-native fused BasicBlock.  x_nhwc: (N, H, W, Cin) f32 -> (N, H, W, Cmid)."""
    N, H, W, Cin = x_nhwc.shape
    Cmid = params["w1p"].shape[-1]
    has_downsample = params["has_downsample"]                  # static python bool
    k2 = params["w2p"].shape[0]                                # 9*Cmid (+ Cin if fused)

    kern = functools.partial(basic_block_kernel, H=H, W=W, Cin=Cin, Cmid=Cmid,
                             has_downsample=has_downsample)

    in_specs = [
        pl.BlockSpec((1, H, W, Cin), lambda n: (n, 0, 0, 0)),
        pl.BlockSpec((9 * Cin, Cmid), lambda n: (0, 0)),
        pl.BlockSpec((1, Cmid), lambda n: (0, 0)),
        pl.BlockSpec((k2, Cmid), lambda n: (0, 0)),
        pl.BlockSpec((1, Cmid), lambda n: (0, 0)),
    ]

    out_flat = pl.pallas_call(
        kern,
        out_shape=jax.ShapeDtypeStruct((N, H * W, Cmid), out_dtype),
        grid_spec=pltpu.PrefetchScalarGridSpec(
            num_scalar_prefetch=0,
            grid=(N,),
            in_specs=in_specs,
            out_specs=pl.BlockSpec((1, H * W, Cmid), lambda n: (n, 0, 0)),
            scratch_shapes=[
                pltpu.VMEM((H + 2, W + 2, Cin), jnp.bfloat16),   # padded input
                pltpu.VMEM((H + 2, W + 2, Cmid), jnp.bfloat16),  # padded out1
            ],
        ),
        compiler_params=pltpu.CompilerParams(
            dimension_semantics=("parallel",),
            vmem_limit_bytes=_vmem_limit_bytes()),
    )(x_nhwc, params["w1p"], params["b1"], params["w2p"], params["b2"])

    return out_flat.reshape(N, H, W, Cmid)


def basic_block_forward(x_nchw, params):
    """PyTorch-facing wrapper: (N, Cin, H, W) f32 -> (N, Cmid, H, W) f32.

    The two transposes here are the model-boundary layout conversion; a full
    ResNet should chain basic_block_forward_nhwc() directly (no per-block
    transposes / HBM round trips).
    """
    x_nhwc = jnp.transpose(x_nchw, (0, 2, 3, 1))
    y_nhwc = basic_block_forward_nhwc(x_nhwc, params)
    return jnp.transpose(y_nhwc, (0, 3, 1, 2))


def _random_bn(keys, c):
    g = 1.0 + 0.1 * jax.random.normal(keys[0], (c,))
    b = 0.1 * jax.random.normal(keys[1], (c,))
    m = 0.1 * jax.random.normal(keys[2], (c,))
    v = 1.0 + 0.1 * jax.random.uniform(keys[3], (c,))
    return jnp.stack([g, b, m, v]).astype(jnp.float32)


def _fold_bn(bn):
    """bn: (4, C) = [gamma, beta, mean, var] -> (scale, shift) per channel."""
    g, b, m, v = bn[0], bn[1], bn[2], bn[3]
    s = g * lax.rsqrt(v + EPS)
    return s, b - m * s


def init_params(key, in_planes, planes, stride=1):
    assert stride == 1  # TODO(synk): stride>1 not supported by this kernel.
    ks = jax.random.split(key, 16)

    w1_oihw = 0.1 * jax.random.normal(ks[0], (planes, in_planes, 3, 3), jnp.float32)
    w2_oihw = 0.1 * jax.random.normal(ks[1], (planes, planes, 3, 3), jnp.float32)
    bn1 = _random_bn(ks[4:8], planes)
    bn2 = _random_bn(ks[8:12], planes)

    s1, sh1 = _fold_bn(bn1)
    s2, sh2 = _fold_bn(bn2)

    # Fold BN scale into HWIO weights, pack for im2col as (9*Cin, Cout).
    w1_hwio = jnp.transpose(w1_oihw, (2, 3, 1, 0)) * s1[None, None, None, :]
    w2_hwio = jnp.transpose(w2_oihw, (2, 3, 1, 0)) * s2[None, None, None, :]
    w1p = w1_hwio.reshape(9 * in_planes, planes)
    w2p = w2_hwio.reshape(9 * planes, planes)
    b2 = sh2

    has_downsample = (stride != 1) or (in_planes != planes)

    params = {
        "has_downsample": has_downsample,
        # PyTorch-style layouts kept only for the pure-JAX reference check.
        "w1_oihw": w1_oihw, "w2_oihw": w2_oihw, "bn1": bn1, "bn2": bn2,
    }

    if has_downsample:
        wd_oihw = 0.1 * jax.random.normal(ks[2], (planes, in_planes, 1, 1), jnp.float32)
        bnd = _random_bn(ks[12:16], planes)
        sd, shd = _fold_bn(bnd)
        wd_io = jnp.transpose(wd_oihw[:, :, 0, 0], (1, 0)) * sd[None, :]
        # Fuse the 1x1 downsample into conv2: stack wd under w2 (K-concat) and
        # sum the folded-BN shifts, so the kernel does a single K=9*Cmid+Cin matmul.
        w2p = jnp.concatenate([w2p, wd_io], axis=0)
        b2 = sh2 + shd
        params.update({"wd_oihw": wd_oihw, "bnd": bnd})

    params.update({
        "w1p": w1p.astype(jnp.bfloat16),
        "w2p": w2p.astype(jnp.bfloat16),
        "b1": sh1.reshape(1, planes).astype(jnp.float32),
        "b2": b2.reshape(1, planes).astype(jnp.float32),
    })
    return params


def ref_forward(x_nchw, p):
    """Pure-JAX reference matching PyTorch BasicBlock eval-mode forward (NCHW)."""
    def conv(x, w, stride, pad):
        return lax.conv_general_dilated(
            x, w, (stride, stride), [(pad, pad), (pad, pad)],
            dimension_numbers=("NCHW", "OIHW", "NCHW"))

    def bn(x, t):
        g, b, m, v = t[0], t[1], t[2], t[3]
        sc = g / jnp.sqrt(v + EPS)
        return x * sc[None, :, None, None] + (b - m * sc)[None, :, None, None]

    out = jax.nn.relu(bn(conv(x_nchw, p["w1_oihw"], 1, 1), p["bn1"]))
    out = bn(conv(out, p["w2_oihw"], 1, 1), p["bn2"])
    if p["has_downsample"]:
        ident = bn(conv(x_nchw, p["wd_oihw"], 1, 0), p["bnd"])
    else:
        ident = x_nchw
    return jax.nn.relu(out + ident)


if __name__ == "__main__":
    key = jax.random.PRNGKey(0)
    kx, kp, kp2 = jax.random.split(key, 3)

    # Case 1: channel-changing block (1x1 downsample branch active, fused into conv2).
    N, in_planes, planes, H, W = 2, 4, 8, 16, 16
    x = jax.random.normal(kx, (N, in_planes, H, W), jnp.float32)
    params = init_params(kp, in_planes, planes, stride=1)
    out = jax.block_until_ready(basic_block_forward(x, params))
    ref = ref_forward(x, params)
    assert out.shape == (N, planes, H, W), out.shape
    err = float(jnp.max(jnp.abs(out - ref)))
    assert err < 2e-2, f"downsample case: max abs err {err}"

    # Case 2: identity block (in_planes == planes, exact f32 identity add).
    params2 = init_params(kp2, planes, planes, stride=1)
    x2 = jax.random.normal(kx, (N, planes, H, W), jnp.float32)
    out2 = jax.block_until_ready(basic_block_forward(x2, params2))
    ref2 = ref_forward(x2, params2)
    assert out2.shape == (N, planes, H, W), out2.shape
    err2 = float(jnp.max(jnp.abs(out2 - ref2)))
    assert err2 < 2e-2, f"identity case: max abs err {err2}"

    print("KERNEL_OK")
</pallas_src>

<mosaic_0001>
module attributes {stable_mosaic.version = 11 : i64} {
  func.func @basic_block_kernel(%arg0: i32, %arg1: memref<1x16x16x4xf32, #tpu.memory_space<vmem>>, %arg2: memref<36x8xbf16, #tpu.memory_space<vmem>>, %arg3: memref<1x8xf32, #tpu.memory_space<vmem>>, %arg4: memref<76x8xbf16, #tpu.memory_space<vmem>>, %arg5: memref<1x8xf32, #tpu.memory_space<vmem>>, %arg6: memref<1x256x8xf32, #tpu.memory_space<vmem>>, %arg7: memref<18x18x4xbf16, #tpu.memory_space<vmem>>, %arg8: memref<18x18x8xbf16, #tpu.memory_space<vmem>>) attributes {dimension_semantics = [#tpu.dimension_semantics<parallel>], iteration_bounds = array<i64: 2>, scalar_prefetch = 0 : i64, scratch_operands = 2 : i64, tpu.core_type = #tpu.core_type<tc>, window_params = [{transform_indices = @transform_0, window_bounds = array<i64: 1, 16, 16, 4>}, {pipeline_mode = #tpu.pipeline_mode<synchronous>, transform_indices = @transform_1, window_bounds = array<i64: 36, 8>}, {pipeline_mode = #tpu.pipeline_mode<synchronous>, transform_indices = @transform_2, window_bounds = array<i64: 1, 8>}, {pipeline_mode = #tpu.pipeline_mode<synchronous>, transform_indices = @transform_3, window_bounds = array<i64: 76, 8>}, {pipeline_mode = #tpu.pipeline_mode<synchronous>, transform_indices = @transform_4, window_bounds = array<i64: 1, 8>}, {transform_indices = @transform_5, window_bounds = array<i64: 1, 256, 8>}]} {
    %cst = arith.constant 0.000000e+00 : bf16
    %0 = vector.broadcast %cst : bf16 to vector<1x18x4xbf16>
    %cst_0 = arith.constant 0.000000e+00 : bf16
    %1 = vector.broadcast %cst_0 : bf16 to vector<18x1x4xbf16>
    %c0 = arith.constant 0 : index
    %c0_1 = arith.constant 0 : index
    %c0_2 = arith.constant 0 : index
    %2 = vector.load %arg7[%c0, %c0_1, %c0_2] : memref<18x18x4xbf16, #tpu.memory_space<vmem>>, vector<1x18x4xbf16>
    tpu.vector_store %arg7[%c0, %c0_1, %c0_2], %0 {strides = array<i32>} : memref<18x18x4xbf16, #tpu.memory_space<vmem>>, vector<1x18x4xbf16>,
    %c17 = arith.constant 17 : index
    %c0_3 = arith.constant 0 : index
    %c0_4 = arith.constant 0 : index
    %3 = vector.load %arg7[%c17, %c0_3, %c0_4] : memref<18x18x4xbf16, #tpu.memory_space<vmem>>, vector<1x18x4xbf16>
    tpu.vector_store %arg7[%c17, %c0_3, %c0_4], %0 {strides = array<i32>} : memref<18x18x4xbf16, #tpu.memory_space<vmem>>, vector<1x18x4xbf16>,
    %c0_5 = arith.constant 0 : index
    %c0_6 = arith.constant 0 : index
    %c0_7 = arith.constant 0 : index
    %4 = vector.load %arg7[%c0_5, %c0_6, %c0_7] : memref<18x18x4xbf16, #tpu.memory_space<vmem>>, vector<18x1x4xbf16>
    tpu.vector_store %arg7[%c0_5, %c0_6, %c0_7], %1 {strides = array<i32>} : memref<18x18x4xbf16, #tpu.memory_space<vmem>>, vector<18x1x4xbf16>,
    %c0_8 = arith.constant 0 : index
    %c17_9 = arith.constant 17 : index
    %c0_10 = arith.constant 0 : index
    %5 = vector.load %arg7[%c0_8, %c17_9, %c0_10] : memref<18x18x4xbf16, #tpu.memory_space<vmem>>, vector<18x1x4xbf16>
    tpu.vector_store %arg7[%c0_8, %c17_9, %c0_10], %1 {strides = array<i32>} : memref<18x18x4xbf16, #tpu.memory_space<vmem>>, vector<18x1x4xbf16>,
    %cst_11 = arith.constant 0.000000e+00 : bf16
    %6 = vector.broadcast %cst_11 : bf16 to vector<1x18x8xbf16>
    %cst_12 = arith.constant 0.000000e+00 : bf16
    %7 = vector.broadcast %cst_12 : bf16 to vector<18x1x8xbf16>
    %c0_13 = arith.constant 0 : index
    %c0_14 = arith.constant 0 : index
    %c0_15 = arith.constant 0 : index
    %8 = vector.load %arg8[%c0_13, %c0_14, %c0_15] : memref<18x18x8xbf16, #tpu.memory_space<vmem>>, vector<1x18x8xbf16>
    tpu.vector_store %arg8[%c0_13, %c0_14, %c0_15], %6 {strides = array<i32>} : memref<18x18x8xbf16, #tpu.memory_space<vmem>>, vector<1x18x8xbf16>,
    %c17_16 = arith.constant 17 : index
    %c0_17 = arith.constant 0 : index
    %c0_18 = arith.constant 0 : index
    %9 = vector.load %arg8[%c17_16, %c0_17, %c0_18] : memref<18x18x8xbf16, #tpu.memory_space<vmem>>, vector<1x18x8xbf16>
    tpu.vector_store %arg8[%c17_16, %c0_17, %c0_18], %6 {strides = array<i32>} : memref<18x18x8xbf16, #tpu.memory_space<vmem>>, vector<1x18x8xbf16>,
    %c0_19 = arith.constant 0 : index
    %c0_20 = arith.constant 0 : index
    %c0_21 = arith.constant 0 : index
    %10 = vector.load %arg8[%c0_19, %c0_20, %c0_21] : memref<18x18x8xbf16, #tpu.memory_space<vmem>>, vector<18x1x8xbf16>
    tpu.vector_store %arg8[%c0_19, %c0_20, %c0_21], %7 {strides = array<i32>} : memref<18x18x8xbf16, #tpu.memory_space<vmem>>, vector<18x1x8xbf16>,
    %c0_22 = arith.constant 0 : index
    %c17_23 = arith.constant 17 : index
    %c0_24 = arith.constant 0 : index
    %11 = vector.load %arg8[%c0_22, %c17_23, %c0_24] : memref<18x18x8xbf16, #tpu.memory_space<vmem>>, vector<18x1x8xbf16>
    tpu.vector_store %arg8[%c0_22, %c17_23, %c0_24], %7 {strides = array<i32>} : memref<18x18x8xbf16, #tpu.memory_space<vmem>>, vector<18x1x8xbf16>,
    %c0_25 = arith.constant 0 : index
    %c0_26 = arith.constant 0 : index
    %c0_27 = arith.constant 0 : index
    %c0_28 = arith.constant 0 : index
    %12 = vector.load %arg1[%c0_25, %c0_26, %c0_27, %c0_28] : memref<1x16x16x4xf32, #tpu.memory_space<vmem>>, vector<1x16x16x4xf32>
    %13 = vector.shape_cast %12 : vector<1x16x16x4xf32> to vector<16x16x4xf32>
    %14 = arith.truncf %13 : vector<16x16x4xf32> to vector<16x16x4xbf16>
    %c1 = arith.constant 1 : index
    %c1_29 = arith.constant 1 : index
    %c0_30 = arith.constant 0 : index
    %15 = vector.load %arg7[%c1, %c1_29, %c0_30] : memref<18x18x4xbf16, #tpu.memory_space<vmem>>, vector<16x16x4xbf16>
    tpu.vector_store %arg7[%c1, %c1_29, %c0_30], %14 {strides = array<i32>} : memref<18x18x4xbf16, #tpu.memory_space<vmem>>, vector<16x16x4xbf16>,
    %c0_31 = arith.constant 0 : index
    %c0_32 = arith.constant 0 : index
    %c0_33 = arith.constant 0 : index
    %16 = vector.load %arg7[%c0_31, %c0_32, %c0_33] : memref<18x18x4xbf16, #tpu.memory_space<vmem>>, vector<18x18x4xbf16>
    %17 = vector.extract_strided_slice %16 {offsets = [0, 0, 0], sizes = [16, 16, 4], strides = [1, 1, 1]} : vector<18x18x4xbf16> to vector<16x16x4xbf16>
    %18 = vector.shape_cast %17 : vector<16x16x4xbf16> to vector<256x4xbf16>
    %19 = vector.extract_strided_slice %16 {offsets = [0, 1, 0], sizes = [16, 16, 4], strides = [1, 1, 1]} : vector<18x18x4xbf16> to vector<16x16x4xbf16>
    %20 = vector.shape_cast %19 : vector<16x16x4xbf16> to vector<256x4xbf16>
    %21 = vector.extract_strided_slice %16 {offsets = [0, 2, 0], sizes = [16, 16, 4], strides = [1, 1, 1]} : vector<18x18x4xbf16> to vector<16x16x4xbf16>
    %22 = vector.shape_cast %21 : vector<16x16x4xbf16> to vector<256x4xbf16>
    %23 = vector.extract_strided_slice %16 {offsets = [1, 0, 0], sizes = [16, 16, 4], strides = [1, 1, 1]} : vector<18x18x4xbf16> to vector<16x16x4xbf16>
    %24 = vector.shape_cast %23 : vector<16x16x4xbf16> to vector<256x4xbf16>
    %25 = vector.extract_strided_slice %16 {offsets = [1, 1, 0], sizes = [16, 16, 4], strides = [1, 1, 1]} : vector<18x18x4xbf16> to vector<16x16x4xbf16>
    %26 = vector.shape_cast %25 : vector<16x16x4xbf16> to vector<256x4xbf16>
    %27 = vector.extract_strided_slice %16 {offsets = [1, 2, 0], sizes = [16, 16, 4], strides = [1, 1, 1]} : vector<18x18x4xbf16> to vector<16x16x4xbf16>
    %28 = vector.shape_cast %27 : vector<16x16x4xbf16> to vector<256x4xbf16>
    %29 = vector.extract_strided_slice %16 {offsets = [2, 0, 0], sizes = [16, 16, 4], strides = [1, 1, 1]} : vector<18x18x4xbf16> to vector<16x16x4xbf16>
    %30 = vector.shape_cast %29 : vector<16x16x4xbf16> to vector<256x4xbf16>
    %31 = vector.extract_strided_slice %16 {offsets = [2, 1, 0], sizes = [16, 16, 4], strides = [1, 1, 1]} : vector<18x18x4xbf16> to vector<16x16x4xbf16>
    %32 = vector.shape_cast %31 : vector<16x16x4xbf16> to vector<256x4xbf16>
    %33 = vector.extract_strided_slice %16 {offsets = [2, 2, 0], sizes = [16, 16, 4], strides = [1, 1, 1]} : vector<18x18x4xbf16> to vector<16x16x4xbf16>
    %34 = vector.shape_cast %33 : vector<16x16x4xbf16> to vector<256x4xbf16>
    %35 = tpu.concatenate %18, %20, %22, %24, %26, %28, %30, %32, %34 in 1 : vector<256x4xbf16>, vector<256x4xbf16>, vector<256x4xbf16>, vector<256x4xbf16>, vector<256x4xbf16>, vector<256x4xbf16>, vector<256x4xbf16>, vector<256x4xbf16>, vector<256x4xbf16> -> vector<256x36xbf16>
    %c0_34 = arith.constant 0 : index
    %c0_35 = arith.constant 0 : index
    %36 = vector.load %arg2[%c0_34, %c0_35] : memref<36x8xbf16, #tpu.memory_space<vmem>>, vector<36x8xbf16>
    %cst_36 = arith.constant dense<0.000000e+00> : vector<256x8xf32>
    %37 = tpu.matmul %35, %36, %cst_36 {dimension_numbers = #tpu.dot_dimension_numbers<[1], [0], [0], [1], [0, 0, 1, 1], [], []>} : vector<256x36xbf16>, vector<36x8xbf16>, vector<256x8xf32> -> vector<256x8xf32>
    %c0_37 = arith.constant 0 : index
    %c0_38 = arith.constant 0 : index
    %38 = vector.load %arg3[%c0_37, %c0_38] : memref<1x8xf32, #tpu.memory_space<vmem>>, vector<1x8xf32>
    %39 = vector.broadcast %38 : vector<1x8xf32> to vector<256x8xf32>
    %40 = arith.addf %37, %39 : vector<256x8xf32>
    %cst_39 = arith.constant 0.000000e+00 : f32
    %41 = vector.broadcast %cst_39 : f32 to vector<256x8xf32>
    %42 = arith.maximumf %40, %41 : vector<256x8xf32>
    %43 = vector.shape_cast %42 : vector<256x8xf32> to vector<16x16x8xf32>
    %44 = arith.truncf %43 : vector<16x16x8xf32> to vector<16x16x8xbf16>
    %c1_40 = arith.constant 1 : index
    %c1_41 = arith.constant 1 : index
    %c0_42 = arith.constant 0 : index
    %45 = vector.load %arg8[%c1_40, %c1_41, %c0_42] : memref<18x18x8xbf16, #tpu.memory_space<vmem>>, vector<16x16x8xbf16>
    tpu.vector_store %arg8[%c1_40, %c1_41, %c0_42], %44 {strides = array<i32>} : memref<18x18x8xbf16, #tpu.memory_space<vmem>>, vector<16x16x8xbf16>,
    %c0_43 = arith.constant 0 : index
    %c0_44 = arith.constant 0 : index
    %c0_45 = arith.constant 0 : index
    %46 = vector.load %arg8[%c0_43, %c0_44, %c0_45] : memref<18x18x8xbf16, #tpu.memory_space<vmem>>, vector<18x18x8xbf16>
    %47 = vector.extract_strided_slice %46 {offsets = [0, 0, 0], sizes = [16, 16, 8], strides = [1, 1, 1]} : vector<18x18x8xbf16> to vector<16x16x8xbf16>
    %48 = vector.shape_cast %47 : vector<16x16x8xbf16> to vector<256x8xbf16>
    %49 = vector.extract_strided_slice %46 {offsets = [0, 1, 0], sizes = [16, 16, 8], strides = [1, 1, 1]} : vector<18x18x8xbf16> to vector<16x16x8xbf16>
    %50 = vector.shape_cast %49 : vector<16x16x8xbf16> to vector<256x8xbf16>
    %51 = vector.extract_strided_slice %46 {offsets = [0, 2, 0], sizes = [16, 16, 8], strides = [1, 1, 1]} : vector<18x18x8xbf16> to vector<16x16x8xbf16>
    %52 = vector.shape_cast %51 : vector<16x16x8xbf16> to vector<256x8xbf16>
    %53 = vector.extract_strided_slice %46 {offsets = [1, 0, 0], sizes = [16, 16, 8], strides = [1, 1, 1]} : vector<18x18x8xbf16> to vector<16x16x8xbf16>
    %54 = vector.shape_cast %53 : vector<16x16x8xbf16> to vector<256x8xbf16>
    %55 = vector.extract_strided_slice %46 {offsets = [1, 1, 0], sizes = [16, 16, 8], strides = [1, 1, 1]} : vector<18x18x8xbf16> to vector<16x16x8xbf16>
    %56 = vector.shape_cast %55 : vector<16x16x8xbf16> to vector<256x8xbf16>
    %57 = vector.extract_strided_slice %46 {offsets = [1, 2, 0], sizes = [16, 16, 8], strides = [1, 1, 1]} : vector<18x18x8xbf16> to vector<16x16x8xbf16>
    %58 = vector.shape_cast %57 : vector<16x16x8xbf16> to vector<256x8xbf16>
    %59 = vector.extract_strided_slice %46 {offsets = [2, 0, 0], sizes = [16, 16, 8], strides = [1, 1, 1]} : vector<18x18x8xbf16> to vector<16x16x8xbf16>
    %60 = vector.shape_cast %59 : vector<16x16x8xbf16> to vector<256x8xbf16>
    %61 = vector.extract_strided_slice %46 {offsets = [2, 1, 0], sizes = [16, 16, 8], strides = [1, 1, 1]} : vector<18x18x8xbf16> to vector<16x16x8xbf16>
    %62 = vector.shape_cast %61 : vector<16x16x8xbf16> to vector<256x8xbf16>
    %63 = vector.extract_strided_slice %46 {offsets = [2, 2, 0], sizes = [16, 16, 8], strides = [1, 1, 1]} : vector<18x18x8xbf16> to vector<16x16x8xbf16>
    %64 = vector.shape_cast %63 : vector<16x16x8xbf16> to vector<256x8xbf16>
    %65 = tpu.concatenate %48, %50, %52, %54, %56, %58, %60, %62, %64 in 1 : vector<256x8xbf16>, vector<256x8xbf16>, vector<256x8xbf16>, vector<256x8xbf16>, vector<256x8xbf16>, vector<256x8xbf16>, vector<256x8xbf16>, vector<256x8xbf16>, vector<256x8xbf16> -> vector<256x72xbf16>
    %66 = vector.shape_cast %13 : vector<16x16x4xf32> to vector<256x4xf32>
    %67 = arith.truncf %66 : vector<256x4xf32> to vector<256x4xbf16>
    %68 = tpu.concatenate %65, %67 in 1 : vector<256x72xbf16>, vector<256x4xbf16> -> vector<256x76xbf16>
    %c0_46 = arith.constant 0 : index
    %c0_47 = arith.constant 0 : index
    %69 = vector.load %arg4[%c0_46, %c0_47] : memref<76x8xbf16, #tpu.memory_space<vmem>>, vector<76x8xbf16>
    %cst_48 = arith.constant dense<0.000000e+00> : vector<256x8xf32>
    %70 = tpu.matmul %68, %69, %cst_48 {dimension_numbers = #tpu.dot_dimension_numbers<[1], [0], [0], [1], [0, 0, 1, 1], [], []>} : vector<256x76xbf16>, vector<76x8xbf16>, vector<256x8xf32> -> vector<256x8xf32>
    %c0_49 = arith.constant 0 : index
    %c0_50 = arith.constant 0 : index
    %71 = vector.load %arg5[%c0_49, %c0_50] : memref<1x8xf32, #tpu.memory_space<vmem>>, vector<1x8xf32>
    %72 = vector.broadcast %71 : vector<1x8xf32> to vector<256x8xf32>
    %73 = arith.addf %70, %72 : vector<256x8xf32>
    %cst_51 = arith.constant 0.000000e+00 : f32
    %74 = vector.broadcast %cst_51 : f32 to vector<256x8xf32>
    %75 = arith.maximumf %73, %74 : vector<256x8xf32>
    %c0_52 = arith.constant 0 : index
    %c0_53 = arith.constant 0 : index
    %c0_54 = arith.constant 0 : index
    %76 = vector.load %arg6[%c0_52, %c0_53, %c0_54] : memref<1x256x8xf32, #tpu.memory_space<vmem>>, vector<1x256x8xf32>
    %77 = vector.shape_cast %76 : vector<1x256x8xf32> to vector<256x8xf32>
    %78 = vector.shape_cast %75 : vector<256x8xf32> to vector<1x256x8xf32>
    tpu.vector_store %arg6[%c0_52, %c0_53, %c0_54], %78 {strides = array<i32>} : memref<1x256x8xf32, #tpu.memory_space<vmem>>, vector<1x256x8xf32>,
    return
  }
  func.func @transform_0(%arg0: i32) -> (i32, i32, i32, i32) {
    %c0_i32 = arith.constant 0 : i32
    %c0_i32_0 = arith.constant 0 : i32
    %c0_i32_1 = arith.constant 0 : i32
    %c0_i32_2 = arith.constant 0 : i32
    return %arg0, %c0_i32, %c0_i32_0, %c0_i32_1 : i32, i32, i32, i32
  }
  func.func @transform_1(%arg0: i32) -> (i32, i32) {
    %c0_i32 = arith.constant 0 : i32
    %c0_i32_0 = arith.constant 0 : i32
    %c0_i32_1 = arith.constant 0 : i32
    return %c0_i32, %c0_i32_0 : i32, i32
  }
  func.func @transform_2(%arg0: i32) -> (i32, i32) {
    %c0_i32 = arith.constant 0 : i32
    %c0_i32_0 = arith.constant 0 : i32
    %c0_i32_1 = arith.constant 0 : i32
    return %c0_i32, %c0_i32_0 : i32, i32
  }
  func.func @transform_3(%arg0: i32) -> (i32, i32) {
    %c0_i32 = arith.constant 0 : i32
    %c0_i32_0 = arith.constant 0 : i32
    %c0_i32_1 = arith.constant 0 : i32
    return %c0_i32, %c0_i32_0 : i32, i32
  }
  func.func @transform_4(%arg0: i32) -> (i32, i32) {
    %c0_i32 = arith.constant 0 : i32
    %c0_i32_0 = arith.constant 0 : i32
    %c0_i32_1 = arith.constant 0 : i32
    return %c0_i32, %c0_i32_0 : i32, i32
  }
  func.func @transform_5(%arg0: i32) -> (i32, i32, i32) {
    %c0_i32 = arith.constant 0 : i32
    %c0_i32_0 = arith.constant 0 : i32
    %c0_i32_1 = arith.constant 0 : i32
    return %arg0, %c0_i32, %c0_i32_0 : i32, i32, i32
  }
}

</mosaic_0001>

<bundles_post_ra>
// kernel: tpu_custom_call.1
= control target key start
LH: loop header
LB: loop body
LE: loop exit
PB: predicated region body
PF: predicated region fallthrough
CT: control target
= control target key end

     0   :  { %s5185_s18 = smov 0   ;;  %s8109_s0 = inlined_call_operand.vmem [shape: f32[2,16,16,4], index: 0, kind: input, shape index: {}]   ;;  %s8110_s1 = inlined_call_operand.vmem [shape: bf16[36,8], index: 1, kind: input, shape index: {}]   ;;  %s8111_s2 = inlined_call_operand.vmem [shape: f32[1,8], index: 2, kind: input, shape index: {}]   ;;  %s8112_s3 = inlined_call_operand.vmem [shape: bf16[76,8], index: 3, kind: input, shape index: {}]   ;;  %s8113_s4 = inlined_call_operand.vmem [shape: f32[1,8], index: 4, kind: input, shape index: {}]   ;;  %s8114_s5 = inlined_call_operand.vmem [shape: f32[2,256,8], index: 5, kind: output, shape index: {}]  }
   0x1 LB: > { %s4781_s19 = sadd.s32 4294967295, %s5139_s18   ;;  %p4785_p0 = scmp.ge.s32.totalorder %s5139_s18, 1  ;;  %s5139_s18 = sphi %s5185_s18, %s15_s18  }
   0x2   : > { %p187_p1 = scmp.lt.s32.totalorder %s5139_s18, 3 }
   0x4   : > { %p188_p2 = pnand %p4785_p0, %p187_p1 }
   0x6   : > { %191 = sbr.rel (%p188_p2) target bundleno = 1360 (0x550), region = 40 }
   0xb   : > { %vm226_vm0 = vcmask 27648   ;;  %vm229_vm1 = vcmask 24576   ;;  %vm236_vm2 = vsmask.f32 256  ;;  %v5141_v0 = vmov 0   ;;  %p215_p3 = scmp.lt.s32.totalorder %s4781_s19, 1 }
   0xc   : > { %227 = vst.msk [vmem:[#allocation2] sm:$0xf] %vm226_vm0, %v5141_v0  ;;  %vm8182_vm3 = vsmask.f32 7938  ;;  %vm5197_vm4 = vmand %vm229_vm1, %vm236_vm2  ;;  %v250_v2 = vld [vmem:[#allocation2 + $0x30] sm:$0x1] }
   0xd   : > { %228 = vst.msk [vmem:[#allocation2 + $0x4] sm:$0xf] %vm226_vm0, %v5141_v0  ;;  %vm5204_vm5 = vmand %vm229_vm1, %vm8182_vm3  ;;  %v8188_v3 = vmov 0  ;;  %v306_v4 = vld [vmem:[#allocation2 + $0x38] sm:$0x1]  ;;  %vm8181_vm6 = vcmask 60416  }
   0xe   : > { %230 = vst.msk [vmem:[#allocation2 + $0x8] sm:$0x1] %vm229_vm1, %v5141_v0  ;;  %v8189_v3 = vsel %vm5204_vm5, 4294967295, %v8188_v3  ;;  %vm351_vm7 = vcmask 57344   ;;  %s8408_s19 = smov (!%p215_p3, %s4781_s19), 1  ;;  %v251_v5 = vsel %vm5197_vm4, 0, %v250_v2  ;;  %vm5281_vm12 = vmand %vm226_vm0, %vm8182_vm3 }
   0xf   : > { %8190 = vst [vmem:[#allocation4_spill] sm:$0xff] %v8189_v3  ;;  %vm532_vm8 = vsmask.f32 4368  ;;  %v244_v6 = vld [vmem:[#allocation2 + $0x18] sm:$0x1]  ;;  %s5032_s20 = sshll.u32 %s8408_s19, 8 }
  0x10   : > { %232 = vst.msk [vmem:[#allocation2 + $0xcc] sm:$0xf] %vm226_vm0, %v5141_v0  ;;  %v5215_v7 = vld [vmem:[#allocation2 + $0x20] sm:$0x1]  ;;  %v307_v8 = vsel %vm5204_vm5, 0, %v306_v4  ;;  %v245_v9 = vsel %vm5197_vm4, 0, %v244_v6  ;;  %s5232_s23 = scalar_lea.vmem %s8109_s0, %s5032_s20  ;;  %vm5271_vm11 = vmor %vm236_vm2, %vm532_vm8  ;;  %s7949_s16 = scalar_lea.vmem %s8114_s5, %s5032_s20 }
  0x11   : > { %233 = vst.msk [vmem:[#allocation2 + $0xd0] sm:$0xf] %vm226_vm0, %v5141_v0  ;;  %v301_v10 = vsel %vm5204_vm5, 0, %v5215_v7  ;;  %v241_v12 = vld [vmem:[#allocation2 + $0xc] sm:$0x1]  ;;  %v474_v15 = vld [vmem:[%s5232_s23 + $0x30] sm:$0xff] }
  0x12   : > { %234 = vst.msk [vmem:[#allocation2 + $0xd4] sm:$0x1] %vm229_vm1, %v5141_v0  ;;  %vm1023_vm9 = vsmask.f32 3328  ;;  %vm1024_vm10 = vsmask.f32 7440  ;;  %v5238_v19 = vpack.c.bf16 %v474_v15, %v474_v15 }
  0x13   : > { %349 = vst.msk [vmem:[#allocation3] sm:$0xf] %vm8181_vm6, %v5141_v0  ;;  %v238_v11 = vld [vmem:[#allocation2] sm:$0x1]  ;;  %v475_v21 = vld [vmem:[%s5232_s23 + $0x38] sm:$0xff]  ;;  %v470_v22 = vld [vmem:[%s5232_s23 + $0x10] sm:$0xff] }
  0x14   : > { %350 = vst.msk [vmem:[#allocation3 + $0x4] sm:$0xf] %vm8181_vm6, %v5141_v0  ;;  %v239_v13 = vsel %vm5197_vm4, 0, %v238_v11  ;;  %v970_v14 = vld [vmem:[#allocation2 + $0x4] sm:$0xf]  ;;  %v471_v23 = vld [vmem:[%s5232_s23 + $0x18] sm:$0xff]  ;;  %v5248_v26 = vpack.c.bf16 %v475_v21, %v475_v21  ;;  %v5253_v29 = vpack.c.bf16 %v470_v22, %v470_v22  ;;  %vm5290_vm13 = vmor %vm1023_vm9, %vm1024_vm10 }
  0x15   : > { %352 = vst.msk [vmem:[#allocation3 + $0x8] sm:$0x1] %vm351_vm7, %v5141_v0  ;;  %v294_v16 = vld [vmem:[#allocation2 + $0x8] sm:$0x1]  ;;  %v1036_v17 = vshll.u32 %v970_v14, 16  ;;  %v1040_v18 = vshrl.u32 %v970_v14, 16  ;;  %v5255_v30 = vpack.c.bf16 %v471_v23, %v471_v23 }
  0x16   : > { %240 = vst [vmem:[#allocation2] sm:$0x1] %v239_v13  ;;  %v295_v20 = vsel %vm5204_vm5, 0, %v294_v16  ;;  %v586_v27 = vshrl.u32 %v5238_v19, 16  ;;  %v589_v28 = vshll.u32 %v5238_v19, 16  ;;  %v242_v31 = vsel %vm5197_vm4, 0, %v241_v12 }
  0x17   : > { %8191 = vst [vmem:[#allocation5_spill] sm:$0xff] %v5238_v19  ;;  %v5246_v24 = vrot.slane %v1036_v17, 5  ;;  %v1042_v25 = vrot.slane %v1040_v18, 4  ;;  %v468_v32 = vld [vmem:[%s5232_s23] sm:$0xff]  ;;  %v594_v35 = vshrl.u32 %v5248_v26, 16  ;;  %v597_v36 = vshll.u32 %v5248_v26, 16 }
  0x18   : > { %354 = vst.msk [vmem:[#allocation3 + $0xcc] sm:$0xf] %vm8181_vm6, %v5141_v0  ;;  %v588_v34 = vrot.slane %v586_v27, 7  ;;  %v469_v37 = vld [vmem:[%s5232_s23 + $0x8] sm:$0xff]  ;;  %v552_v38 = vshrl.u32 %v5253_v29, 16  ;;  %v555_v39 = vshll.u32 %v5253_v29, 16  ;;  %v5275_v51 = vpack.c.bf16 %v468_v32, %v468_v32 }
  0x19   : > { %296 = vst [vmem:[#allocation2 + $0x8] sm:$0x1] %v295_v20  ;;  %v1043_v33 = vor.u32 %v1042_v25, %v5246_v24  ;;  %v560_v40 = vshrl.u32 %v5255_v30, 16  ;;  %v563_v41 = vshll.u32 %v5255_v30, 16  ;;  %v596_v45 = vrot.slane %v594_v35, 7  ;;  %s5142_s24 = smov 4  }
  0x1a   : > { %8192 = vst [vmem:[#allocation6_spill] sm:$0xff] %v5248_v26  ;;  %v591_v43 = vor.u32 %v589_v28, %v588_v34  ;;  %v592_v44 = vrot.slane %v588_v34, 4  ;;  %v297_v46 = vld [vmem:[#allocation2 + $0x14] sm:$0x1]  ;;  %v8195_v48 = vmov 0  ;;  %v554_v49 = vrot.slane %v552_v38, 7 }
  0x1b   : > { %355 = vst.msk [vmem:[#allocation3 + $0xd0] sm:$0xf] %vm8181_vm6, %v5141_v0  ;;  %v1044_v42 = vrot.slane %v1043_v33, 4  ;;  %v8196_v48 = vsel %vm5271_vm11, 4294967295, %v8195_v48  ;;  %v562_v50 = vrot.slane %v560_v40, 7  ;;  %v5277_v52 = vpack.c.bf16 %v469_v37, %v469_v37  ;;  %v472_v37 = vld [vmem:[%s5232_s23 + $0x20] sm:$0xff] }
  0x1c   : > { %8193 = vst [vmem:[#allocation7_spill] sm:$0xff] %v5253_v29  ;;  %v599_v55 = vor.u32 %v597_v36, %v596_v45  ;;  %v601_v56 = vrot.slane %v596_v45, 4  ;;  %v557_v58 = vor.u32 %v555_v39, %v554_v49  ;;  %v558_v59 = vrot.slane %v554_v49, 4  ;;  %v253_v15 = vld [vmem:[#allocation2 + $0x3c] sm:$0x1]  ;;  %v473_v38 = vld [vmem:[%s5232_s23 + $0x28] sm:$0xff] }
  0x1d   : > { %8194 = vst [vmem:[#allocation8_spill] sm:$0xff] %v5255_v30  ;;  %v969_v47 = vld [vmem:[#allocation2] sm:$0xf]  ;;  %v565_v60 = vor.u32 %v563_v41, %v562_v50  ;;  %v567_v61 = vrot.slane %v562_v50, 4  ;;  %v543_v14 = vshrl.u32 %v5277_v52, 16  ;;  %v546_v20 = vshll.u32 %v5277_v52, 16 }
  0x1e   : > { %356 = vst.msk [vmem:[#allocation3 + $0xd4] sm:$0x1] %vm351_vm7, %v5141_v0  ;;  %v1027_v53 = vshrl.u32 %v969_v47, 16  ;;  %v1030_v54 = vshll.u32 %v969_v47, 16  ;;  %v600_v4 = vsel %vm5271_vm11, %v592_v44, %v599_v55  ;;  %v478_v44 = vld [vmem:[%s5232_s23 + $0x50] sm:$0xff]  ;;  %v254_v47 = vsel %vm5197_vm4, 0, %v253_v15 }
  0x1f   : > { %252 = vst [vmem:[#allocation2 + $0x30] sm:$0x1] %v251_v5  ;;  %v476_v5 = vld [vmem:[%s5232_s23 + $0x40] sm:$0xff]  ;;  %v566_v7 = vsel %vm5271_vm11, %v558_v59, %v565_v60  ;;  %v545_v28 = vrot.slane %v543_v14, 7  ;;  %vm1458_vm14 = vcmask 1042432   ;;  %vm1459_vm15 = vcmask 1046532  }
  0x20   : > { %308 = vst [vmem:[#allocation2 + $0x38] sm:$0x1] %v307_v8  ;;  %v971_v57 = vld [vmem:[#allocation2 + $0x8] sm:$0x1]  ;;  %v1029_v63 = vrot.slane %v1027_v53, 4  ;;  %v1032_v0 = vrot.slane %v1030_v54, 5  ;;  %v5306_v21 = vpack.c.bf16 %v476_v5, %v476_v5  ;;  %v5339_v5 = vpack.c.bf16 %v473_v38, %v473_v38  ;;  %vm5796_vm1 = vmor %vm1458_vm14, %vm1459_vm15 }
  0x21   : > { %8197 = vst [vmem:[#allocation9_spill] sm:$0xff] %v8196_v48  ;;  %v1046_v2 = vshll.u32 %v971_v57, 16  ;;  %v298_v8 = vsel %vm5204_vm5, 0, %v297_v46  ;;  %v548_v41 = vor.u32 %v546_v20, %v545_v28  ;;  %v309_v49 = vld [vmem:[#allocation2 + $0x44] sm:$0x1]  ;;  %s5143_s25 = smov 8  }
  0x22   : > { %246 = vst [vmem:[#allocation2 + $0x18] sm:$0x1] %v245_v9  ;;  %v535_v9 = vshrl.u32 %v5275_v51, 16  ;;  %v1033_v11 = vor.u32 %v1032_v0, %v1029_v63  ;;  %v310_v54 = vsel %vm5204_vm5, 0, %v309_v49  ;;  %v606_v55 = vshll.u32 %v5306_v21, 16  ;;  %s5144_s26 = smov 12  }
  0x23   : > { %8198 = vst [vmem:[#allocation10_spill] sm:$0xff] %v5275_v51  ;;  %v1048_v12 = vrot.slane %v1046_v2, 5  ;;  %s5145_s27 = smov 16   ;;  %s5146_s28 = smov 20   ;;  %vm2059_vm8 = vcmask 31744   ;;  %vm8183_vm9 = vcmask 97280  }
  0x24   : > { %8199 = vst [vmem:[#allocation11_spill] sm:$0xff] %v5277_v52  ;;  %v537_v18 = vrot.slane %v535_v9, 7  ;;  %v1034_v22 = vrot.slane %v1033_v11, 4  ;;  %v5344_v11 = vpack.c.bf16 %v478_v44, %v478_v44  ;;  %s5147_s29 = smov 32   ;;  %s5148_s30 = smov 24   ;;  %vm2108_vm10 = vcmask 64512  }
  0x25   : > { %302 = vst [vmem:[#allocation2 + $0x20] sm:$0x1] %v301_v10  ;;  %v538_v10 = vshll.u32 %v5275_v51, 16  ;;  %v1049_v23 = vsel %vm5290_vm13, %v1044_v42, %v1048_v12  ;;  %v550_v42 = vrot.slane %v545_v28, 4  ;;  %s5149_s6 = smov 28   ;;  %vm2174_vm14 = vcmask 130048  }
  0x26   : > { %243 = vst [vmem:[#allocation2 + $0xc] sm:$0x1] %v242_v31  ;;  %v878_v13 = vld [vmem:[#allocation2 + $0x30] sm:$0xf]  ;;  %v477_v31 = vld [vmem:[%s5232_s23 + $0x48] sm:$0xff]  ;;  %v1690_v32 = vunpack.c.l.b16 %v1049_v23  ;;  %v541_v36 = vrot.slane %v537_v18, 4  ;;  %v1039_v39 = vsel %vm5290_vm13, %v1034_v22, %v5246_v24 }
  0x27   : > { %881 = vst.msk [vmem:[#allocation2 + $0x34] sm:$0xf] %vm226_vm0, %v600_v4  ;;  %v879_v16 = vsel %vm5281_vm12, %v591_v43, %v878_v13  ;;  %v882_v17 = vld [vmem:[#allocation2 + $0x38] sm:$0x1]  ;;  %v540_v35 = vor.u32 %v538_v10, %v537_v18  ;;  %v1689_v45 = vunpack.c.l.b16 %v1039_v39  ;;  %v603_v24 = vshrl.u32 %v5306_v21, 16  ;;  %s5150_s17 = smov 40  }
  0x28   : > { %867 = vst.msk [vmem:[#allocation2 + $0x1c] sm:$0xf] %vm226_vm0, %v566_v7  ;;  %v883_v25 = vsel %vm5197_vm4, %v601_v56, %v882_v17  ;;  %v549_v53 = vsel %vm5271_vm11, %v541_v36, %v548_v41  ;;  %v479_v56 = vld [vmem:[%s5232_s23 + $0x58] sm:$0xff]  ;;  %v5337_v4 = vpack.c.bf16 %v472_v37, %v472_v37  ;;  %vm2240_vm15 = vcmask 195584   ;;  %s5151_s21 = smov 48   ;;  %s5152_s22 = smov 56  }
  0x29   : > { %299 = vst [vmem:[#allocation2 + $0x14] sm:$0x1] %v298_v8  ;;  %v864_v27 = vld [vmem:[#allocation2 + $0x18] sm:$0xf]  ;;  %v1721_v57 = vpack.c.b16 %v1690_v32, %v1689_v45  ;;  %v5346_v22 = vrot.slane %v603_v24, 7  ;;  %v5348_v23 = vpack.c.bf16 %v479_v56, %v479_v56  ;;  %vm2306_vm6 = vcmask 261120  }
  0x2a   : > { %8204 = vst [vmem:[#allocation12_spill] sm:$0xff] %v5306_v21  ;;  %v865_v33 = vsel %vm5281_vm12, %v557_v58, %v864_v27  ;;  %vm2363_vm3 = vcmask 293888  }
  0x2b   : > { %880 = vst [vmem:[#allocation2 + $0x30] sm:$0xf] %v879_v16  ;;  %1737 = vrot.lane.b32.xlu0 %v1721_v57, %s5142_s24 }
  0x2c   : > { %884 = vst [vmem:[#allocation2 + $0x38] sm:$0x1] %v883_v25  ;;  %v868_v34 = vld [vmem:[#allocation2 + $0x20] sm:$0x1] }
  0x2d   : > { %866 = vst [vmem:[#allocation2 + $0x18] sm:$0xf] %v865_v33  ;;  %v869_v40 = vsel %vm5197_vm4, %v567_v61, %v868_v34  ;;  %v857_v43 = vld [vmem:[#allocation2 + $0xc] sm:$0xf]  ;;  %v5335_v61 = vpack.c.bf16 %v477_v31, %v477_v31 }
  0x2e   : > { %870 = vst [vmem:[#allocation2 + $0x20] sm:$0x1] %v869_v40  ;;  %v858_v46 = vsel %vm5281_vm12, %v540_v35, %v857_v43  ;;  %v982_v50 = vld [vmem:[#allocation2 + $0x34] sm:$0xf] }
  0x2f   : > { %859 = vst [vmem:[#allocation2 + $0xc] sm:$0xf] %v858_v46  ;;  %v1132_v58 = vshll.u32 %v982_v50, 16  ;;  %v1136_v59 = vshrl.u32 %v982_v50, 16  ;;  %v976_v60 = vld [vmem:[#allocation2 + $0x1c] sm:$0xf] }
  0x30   : > { %860 = vst.msk [vmem:[#allocation2 + $0x10] sm:$0xf] %vm226_vm0, %v549_v53  ;;  %v1084_v63 = vshll.u32 %v976_v60, 16  ;;  %v1088_v0 = vshrl.u32 %v976_v60, 16  ;;  %v861_v2 = vld [vmem:[#allocation2 + $0x14] sm:$0x1] }
  0x31   : > { %8205 = vst [vmem:[#allocation13_spill] sm:$0xff] %v5335_v61  ;;  %v1134_v8 = vrot.slane %v1132_v58, 5  ;;  %v1138_v9 = vrot.slane %v1136_v59, 4  ;;  %v862_v10 = vsel %vm5197_vm4, %v550_v42, %v861_v2 }
  0x32   : > { %255 = vst [vmem:[#allocation2 + $0x3c] sm:$0x1] %v254_v47  ;;  %v981_v7 = vld [vmem:[#allocation2 + $0x30] sm:$0xf]  ;;  %v1086_v15 = vrot.slane %v1084_v63, 5  ;;  %v1090_v16 = vrot.slane %v1088_v0, 4  ;;  %v608_v0 = vor.u32 %v606_v55, %v5346_v22 }
  0x33   : > { %8206 = vst [vmem:[#allocation14_spill] sm:$0xff] %v5337_v4  ;;  %v983_v12 = vld [vmem:[#allocation2 + $0x38] sm:$0x1]  ;;  %v1123_v13 = vshrl.u32 %v981_v7, 16  ;;  %v1126_v14 = vshll.u32 %v981_v7, 16  ;;  %v1139_v17 = vor.u32 %v1138_v9, %v1134_v8 }
  0x34   : > { %8207 = vst [vmem:[#allocation15_spill] sm:$0xff] %v5339_v5  ;;  %v1142_v18 = vshll.u32 %v983_v12, 16  ;;  %v975_v20 = vld [vmem:[#allocation2 + $0x18] sm:$0xf]  ;;  %v1091_v35 = vor.u32 %v1090_v16, %v1086_v15  ;;  %v609_v16 = vrot.slane %v5346_v22, 4 }
  0x35   : > { %311 = vst [vmem:[#allocation2 + $0x44] sm:$0x1] %v310_v54  ;;  %v1125_v25 = vrot.slane %v1123_v13, 4  ;;  %v1128_v27 = vrot.slane %v1126_v14, 5  ;;  %v977_v28 = vld [vmem:[#allocation2 + $0x20] sm:$0x1] }
  0x36   : > { %8208 = vst [vmem:[#allocation16_spill] sm:$0xff] %v5344_v11  ;;  %v1075_v31 = vshrl.u32 %v975_v20, 16  ;;  %v1078_v32 = vshll.u32 %v975_v20, 16  ;;  %v1140_v33 = vrot.slane %v1139_v17, 4  ;;  %v1144_v34 = vrot.slane %v1142_v18, 5 }
  0x37   : > { %863 = vst [vmem:[#allocation2 + $0x14] sm:$0x1] %v862_v10  ;;  %v1094_v36 = vshll.u32 %v977_v28, 16  ;;  %v972_v37 = vld [vmem:[#allocation2 + $0xc] sm:$0xf]  ;;  %v1129_v38 = vor.u32 %v1128_v27, %v1125_v25  ;;  %v1092_v44 = vrot.slane %v1091_v35, 4 }
  0x38   : > { %8209 = vst [vmem:[#allocation17_spill] sm:$0xff] %v5348_v23  ;;  %v1077_v39 = vrot.slane %v1075_v31, 4  ;;  %v1080_v40 = vrot.slane %v1078_v32, 5  ;;  %v973_v41 = vld [vmem:[#allocation2 + $0x10] sm:$0xf]  ;;  %v1051_v42 = vshrl.u32 %v972_v37, 16  ;;  %v1145_v43 = vsel %vm5290_vm13, %v1140_v33, %v1144_v34 }
  0x39   : > { %v1096_v45 = vrot.slane %v1094_v36, 5  ;;  %v1054_v46 = vshll.u32 %v972_v37, 16  ;;  %v1130_v47 = vrot.slane %v1129_v38, 4  ;;  %v1698_v49 = vunpack.c.l.b16 %v1145_v43  ;;  %v885_v12 = vld [vmem:[#allocation2 + $0x3c] sm:$0xf] }
  0x3a   : > { %v1081_v24 = vor.u32 %v1080_v40, %v1077_v39  ;;  %v1053_v50 = vrot.slane %v1051_v42, 4  ;;  %v1060_v56 = vshll.u32 %v973_v41, 16  ;;  %v1064_v57 = vshrl.u32 %v973_v41, 16  ;;  %v247_v17 = vld [vmem:[#allocation2 + $0x24] sm:$0x1] }
  0x3b   : > { %v1097_v53 = vsel %vm5290_vm13, %v1092_v44, %v1096_v45  ;;  %v1056_v54 = vrot.slane %v1054_v46, 5  ;;  %v1135_v58 = vsel %vm5290_vm13, %v1130_v47, %v1134_v8  ;;  %v611_v8 = vshrl.u32 %v5335_v61, 16  ;;  %v303_v28 = vld [vmem:[#allocation2 + $0x2c] sm:$0x1]  ;;  %v256_v34 = vld [vmem:[#allocation2 + $0x48] sm:$0x1] }
  0x3c   : > { %v1082_v59 = vrot.slane %v1081_v24, 4  ;;  %v1694_v60 = vunpack.c.l.b16 %v1097_v53  ;;  %v1697_v2 = vunpack.c.l.b16 %v1135_v58  ;;  %v1062_v9 = vrot.slane %v1060_v56, 5  ;;  %v889_v55 = vld [vmem:[#allocation2 + $0x44] sm:$0x1]  ;;  %v312_v42 = vld [vmem:[#allocation2 + $0x50] sm:$0x1] }
  0x3d   : > { %v1057_v7 = vor.u32 %v1056_v54, %v1053_v50  ;;  %v1066_v10 = vrot.slane %v1064_v57, 4  ;;  %v613_v32 = vrot.slane %v611_v8, 7  ;;  %v614_v33 = vshll.u32 %v5335_v61, 16  ;;  %v482_v53 = vld [vmem:[%s5232_s23 + $0x70] sm:$0xff]  ;;  %v483_v54 = vld [vmem:[%s5232_s23 + $0x78] sm:$0xff] }
  0x3e   : > { %v974_v63 = vld [vmem:[#allocation2 + $0x14] sm:$0x1]  ;;  %v1087_v13 = vsel %vm5290_vm13, %v1082_v59, %v1086_v15  ;;  %v5363_v18 = vpack.c.b16 %v1698_v49, %v1697_v2  ;;  %v886_v15 = vsel %vm5281_vm12, %v608_v0, %v885_v12  ;;  %v248_v37 = vsel %vm5197_vm4, 0, %v247_v17 }
  0x3f   : > { %v1070_v14 = vshll.u32 %v974_v63, 16  ;;  %v1693_v20 = vunpack.c.l.b16 %v1087_v13  ;;  %v1058_v25 = vrot.slane %v1057_v7, 4  ;;  %v1067_v27 = vor.u32 %v1066_v10, %v1062_v9  ;;  %887 = vst [vmem:[#allocation2 + $0x3c] sm:$0xf] %v886_v15  ;;  %v262_v13 = vld [vmem:[#allocation2 + $0x60] sm:$0x1] }
  0x40   : > { %8210 = vst [vmem:[#allocation18_spill] sm:$0xff] %v5363_v18  ;;  %1745 = vrot.lane.b32.xlu2 %v5363_v18, %s5142_s24  ;;  %v616_v39 = vor.u32 %v614_v33, %v613_v32  ;;  %v618_v40 = vrot.slane %v613_v32, 4  ;;  %v304_v41 = vsel %vm5204_vm5, 0, %v303_v28  ;;  %v569_v44 = vshrl.u32 %v5337_v4, 16  ;;  %v481_v15 = vld [vmem:[%s5232_s23 + $0x68] sm:$0xff] }
  0x41   : > { %v1072_v31 = vrot.slane %v1070_v14, 5  ;;  %v5370_v22 = vpack.c.b16 %v1694_v60, %v1693_v20  ;;  %v1063_v35 = vsel %vm5290_vm13, %v1058_v25, %v1062_v9  ;;  %v1068_v36 = vrot.slane %v1067_v27, 4  ;;  %249 = vst [vmem:[#allocation2 + $0x24] sm:$0x1] %v248_v37  ;;  %v5402_v14 = vld [vmem:[#allocation2 + $0x68] sm:$0x1] }
  0x42   : > { %v1691_v38 = vunpack.c.l.b16 %v1063_v35  ;;  %305 = vst [vmem:[#allocation2 + $0x2c] sm:$0x1] %v304_v41  ;;  %v572_v45 = vshll.u32 %v5337_v4, 16  ;;  %v577_v46 = vshrl.u32 %v5339_v5, 16  ;;  %v617_v49 = vsel %vm5271_vm11, %v609_v16, %v616_v39  ;;  %v480_v16 = vld [vmem:[%s5232_s23 + $0x60] sm:$0xff] }
  0x43   : > { %8211 = vst [vmem:[#allocation19_spill] sm:$0xff] %v5370_v22  ;;  %1741 = vrot.lane.b32.xlu1 %v5370_v22, %s5142_s24  ;;  %v1073_v43 = vsel %vm5290_vm13, %v1068_v36, %v1072_v31  ;;  %v890_v24 = vsel %vm5197_vm4, %v618_v40, %v889_v55  ;;  %v580_v50 = vshll.u32 %v5339_v5, 16  ;;  %v571_v56 = vrot.slane %v569_v44, 7  ;;  %v485_v44 = vld [vmem:[%s5232_s23 + $0x88] sm:$0xff] }
  0x44   : > { %v1692_v47 = vunpack.c.l.b16 %v1073_v43  ;;  %888 = vst.msk [vmem:[#allocation2 + $0x40] sm:$0xf] %vm226_vm0, %v617_v49  ;;  %v579_v57 = vrot.slane %v577_v46, 7  ;;  %v257_v58 = vsel %vm5197_vm4, 0, %v256_v34  ;;  %v313_v59 = vsel %vm5204_vm5, 0, %v312_v42  ;;  %v484_v43 = vld [vmem:[%s5232_s23 + $0x80] sm:$0xff] }
  0x45   : > { %891 = vst [vmem:[#allocation2 + $0x44] sm:$0x1] %v890_v24  ;;  %v620_v63 = vshrl.u32 %v5344_v11, 16  ;;  %v623_v0 = vshll.u32 %v5344_v11, 16  ;;  %v628_v2 = vshrl.u32 %v5348_v23, 16  ;;  %v574_v7 = vor.u32 %v572_v45, %v571_v56  ;;  %v494_v11 = vld [vmem:[%s5232_s23 + $0xd0] sm:$0xff] }
  0x46   : > { %v5397_v60 = vpack.c.b16 %v1692_v47, %v1691_v38  ;;  %v575_v9 = vrot.slane %v571_v56, 4  ;;  %v582_v10 = vor.u32 %v580_v50, %v579_v57  ;;  %v584_v12 = vrot.slane %v579_v57, 4  ;;  %258 = vst [vmem:[#allocation2 + $0x48] sm:$0x1] %v257_v58  ;;  %v984_v8 = vld [vmem:[#allocation2 + $0x3c] sm:$0xf] }
  0x47   : > { %314 = vst [vmem:[#allocation2 + $0x50] sm:$0x1] %v313_v59  ;;  %v622_v17 = vrot.slane %v620_v63, 7  ;;  %v630_v20 = vrot.slane %v628_v2, 7  ;;  %v5407_v25 = vpack.c.bf16 %v482_v53, %v482_v53  ;;  %v5409_v27 = vpack.c.bf16 %v483_v54, %v483_v54 }
  0x48   : > { %8212 = vst [vmem:[#allocation20_spill] sm:$0xff] %v5397_v60  ;;  %1739 = vrot.lane.b32.xlu0 %v5397_v60, %s5142_s24  ;;  %v1147_v55 = vshrl.u32 %v984_v8, 16  ;;  %v1150_v28 = vshll.u32 %v984_v8, 16  ;;  %v583_v31 = vsel %vm5271_vm11, %v575_v9, %v582_v10  ;;  %v871_v32 = vld [vmem:[#allocation2 + $0x24] sm:$0xf]  ;;  %v631_v33 = vshll.u32 %v5348_v23, 16 }
  0x49   : > { %8213 = vst [vmem:[#allocation21_spill] sm:$0xff] %v5407_v25  ;;  %v872_v34 = vsel %vm5281_vm12, %v574_v7, %v871_v32  ;;  %v875_v35 = vld [vmem:[#allocation2 + $0x2c] sm:$0x1]  ;;  %v625_v36 = vor.u32 %v623_v0, %v622_v17  ;;  %v626_v37 = vrot.slane %v622_v17, 4  ;;  %v635_v38 = vrot.slane %v630_v20, 4 }
  0x4a   : > { %8214 = vst [vmem:[#allocation22_spill] sm:$0xff] %v5409_v27  ;;  %v1149_v39 = vrot.slane %v1147_v55, 4  ;;  %v1152_v40 = vrot.slane %v1150_v28, 5  ;;  %v876_v41 = vsel %vm5197_vm4, %v584_v12, %v875_v35  ;;  %v633_v42 = vor.u32 %v631_v33, %v630_v20 }
  0x4b   : > { %874 = vst.msk [vmem:[#allocation2 + $0x28] sm:$0xf] %vm226_vm0, %v583_v31  ;;  %v985_v45 = vld [vmem:[#allocation2 + $0x40] sm:$0xf]  ;;  %v263_v46 = vsel %vm5197_vm4, 0, %v262_v13  ;;  %v319_v47 = vsel %vm5204_vm5, 0, %v5402_v14  ;;  %v5427_v49 = vpack.c.bf16 %v480_v16, %v480_v16  ;;  %v5429_v24 = vpack.c.bf16 %v481_v15, %v481_v15 }
  0x4c   : > { %873 = vst [vmem:[#allocation2 + $0x24] sm:$0xf] %v872_v34  ;;  %v986_v50 = vld [vmem:[#allocation2 + $0x44] sm:$0x1]  ;;  %v1153_v53 = vor.u32 %v1152_v40, %v1149_v39  ;;  %v1156_v54 = vshll.u32 %v985_v45, 16  ;;  %v1160_v56 = vshrl.u32 %v985_v45, 16  ;;  %v634_v57 = vsel %vm5271_vm11, %v626_v37, %v633_v42 }
  0x4d   : > { %877 = vst [vmem:[#allocation2 + $0x2c] sm:$0x1] %v876_v41  ;;  %v1166_v58 = vshll.u32 %v986_v50, 16  ;;  %v892_v59 = vld [vmem:[#allocation2 + $0x48] sm:$0xf]  ;;  %v654_v63 = vshrl.u32 %v5407_v25, 16  ;;  %v5435_v0 = vpack.c.bf16 %v484_v43, %v484_v43  ;;  %v5437_v2 = vpack.c.bf16 %v485_v44, %v485_v44 }
  0x4e   : > { %8215 = vst [vmem:[#allocation23_spill] sm:$0xff] %v5427_v49  ;;  %v1154_v7 = vrot.slane %v1153_v53, 4  ;;  %v1158_v9 = vrot.slane %v1156_v54, 5  ;;  %v1162_v10 = vrot.slane %v1160_v56, 4  ;;  %v893_v12 = vsel %vm5281_vm12, %v625_v36, %v892_v59  ;;  %v896_v13 = vld [vmem:[#allocation2 + $0x50] sm:$0x1] }
  0x4f   : > { %8216 = vst [vmem:[#allocation24_spill] sm:$0xff] %v5429_v24  ;;  %v1168_v14 = vrot.slane %v1166_v58, 5  ;;  %v897_v16 = vsel %vm5197_vm4, %v635_v38, %v896_v13  ;;  %v656_v8 = vrot.slane %v654_v63, 7  ;;  %v657_v17 = vshll.u32 %v5407_v25, 16 }
  0x50   : > { %264 = vst [vmem:[#allocation2 + $0x60] sm:$0x1] %v263_v46  ;;  %v1159_v20 = vsel %vm5290_vm13, %v1154_v7, %v1158_v9  ;;  %v1163_v55 = vor.u32 %v1162_v10, %v1158_v9  ;;  %v662_v31 = vshrl.u32 %v5409_v27, 16  ;;  %v665_v32 = vshll.u32 %v5409_v27, 16 }
  0x51   : > { %895 = vst.msk [vmem:[#allocation2 + $0x4c] sm:$0xf] %vm226_vm0, %v634_v57  ;;  %v1699_v33 = vunpack.c.l.b16 %v1159_v20  ;;  %v659_v36 = vor.u32 %v657_v17, %v656_v8  ;;  %v660_v41 = vrot.slane %v656_v8, 4 }
  0x52   : > { %8217 = vst [vmem:[#allocation25_spill] sm:$0xff] %v5435_v0  ;;  %v5446_v28 = vld [vmem:[#allocation2 + $0x28] sm:$0xf]  ;;  %v1164_v37 = vrot.slane %v1163_v55, 4  ;;  %v664_v45 = vrot.slane %v662_v31, 7 }
  0x53   : > { %8218 = vst [vmem:[#allocation26_spill] sm:$0xff] %v5437_v2  ;;  %v5450_v15 = vld [vmem:[#allocation2 + $0x24] sm:$0xf]  ;;  %v1108_v34 = vshll.u32 %v5446_v28, 16  ;;  %v1112_v35 = vshrl.u32 %v5446_v28, 16 }
  0x54   : > { %894 = vst [vmem:[#allocation2 + $0x48] sm:$0xf] %v893_v12  ;;  %v5454_v38 = vld [vmem:[#allocation2 + $0x2c] sm:$0x1]  ;;  %v1099_v39 = vshrl.u32 %v5450_v15, 16  ;;  %v1102_v40 = vshll.u32 %v5450_v15, 16  ;;  %v1169_v50 = vsel %vm5290_vm13, %v1164_v37, %v1168_v14  ;;  %v667_v12 = vor.u32 %v665_v32, %v664_v45 }
  0x55   : > { %898 = vst [vmem:[#allocation2 + $0x50] sm:$0x1] %v897_v16  ;;  %v1110_v42 = vrot.slane %v1108_v34, 5  ;;  %v1114_v43 = vrot.slane %v1112_v35, 4  ;;  %v1118_v44 = vshll.u32 %v5454_v38, 16  ;;  %v1700_v57 = vunpack.c.l.b16 %v1169_v50 }
  0x56   : > { %320 = vst [vmem:[#allocation2 + $0x68] sm:$0x1] %v319_v47  ;;  %v1101_v53 = vrot.slane %v1099_v39, 4  ;;  %v1104_v47 = vrot.slane %v1102_v40, 5  ;;  %v669_v13 = vrot.slane %v664_v45, 4  ;;  %v668_v40 = vsel %vm5271_vm11, %v660_v41, %v667_v12  ;;  %v489_v45 = vld [vmem:[%s5232_s23 + $0xa8] sm:$0xff] }
  0x57   : > { %v906_v46 = vld [vmem:[#allocation2 + $0x60] sm:$0xf]  ;;  %v1115_v58 = vor.u32 %v1114_v43, %v1110_v42  ;;  %v1120_v59 = vrot.slane %v1118_v44, 5  ;;  %v259_v16 = vld [vmem:[#allocation2 + $0x54] sm:$0x1]  ;;  %v5463_v8 = vpack.c.b16 %v1700_v57, %v1699_v33 }
  0x58   : > { %v988_v54 = vld [vmem:[#allocation2 + $0x4c] sm:$0xf]  ;;  %v907_v56 = vsel %vm5281_vm12, %v659_v36, %v906_v46  ;;  %v1105_v7 = vor.u32 %v1104_v47, %v1101_v53  ;;  %v315_v43 = vld [vmem:[#allocation2 + $0x5c] sm:$0x1]  ;;  %v488_v44 = vld [vmem:[%s5232_s23 + $0xa0] sm:$0xff] }
  0x59   : > { %v1180_v63 = vshll.u32 %v988_v54, 16  ;;  %908 = vst [vmem:[#allocation2 + $0x60] sm:$0xf] %v907_v56  ;;  %v1184_v10 = vshrl.u32 %v988_v54, 16  ;;  %v1116_v14 = vrot.slane %v1115_v58, 4  ;;  %1747 = vrot.lane.b32.xlu2 %v5463_v8, %s5142_s24  ;;  %v260_v58 = vsel %vm5197_vm4, 0, %v259_v16 }
  0x5a   : > { %8219 = vst [vmem:[#allocation27_spill] sm:$0xff] %v5463_v8  ;;  %v1106_v31 = vrot.slane %v1105_v7, 4  ;;  %v321_v7 = vld [vmem:[#allocation2 + $0x74] sm:$0x1] }
  0x5b   : > { %v987_v9 = vld [vmem:[#allocation2 + $0x48] sm:$0xf]  ;;  %v1182_v34 = vrot.slane %v1180_v63, 5  ;;  %v1186_v35 = vrot.slane %v1184_v10, 4  ;;  %v1121_v32 = vsel %vm5290_vm13, %v1116_v14, %v1120_v59  ;;  %909 = vst.msk [vmem:[#allocation2 + $0x64] sm:$0xf] %vm226_vm0, %v668_v40  ;;  %v5489_v10 = vpack.c.bf16 %v489_v45, %v489_v45 }
  0x5c   : > { %v5465_v17 = vld [vmem:[#allocation2 + $0x50] sm:$0x1]  ;;  %v1171_v20 = vshrl.u32 %v987_v9, 16  ;;  %v1174_v55 = vshll.u32 %v987_v9, 16  ;;  %v1111_v46 = vsel %vm5290_vm13, %v1106_v31, %v1110_v42  ;;  %v1696_v50 = vunpack.c.l.b16 %v1121_v32  ;;  %v265_v63 = vld [vmem:[#allocation2 + $0x6c] sm:$0x1] }
  0x5d   : > { %v1190_v36 = vshll.u32 %v5465_v17, 16  ;;  %v910_v37 = vld [vmem:[#allocation2 + $0x68] sm:$0x1]  ;;  %v1187_v53 = vor.u32 %v1186_v35, %v1182_v34  ;;  %v1695_v54 = vunpack.c.l.b16 %v1111_v46  ;;  %v316_v42 = vsel %vm5204_vm5, 0, %v315_v43  ;;  %8221 = vst [vmem:[#allocation29_spill] sm:$0xff] %v5489_v10 }
  0x5e   : > { %v1173_v33 = vrot.slane %v1171_v20, 4  ;;  %v1176_v39 = vrot.slane %v1174_v55, 5  ;;  %v911_v57 = vsel %vm5197_vm4, %v669_v13, %v910_v37  ;;  %v5487_v9 = vpack.c.bf16 %v488_v44, %v488_v44  ;;  %261 = vst [vmem:[#allocation2 + $0x54] sm:$0x1] %v260_v58 }
  0x5f   : > { %v1192_v47 = vrot.slane %v1190_v36, 5  ;;  %v1188_v41 = vrot.slane %v1187_v53, 4  ;;  %912 = vst [vmem:[#allocation2 + $0x68] sm:$0x1] %v911_v57  ;;  %v5491_v12 = vpack.c.b16 %v1696_v50, %v1695_v54  ;;  %v637_v55 = vshrl.u32 %v5427_v49, 16 }
  0x60   : > { %v1177_v56 = vor.u32 %v1176_v39, %v1173_v33  ;;  %v5483_v59 = vld [vmem:[#allocation2 + $0x60] sm:$0xf]  ;;  %8220 = vst [vmem:[#allocation28_spill] sm:$0xff] %v5487_v9  ;;  %v640_v31 = vshll.u32 %v5427_v49, 16  ;;  %v645_v35 = vshrl.u32 %v5429_v24, 16  ;;  %v648_v44 = vshll.u32 %v5429_v24, 16 }
  0x61   : > { %8222 = vst [vmem:[#allocation30_spill] sm:$0xff] %v5491_v12  ;;  %v1219_v13 = vshrl.u32 %v5483_v59, 16  ;;  %v1222_v16 = vshll.u32 %v5483_v59, 16  ;;  %v1193_v20 = vsel %vm5290_vm13, %v1188_v41, %v1192_v47  ;;  %1743 = vrot.lane.b32.xlu1 %v5491_v12, %s5142_s24  ;;  %v639_v40 = vrot.slane %v637_v55, 7 }
  0x62   : > { %v1178_v14 = vrot.slane %v1177_v56, 4  ;;  %317 = vst [vmem:[#allocation2 + $0x5c] sm:$0x1] %v316_v42  ;;  %v1702_v37 = vunpack.c.l.b16 %v1193_v20  ;;  %v647_v43 = vrot.slane %v645_v35, 7  ;;  %v5505_v45 = vld [vmem:[#allocation2 + $0x64] sm:$0xf] }
  0x63   : > { %v1221_v32 = vrot.slane %v1219_v13, 4  ;;  %v1224_v33 = vrot.slane %v1222_v16, 5  ;;  %v266_v50 = vsel %vm5197_vm4, 0, %v265_v63  ;;  %v322_v53 = vsel %vm5204_vm5, 0, %v321_v7  ;;  %v271_v63 = vld [vmem:[#allocation2 + $0x84] sm:$0x1] }
  0x64   : > { %v1183_v36 = vsel %vm5290_vm13, %v1178_v14, %v1182_v34  ;;  %v671_v47 = vshrl.u32 %v5435_v0, 16  ;;  %v1228_v54 = vshll.u32 %v5505_v45, 16  ;;  %v1232_v56 = vshrl.u32 %v5505_v45, 16  ;;  %267 = vst [vmem:[#allocation2 + $0x6c] sm:$0x1] %v266_v50  ;;  %v486_v50 = vld [vmem:[%s5232_s23 + $0x90] sm:$0xff] }
  0x65   : > { %v1701_v39 = vunpack.c.l.b16 %v1183_v36  ;;  %v1225_v46 = vor.u32 %v1224_v33, %v1221_v32  ;;  %v642_v57 = vor.u32 %v640_v31, %v639_v40  ;;  %v643_v42 = vrot.slane %v639_v40, 4  ;;  %v327_v16 = vld [vmem:[#allocation2 + $0x8c] sm:$0x1]  ;;  %v899_v35 = vld [vmem:[#allocation2 + $0x54] sm:$0xf] }
  0x66   : > { %v5516_v58 = vld [vmem:[#allocation2 + $0x68] sm:$0x1]  ;;  %v650_v14 = vor.u32 %v648_v44, %v647_v43  ;;  %v652_v13 = vrot.slane %v647_v43, 4  ;;  %v1230_v7 = vrot.slane %v1228_v54, 5  ;;  %v1234_v20 = vrot.slane %v1232_v56, 4 }
  0x67   : > { %v5512_v34 = vpack.c.b16 %v1702_v37, %v1701_v39  ;;  %v1226_v41 = vrot.slane %v1225_v46, 4  ;;  %v1238_v55 = vshll.u32 %v5516_v58, 16  ;;  %v673_v31 = vrot.slane %v671_v47, 7  ;;  %323 = vst [vmem:[#allocation2 + $0x74] sm:$0x1] %v322_v53  ;;  %v487_v47 = vld [vmem:[%s5232_s23 + $0x98] sm:$0xff] }
  0x68   : > { %v651_v36 = vsel %vm5271_vm11, %v643_v42, %v650_v14  ;;  %v900_v37 = vsel %vm5281_vm12, %v642_v57, %v899_v35  ;;  %v674_v33 = vshll.u32 %v5435_v0, 16  ;;  %v679_v39 = vshrl.u32 %v5437_v2, 16  ;;  %v5534_v42 = vld [vmem:[#allocation2 + $0x78] sm:$0x1]  ;;  %v5536_v14 = vld [vmem:[#allocation2 + $0x80] sm:$0x1] }
  0x69   : > { %8223 = vst [vmem:[#allocation31_spill] sm:$0xff] %v5512_v34  ;;  %1749 = vrot.lane.b32.xlu0 %v5512_v34, %s5142_s24  ;;  %v903_v32 = vld [vmem:[#allocation2 + $0x5c] sm:$0x1]  ;;  %v1231_v40 = vsel %vm5290_vm13, %v1226_v41, %v1230_v7  ;;  %v1235_v43 = vor.u32 %v1234_v20, %v1230_v7  ;;  %v1240_v44 = vrot.slane %v1238_v55, 5  ;;  %v677_v53 = vrot.slane %v673_v31, 4 }
  0x6a   : > { %901 = vst [vmem:[#allocation2 + $0x54] sm:$0xf] %v900_v37  ;;  %v904_v46 = vsel %vm5197_vm4, %v652_v13, %v903_v32  ;;  %v1705_v54 = vunpack.c.l.b16 %v1231_v40  ;;  %v676_v56 = vor.u32 %v674_v33, %v673_v31  ;;  %v681_v57 = vrot.slane %v679_v39, 7  ;;  %v490_v39 = vld [vmem:[%s5232_s23 + $0xb0] sm:$0xff]  ;;  %v5115_v34 = vld [vmem:[#allocation2 + $0x18] sm:$0xf] }
  0x6b   : > { %902 = vst.msk [vmem:[#allocation2 + $0x58] sm:$0xf] %vm226_vm0, %v651_v36  ;;  %v1236_v35 = vrot.slane %v1235_v43, 4  ;;  %v682_v41 = vshll.u32 %v5437_v2, 16  ;;  %v272_v13 = vsel %vm5197_vm4, 0, %v271_v63  ;;  %v328_v7 = vsel %vm5204_vm5, 0, %v327_v16 }
  0x6c   : > { %905 = vst [vmem:[#allocation2 + $0x5c] sm:$0x1] %v904_v46  ;;  %v686_v20 = vrot.slane %v681_v57, 4  ;;  %v913_v55 = vld [vmem:[#allocation2 + $0x6c] sm:$0xf]  ;;  %v705_v31 = vshrl.u32 %v5487_v9, 16  ;;  %v5544_v36 = vpack.c.bf16 %v486_v50, %v486_v50  ;;  %v5546_v37 = vpack.c.bf16 %v487_v47, %v487_v47 }
  0x6d   : > { %273 = vst [vmem:[#allocation2 + $0x84] sm:$0x1] %v272_v13  ;;  %v1241_v32 = vsel %vm5290_vm13, %v1236_v35, %v1240_v44  ;;  %v684_v33 = vor.u32 %v682_v41, %v681_v57  ;;  %v914_v63 = vsel %vm5281_vm12, %v676_v56, %v913_v55  ;;  %v708_v16 = vshll.u32 %v5487_v9, 16  ;;  %v491_v47 = vld [vmem:[%s5232_s23 + $0xb8] sm:$0xff] }
  0x6e   : > { %8224 = vst [vmem:[#allocation32_spill] sm:$0xff] %v5544_v36  ;;  %v1706_v40 = vunpack.c.l.b16 %v1241_v32  ;;  %v707_v43 = vrot.slane %v705_v31, 7  ;;  %v713_v46 = vshrl.u32 %v5489_v10, 16  ;;  %v716_v50 = vshll.u32 %v5489_v10, 16  ;;  %v917_v44 = vld [vmem:[#allocation2 + $0x74] sm:$0x1] }
  0x6f   : > { %8225 = vst [vmem:[#allocation33_spill] sm:$0xff] %v5546_v37  ;;  %v685_v13 = vsel %vm5271_vm11, %v677_v53, %v684_v33  ;;  %v269_v56 = vsel %vm5197_vm4, 0, %v5534_v42  ;;  %v688_v35 = vshrl.u32 %v5544_v36, 16  ;;  %v918_v53 = vsel %vm5197_vm4, %v686_v20, %v917_v44  ;;  %v339_v2 = vld [vmem:[#allocation2 + $0xbc] sm:$0x1] }
  0x70   : > { %329 = vst [vmem:[#allocation2 + $0x8c] sm:$0x1] %v328_v7  ;;  %v5566_v41 = vpack.c.b16 %v1706_v40, %v1705_v54  ;;  %v710_v55 = vor.u32 %v708_v16, %v707_v43  ;;  %v711_v31 = vrot.slane %v707_v43, 4  ;;  %v5579_v54 = vpack.c.bf16 %v491_v47, %v491_v47 }
  0x71   : > { %915 = vst [vmem:[#allocation2 + $0x6c] sm:$0xf] %v914_v63  ;;  %v5568_v7 = vld [vmem:[#allocation2 + $0x54] sm:$0xf]  ;;  %v5577_v63 = vpack.c.bf16 %v490_v39, %v490_v39  ;;  %v715_v43 = vrot.slane %v713_v46, 7  ;;  %v691_v47 = vshll.u32 %v5544_v36, 16 }
  0x72   : > { %8226 = vst [vmem:[#allocation34_spill] sm:$0xff] %v5566_v41  ;;  %v5573_v32 = vld [vmem:[#allocation2 + $0x58] sm:$0xf]  ;;  %v1195_v42 = vshrl.u32 %v5568_v7, 16  ;;  %v1198_v33 = vshll.u32 %v5568_v7, 16  ;;  %1753 = vrot.lane.b32.xlu2 %v5566_v41, %s5142_s24  ;;  %v4792_v22 = vrot.slane %v5115_v34, 9 }
  0x73   : > { %916 = vst.msk [vmem:[#allocation2 + $0x70] sm:$0xf] %vm226_vm0, %v685_v13  ;;  %v5583_v40 = vld [vmem:[#allocation2 + $0x5c] sm:$0x1]  ;;  %v1204_v20 = vshll.u32 %v5573_v32, 16  ;;  %v1208_v16 = vshrl.u32 %v5573_v32, 16  ;;  %v718_v24 = vor.u32 %v716_v50, %v715_v43 }
  0x74   : > { %919 = vst [vmem:[#allocation2 + $0x74] sm:$0x1] %v918_v53  ;;  %v5587_v13 = vrot.slane %v688_v35, 7  ;;  %v1197_v44 = vrot.slane %v1195_v42, 4  ;;  %v1200_v57 = vrot.slane %v1198_v33, 5  ;;  %v1214_v39 = vshll.u32 %v5583_v40, 16 }
  0x75   : > { %8227 = vst [vmem:[#allocation35_spill] sm:$0xff] %v5577_v63  ;;  %v927_v53 = vld [vmem:[#allocation2 + $0x84] sm:$0xf]  ;;  %v1206_v27 = vrot.slane %v1204_v20, 5  ;;  %v1210_v25 = vrot.slane %v1208_v16, 4  ;;  %v720_v49 = vrot.slane %v715_v43, 4  ;;  %v719_v50 = vsel %vm5271_vm11, %v711_v31, %v718_v24 }
  0x76   : > { %8228 = vst [vmem:[#allocation36_spill] sm:$0xff] %v5579_v54  ;;  %v1201_v61 = vor.u32 %v1200_v57, %v1197_v44  ;;  %v1216_v21 = vrot.slane %v1214_v39, 5  ;;  %v928_v46 = vsel %vm5281_vm12, %v710_v55, %v927_v53  ;;  %v693_v35 = vor.u32 %v691_v47, %v5587_v13  ;;  %v274_v43 = vld [vmem:[#allocation2 + $0x90] sm:$0x1]  ;;  %v5117_v34 = vld [vmem:[#allocation2 + $0x20] sm:$0x1] }
  0x77   : > { %v931_v23 = vld [vmem:[#allocation2 + $0x8c] sm:$0x1]  ;;  %270 = vst [vmem:[#allocation2 + $0x78] sm:$0x1] %v269_v56  ;;  %v1211_v42 = vor.u32 %v1210_v25, %v1206_v27  ;;  %v694_v56 = vrot.slane %v5587_v13, 4  ;;  %v5607_v44 = vpack.c.bf16 %v494_v11, %v494_v11  ;;  %v275_v10 = vsel %vm5197_vm4, 0, %v274_v43 }
  0x78   : > { %v5592_v26 = vld [vmem:[#allocation2 + $0x6c] sm:$0xf]  ;;  %929 = vst [vmem:[#allocation2 + $0x84] sm:$0xf] %v928_v46  ;;  %v1202_v16 = vrot.slane %v1201_v61, 4  ;;  %v932_v55 = vsel %vm5197_vm4, %v720_v49, %v931_v23  ;;  %v696_v49 = vshrl.u32 %v5546_v37, 16 }
  0x79   : > { %v1243_v33 = vshrl.u32 %v5592_v26, 16  ;;  %v1246_v20 = vshll.u32 %v5592_v26, 16  ;;  %930 = vst.msk [vmem:[#allocation2 + $0x88] sm:$0xf] %vm226_vm0, %v719_v50  ;;  %v330_v25 = vld [vmem:[#allocation2 + $0x98] sm:$0x1] }
  0x7a   : > { %v5601_v57 = vld [vmem:[#allocation2 + $0x70] sm:$0xf]  ;;  %8229 = vst [vmem:[#allocation37_spill] sm:$0xff] %v5607_v44  ;;  %v1212_v39 = vrot.slane %v1211_v42, 4  ;;  %v1207_v31 = vsel %vm5290_vm13, %v1202_v16, %v1206_v27  ;;  %v698_v19 = vrot.slane %v696_v49, 7  ;;  %v6034_v62 = vld [vmem:[#allocation2 + $0x54] sm:$0xff] }
  0x7b   : > { %v5609_v53 = vld [vmem:[#allocation2 + $0x74] sm:$0x1]  ;;  %v1245_v47 = vrot.slane %v1243_v33, 4  ;;  %v1248_v24 = vrot.slane %v1246_v20, 5  ;;  %v1252_v61 = vshll.u32 %v5601_v57, 16  ;;  %v1256_v46 = vshrl.u32 %v5601_v57, 16 }
  0x7c   : > { %v1262_v23 = vshll.u32 %v5609_v53, 16  ;;  %933 = vst [vmem:[#allocation2 + $0x8c] sm:$0x1] %v932_v55  ;;  %v1217_v11 = vsel %vm5290_vm13, %v1212_v39, %v1216_v21  ;;  %v1703_v13 = vunpack.c.l.b16 %v1207_v31  ;;  %v8230_v33 = vsel %vm5204_vm5, 0, %v5536_v14 }
  0x7d   : > { %v1249_v42 = vor.u32 %v1248_v24, %v1245_v47  ;;  %v1254_v50 = vrot.slane %v1252_v61, 5  ;;  %326 = vst [vmem:[#allocation2 + $0x80] sm:$0x1] %v8230_v33  ;;  %v1704_v20 = vunpack.c.l.b16 %v1217_v11  ;;  %v1258_v27 = vrot.slane %v1256_v46, 4 }
  0x7e   : > { %v1264_v16 = vrot.slane %v1262_v23, 5  ;;  %v699_v55 = vshll.u32 %v5546_v37, 16  ;;  %v920_v4 = vld [vmem:[#allocation2 + $0x78] sm:$0xf]  ;;  %v331_v21 = vsel %vm5204_vm5, 0, %v330_v25  ;;  %v703_v14 = vrot.slane %v698_v19, 4 }
  0x7f   : > { %v1250_v5 = vrot.slane %v1249_v42, 4  ;;  %v5628_v39 = vpack.c.b16 %v1704_v20, %v1703_v13  ;;  %v1259_v47 = vor.u32 %v1258_v27, %v1254_v50  ;;  %v5630_v24 = vld [vmem:[#allocation2 + $0x84] sm:$0xf]  ;;  %v921_v61 = vsel %vm5281_vm12, %v693_v35, %v920_v4  ;;  %276 = vst [vmem:[#allocation2 + $0x90] sm:$0x1] %v275_v10 }
  0x80   : > { %v5636_v46 = vld [vmem:[#allocation2 + $0x88] sm:$0xf]  ;;  %v1291_v43 = vshrl.u32 %v5630_v24, 16  ;;  %v1294_v23 = vshll.u32 %v5630_v24, 16  ;;  %v701_v25 = vor.u32 %v699_v55, %v698_v19  ;;  %922 = vst [vmem:[#allocation2 + $0x78] sm:$0xf] %v921_v61 }
  0x81   : > { %8231 = vst [vmem:[#allocation38_spill] sm:$0xff] %v5628_v39  ;;  %v1255_v31 = vsel %vm5290_vm13, %v1250_v5, %v1254_v50  ;;  %1751 = vrot.lane.b32.xlu1 %v5628_v39, %s5142_s24  ;;  %v1260_v49 = vrot.slane %v1259_v47, 4  ;;  %v1300_v13 = vshll.u32 %v5636_v46, 16  ;;  %v1304_v4 = vshrl.u32 %v5636_v46, 16  ;;  %v5114_v39 = vld [vmem:[#allocation2 + $0x14] sm:$0x1] }
  0x82   : > { %v1707_v11 = vunpack.c.l.b16 %v1255_v31  ;;  %332 = vst [vmem:[#allocation2 + $0x98] sm:$0x1] %v331_v21  ;;  %v1293_v5 = vrot.slane %v1291_v43, 4  ;;  %v1296_v35 = vrot.slane %v1294_v23, 5  ;;  %v702_v42 = vsel %vm5271_vm11, %v694_v56, %v701_v25  ;;  %v280_v43 = vld [vmem:[#allocation2 + $0xa8] sm:$0x1] }
  0x83   : > { %v5644_v10 = vld [vmem:[#allocation2 + $0x8c] sm:$0x1]  ;;  %v722_v19 = vshrl.u32 %v5577_v63, 16  ;;  %v1265_v50 = vsel %vm5290_vm13, %v1260_v49, %v1264_v16  ;;  %v1302_v33 = vrot.slane %v1300_v13, 5  ;;  %v1306_v20 = vrot.slane %v1304_v4, 4 }
  0x84   : > { %v1310_v27 = vshll.u32 %v5644_v10, 16  ;;  %923 = vst.msk [vmem:[#allocation2 + $0x7c] sm:$0xf] %vm226_vm0, %v702_v42  ;;  %v1708_v55 = vunpack.c.l.b16 %v1265_v50  ;;  %v1297_v21 = vor.u32 %v1296_v35, %v1293_v5  ;;  %v924_v47 = vld [vmem:[#allocation2 + $0x80] sm:$0x1]  ;;  %v725_v31 = vshll.u32 %v5577_v63, 16 }
  0x85   : > { %v724_v61 = vrot.slane %v722_v19, 7  ;;  %v1307_v23 = vor.u32 %v1306_v20, %v1302_v33  ;;  %v925_v25 = vsel %vm5197_vm4, %v703_v14, %v924_v47  ;;  %v730_v16 = vshrl.u32 %v5579_v54, 16  ;;  %v336_v49 = vld [vmem:[#allocation2 + $0xb0] sm:$0x1] }
  0x86   : > { %v1312_v56 = vrot.slane %v1310_v27, 5  ;;  %v5657_v13 = vpack.c.b16 %v1708_v55, %v1707_v11  ;;  %v1298_v4 = vrot.slane %v1297_v21, 4  ;;  %926 = vst [vmem:[#allocation2 + $0x80] sm:$0x1] %v925_v25  ;;  %v934_v5 = vld [vmem:[#allocation2 + $0x90] sm:$0xf] }
  0x87   : > { %v727_v42 = vor.u32 %v725_v31, %v724_v61  ;;  %v728_v50 = vrot.slane %v724_v61, 4  ;;  %v1308_v35 = vrot.slane %v1307_v23, 4  ;;  %v5659_v19 = vld [vmem:[#allocation2 + $0x78] sm:$0xf]  ;;  %v732_v63 = vrot.slane %v730_v16, 7  ;;  %v492_v16 = vld [vmem:[%s5232_s23 + $0xc0] sm:$0xff] }
  0x88   : > { %8232 = vst [vmem:[#allocation39_spill] sm:$0xff] %v5657_v13  ;;  %v733_v20 = vshll.u32 %v5579_v54, 16  ;;  %v281_v14 = vsel %vm5197_vm4, 0, %v280_v43  ;;  %1755 = vrot.lane.b32.xlu0 %v5657_v13, %s5142_s24  ;;  %v1303_v11 = vsel %vm5290_vm13, %v1298_v4, %v1302_v33  ;;  %v1267_v27 = vshrl.u32 %v5659_v19, 16  ;;  %v495_v25 = vld [vmem:[%s5232_s23 + $0xd8] sm:$0xff] }
  0x89   : > { %v1270_v55 = vshll.u32 %v5659_v19, 16  ;;  %v935_v21 = vsel %vm5281_vm12, %v727_v42, %v934_v5  ;;  %v938_v47 = vld [vmem:[#allocation2 + $0x98] sm:$0x1]  ;;  %282 = vst [vmem:[#allocation2 + $0xa8] sm:$0x1] %v281_v14  ;;  %v1313_v61 = vsel %vm5290_vm13, %v1308_v35, %v1312_v56  ;;  %v1711_v31 = vunpack.c.l.b16 %v1303_v11  ;;  %v493_v42 = vld [vmem:[%s5232_s23 + $0xc8] sm:$0xff] }
  0x8a   : > { %v735_v43 = vor.u32 %v733_v20, %v732_v63  ;;  %v737_v23 = vrot.slane %v732_v63, 4  ;;  %936 = vst [vmem:[#allocation2 + $0x90] sm:$0xf] %v935_v21  ;;  %v1712_v33 = vunpack.c.l.b16 %v1313_v61  ;;  %v1269_v54 = vrot.slane %v1267_v27, 4  ;;  %v277_v27 = vld [vmem:[#allocation2 + $0x9c] sm:$0x1] }
  0x8b   : > { %v5676_v4 = vld [vmem:[#allocation2 + $0x7c] sm:$0xf]  ;;  %v1272_v9 = vrot.slane %v1270_v55, 5  ;;  %v337_v30 = vsel %vm5204_vm5, 0, %v336_v49  ;;  %v5690_v11 = vpack.c.bf16 %v495_v25, %v495_v25  ;;  %v756_v49 = vshrl.u32 %v5607_v44, 16 }
  0x8c   : > { %v1276_v5 = vshll.u32 %v5676_v4, 16  ;;  %v1280_v14 = vshrl.u32 %v5676_v4, 16  ;;  %v736_v56 = vsel %vm5271_vm11, %v728_v50, %v735_v43  ;;  %v939_v63 = vsel %vm5197_vm4, %v737_v23, %v938_v47  ;;  %338 = vst [vmem:[#allocation2 + $0xb0] sm:$0x1] %v337_v30  ;;  %v333_v43 = vld [vmem:[#allocation2 + $0xa4] sm:$0x1] }
  0x8d   : > { %v5687_v35 = vpack.c.b16 %v1712_v33, %v1711_v31  ;;  %v1273_v20 = vor.u32 %v1272_v9, %v1269_v54  ;;  %937 = vst.msk [vmem:[#allocation2 + $0x94] sm:$0xf] %vm226_vm0, %v736_v56  ;;  %v5693_v55 = vld [vmem:[#allocation2 + $0x80] sm:$0x1]  ;;  %v5695_v50 = vpack.c.bf16 %v492_v16, %v492_v16  ;;  %v5697_v47 = vpack.c.bf16 %v493_v42, %v493_v42 }
  0x8e   : > { %8234 = vst [vmem:[#allocation41_spill] sm:$0xff] %v5690_v11  ;;  %v1278_v21 = vrot.slane %v1276_v5, 5  ;;  %v1282_v61 = vrot.slane %v1280_v14, 4  ;;  %v1286_v9 = vshll.u32 %v5693_v55, 16  ;;  %v758_v54 = vrot.slane %v756_v49, 7  ;;  %v496_v42 = vld [vmem:[%s5232_s23 + $0xe0] sm:$0xff] }
  0x8f   : > { %8233 = vst [vmem:[#allocation40_spill] sm:$0xff] %v5687_v35  ;;  %1759 = vrot.lane.b32.xlu2 %v5687_v35, %s5142_s24  ;;  %v1274_v30 = vrot.slane %v1273_v20, 4  ;;  %v759_v31 = vshll.u32 %v5607_v44, 16  ;;  %v764_v25 = vshrl.u32 %v5690_v11, 16  ;;  %v767_v33 = vshll.u32 %v5690_v11, 16 }
  0x90   : > { %940 = vst [vmem:[#allocation2 + $0x98] sm:$0x1] %v939_v63  ;;  %v1283_v23 = vor.u32 %v1282_v61, %v1278_v21  ;;  %v948_v5 = vld [vmem:[#allocation2 + $0xa8] sm:$0xf]  ;;  %v278_v16 = vsel %vm5197_vm4, 0, %v277_v27  ;;  %v1288_v56 = vrot.slane %v1286_v9, 5 }
  0x91   : > { %8235 = vst [vmem:[#allocation42_spill] sm:$0xff] %v5695_v50  ;;  %v1279_v14 = vsel %vm5290_vm13, %v1274_v30, %v1278_v21  ;;  %v5710_v63 = vld [vmem:[#allocation2 + $0x90] sm:$0xf]  ;;  %v761_v20 = vor.u32 %v759_v31, %v758_v54  ;;  %v762_v49 = vrot.slane %v758_v54, 4  ;;  %v766_v37 = vrot.slane %v764_v25, 7 }
  0x92   : > { %8236 = vst [vmem:[#allocation43_spill] sm:$0xff] %v5697_v47  ;;  %v1284_v44 = vrot.slane %v1283_v23, 4  ;;  %v1709_v61 = vunpack.c.l.b16 %v1279_v14  ;;  %v1315_v29 = vshrl.u32 %v5710_v63, 16  ;;  %v1318_v11 = vshll.u32 %v5710_v63, 16 }
  0x93   : > { %279 = vst [vmem:[#allocation2 + $0x9c] sm:$0x1] %v278_v16  ;;  %v949_v27 = vsel %vm5281_vm12, %v761_v20, %v948_v5  ;;  %v952_v36 = vld [vmem:[#allocation2 + $0xb0] sm:$0x1]  ;;  %v334_v21 = vsel %vm5204_vm5, 0, %v333_v43  ;;  %v739_v30 = vshrl.u32 %v5695_v50, 16  ;;  %v5723_v16 = vpack.c.bf16 %v496_v42, %v496_v42 }
  0x94   : > { %v1289_v9 = vsel %vm5290_vm13, %v1284_v44, %v1288_v56  ;;  %v5721_v54 = vld [vmem:[#allocation2 + $0x94] sm:$0xf]  ;;  %v1317_v31 = vrot.slane %v1315_v29, 4  ;;  %v1320_v23 = vrot.slane %v1318_v11, 5  ;;  %950 = vst [vmem:[#allocation2 + $0xa8] sm:$0xf] %v949_v27  ;;  %v769_v43 = vor.u32 %v767_v33, %v766_v37 }
  0x95   : > { %8237 = vst [vmem:[#allocation44_spill] sm:$0xff] %v5723_v16  ;;  %v1710_v25 = vunpack.c.l.b16 %v1289_v9  ;;  %v1324_v5 = vshll.u32 %v5721_v54, 16  ;;  %v1328_v20 = vshrl.u32 %v5721_v54, 16  ;;  %v771_v56 = vrot.slane %v766_v37, 4  ;;  %v283_v9 = vld [vmem:[#allocation2 + $0xb4] sm:$0x1] }
  0x96   : > { %335 = vst [vmem:[#allocation2 + $0xa4] sm:$0x1] %v334_v21  ;;  %v1321_v52 = vor.u32 %v1320_v23, %v1317_v31  ;;  %v741_v51 = vrot.slane %v739_v30, 7  ;;  %v770_v27 = vsel %vm5271_vm11, %v762_v49, %v769_v43  ;;  %v742_v21 = vshll.u32 %v5695_v50, 16  ;;  %v497_v37 = vld [vmem:[%s5232_s23 + $0xe8] sm:$0xff] }
  0x97   : > { %v5725_v14 = vld [vmem:[#allocation2 + $0x98] sm:$0x1]  ;;  %v5730_v29 = vpack.c.b16 %v1710_v25, %v1709_v61  ;;  %v1326_v11 = vrot.slane %v1324_v5, 5  ;;  %v1330_v42 = vrot.slane %v1328_v20, 4  ;;  %951 = vst.msk [vmem:[#allocation2 + $0xac] sm:$0xf] %vm226_vm0, %v770_v27  ;;  %v953_v33 = vsel %vm5197_vm4, %v771_v56, %v952_v36 }
  0x98   : > { %v1334_v44 = vshll.u32 %v5725_v14, 16  ;;  %v1322_v0 = vrot.slane %v1321_v52, 4  ;;  %954 = vst [vmem:[#allocation2 + $0xb0] sm:$0x1] %v953_v33  ;;  %v745_v30 = vrot.slane %v741_v51, 4  ;;  %v747_v49 = vshrl.u32 %v5697_v47, 16 }
  0x99   : > { %8238 = vst [vmem:[#allocation45_spill] sm:$0xff] %v5730_v29  ;;  %1757 = vrot.lane.b32.xlu1 %v5730_v29, %s5142_s24  ;;  %v1331_v61 = vor.u32 %v1330_v42, %v1326_v11  ;;  %v750_v31 = vshll.u32 %v5697_v47, 16  ;;  %v744_v23 = vor.u32 %v742_v21, %v741_v51  ;;  %v284_v36 = vsel %vm5197_vm4, 0, %v283_v9  ;;  %v5111_v47 = vld [vmem:[#allocation2 + $0x8] sm:$0x1] }
  0x9a   : > { %v1336_v35 = vrot.slane %v1334_v44, 5  ;;  %v1327_v52 = vsel %vm5290_vm13, %v1322_v0, %v1326_v11  ;;  %v941_v25 = vld [vmem:[#allocation2 + $0x9c] sm:$0xf]  ;;  %v340_v5 = vsel %vm5204_vm5, 0, %v339_v2  ;;  %v749_v44 = vrot.slane %v747_v49, 7 }
  0x9b   : > { %v1332_v20 = vrot.slane %v1331_v61, 4  ;;  %v5749_v43 = vld [vmem:[#allocation2 + $0xa8] sm:$0xf]  ;;  %285 = vst [vmem:[#allocation2 + $0xb4] sm:$0x1] %v284_v36  ;;  %v5751_v56 = vpack.c.bf16 %v497_v37, %v497_v37  ;;  %v1713_v42 = vunpack.c.l.b16 %v1327_v52  ;;  %v942_v51 = vsel %vm5281_vm12, %v744_v23, %v941_v25 }
  0x9c   : > { %v1363_v27 = vshrl.u32 %v5749_v43, 16  ;;  %v1366_v0 = vshll.u32 %v5749_v43, 16  ;;  %341 = vst [vmem:[#allocation2 + $0xbc] sm:$0x1] %v340_v5  ;;  %v752_v9 = vor.u32 %v750_v31, %v749_v44  ;;  %v754_v33 = vrot.slane %v749_v44, 4 }
  0x9d   : > { %8239 = vst [vmem:[#allocation46_spill] sm:$0xff] %v5751_v56  ;;  %v945_v11 = vld [vmem:[#allocation2 + $0xa4] sm:$0x1]  ;;  %v1337_v2 = vsel %vm5290_vm13, %v1332_v20, %v1336_v35  ;;  %v773_v21 = vshrl.u32 %v5723_v16, 16  ;;  %v776_v52 = vshll.u32 %v5723_v16, 16  ;;  %v781_v35 = vshrl.u32 %v5751_v56, 16 }
  0x9e   : > { %943 = vst [vmem:[#allocation2 + $0x9c] sm:$0xf] %v942_v51  ;;  %v1714_v37 = vunpack.c.l.b16 %v1337_v2  ;;  %v1365_v61 = vrot.slane %v1363_v27, 4  ;;  %v1368_v49 = vrot.slane %v1366_v0, 5  ;;  %v5761_v36 = vld [vmem:[#allocation2 + $0xac] sm:$0xf]  ;;  %v753_v23 = vsel %vm5271_vm11, %v745_v30, %v752_v9 }
  0x9f   : > { %v946_v25 = vsel %vm5197_vm4, %v754_v33, %v945_v11  ;;  %v775_v5 = vrot.slane %v773_v21, 7  ;;  %v5770_v20 = vld [vmem:[#allocation2 + $0xb0] sm:$0x1]  ;;  %v1372_v27 = vshll.u32 %v5761_v36, 16  ;;  %v1376_v0 = vshrl.u32 %v5761_v36, 16 }
  0xa0   : > { %v5768_v31 = vpack.c.b16 %v1714_v37, %v1713_v42  ;;  %v1369_v44 = vor.u32 %v1368_v49, %v1365_v61  ;;  %944 = vst.msk [vmem:[#allocation2 + $0xa0] sm:$0xf] %vm226_vm0, %v753_v23  ;;  %v1382_v51 = vshll.u32 %v5770_v20, 16  ;;  %v783_v11 = vrot.slane %v781_v35, 7  ;;  %v5112_v29 = vld [vmem:[#allocation2 + $0xc] sm:$0xf] }
  0xa1   : > { %947 = vst [vmem:[#allocation2 + $0xa4] sm:$0x1] %v946_v25  ;;  %v778_v30 = vor.u32 %v776_v52, %v775_v5  ;;  %v779_v2 = vrot.slane %v775_v5, 4  ;;  %v1374_v9 = vrot.slane %v1372_v27, 5  ;;  %v1378_v33 = vrot.slane %v1376_v0, 4  ;;  %v8275_v48 = vld [vmem:[#allocation45_spill] sm:$0xff] }
  0xa2   : > { %8240 = vst [vmem:[#allocation47_spill] sm:$0xff] %v5768_v31  ;;  %1761 = vrot.lane.b32.xlu0 %v5768_v31, %s5142_s24  ;;  %v1370_v42 = vrot.slane %v1369_v44, 4  ;;  %v784_v21 = vshll.u32 %v5751_v56, 16  ;;  %v955_v37 = vld [vmem:[#allocation2 + $0xb4] sm:$0xf]  ;;  %v1384_v61 = vrot.slane %v1382_v51, 5 }
  0xa3   : > { %v788_v49 = vrot.slane %v783_v11, 4  ;;  %v956_v23 = vsel %vm5281_vm12, %v778_v30, %v955_v37  ;;  %v959_v16 = vld [vmem:[#allocation2 + $0xbc] sm:$0x1]  ;;  %v1379_v25 = vor.u32 %v1378_v33, %v1374_v9  ;;  %v5109_v37 = vld [vmem:[#allocation2] sm:$0xf]  ;;  %v1466_v50 = vrot.slane %v5111_v47, 5 }
  0xa4   : > { %v1375_v52 = vsel %vm5290_vm13, %v1370_v42, %v1374_v9  ;;  %v786_v35 = vor.u32 %v784_v21, %v783_v11  ;;  %957 = vst [vmem:[#allocation2 + $0xb4] sm:$0xf] %v956_v23  ;;  %v4790_v42 = vrot.slane %v5109_v37, 9  ;;  %v5110_v9 = vld [vmem:[#allocation2 + $0x4] sm:$0xf]  ;;  %v4791_v41 = vrot.slane %v5112_v29, 9 }
  0xa5   : > { %v5783_v5 = vld [vmem:[#allocation2 + $0x9c] sm:$0xf]  ;;  %v960_v0 = vsel %vm5197_vm4, %v788_v49, %v959_v16  ;;  %v1380_v51 = vrot.slane %v1379_v25, 4  ;;  %v1463_v33 = vrot.slane %v5110_v9, 5  ;;  %v1717_v56 = vunpack.c.l.b16 %v1375_v52 }
  0xa6   : > { %v1339_v44 = vshrl.u32 %v5783_v5, 16  ;;  %v1342_v27 = vshll.u32 %v5783_v5, 16  ;;  %v787_v30 = vsel %vm5271_vm11, %v779_v2, %v786_v35  ;;  %961 = vst [vmem:[#allocation2 + $0xbc] sm:$0x1] %v960_v0  ;;  %v1473_v13 = vrot.slane %v5114_v39, 5 }
  0xa7   : > { %v5791_v11 = vld [vmem:[#allocation2 + $0xa0] sm:$0xf]  ;;  %958 = vst.msk [vmem:[#allocation2 + $0xb8] sm:$0xf] %vm226_vm0, %v787_v30  ;;  %v1385_v2 = vsel %vm5290_vm13, %v1380_v51, %v1384_v61  ;;  %v1465_v0 = vrot.slane %v1463_v33, 4  ;;  %v1464_v9 = vsel %vm5796_vm1, %v4790_v42, %v1463_v33 }
  0xa8   : > { %v1341_v21 = vrot.slane %v1339_v44, 4  ;;  %v1344_v23 = vrot.slane %v1342_v27, 5  ;;  %v5802_v49 = vld [vmem:[#allocation2 + $0xa4] sm:$0x1]  ;;  %v1348_v25 = vshll.u32 %v5791_v11, 16  ;;  %v1352_v52 = vshrl.u32 %v5791_v11, 16 }
  0xa9   : > { %v1718_v35 = vunpack.c.l.b16 %v1385_v2  ;;  %v1358_v27 = vshll.u32 %v5802_v49, 16  ;;  %v1769_v42 = vunpack.c.l.b16 %v1464_v9 }
  0xaa   : > { %v1345_v44 = vor.u32 %v1344_v23, %v1341_v21  ;;  %v1350_v30 = vrot.slane %v1348_v25, 5  ;;  %v1354_v37 = vrot.slane %v1352_v52, 4  ;;  %v1467_v25 = vsel %vm5796_vm1, %v1465_v0, %v1466_v50  ;;  %v5113_v52 = vld [vmem:[#allocation2 + $0x10] sm:$0xf] }
  0xab   : > { %v5809_v31 = vpack.c.b16 %v1718_v35, %v1717_v56  ;;  %v1360_v51 = vrot.slane %v1358_v27, 5  ;;  %v5811_v3 = vld [vmem:[#allocation2 + $0xb4] sm:$0xf]  ;;  %v1770_v33 = vunpack.c.l.b16 %v1467_v25  ;;  %v1470_v29 = vrot.slane %v5113_v52, 5 }
  0xac   : > { %v1346_v61 = vrot.slane %v1345_v44, 4  ;;  %v1355_v2 = vor.u32 %v1354_v37, %v1350_v30  ;;  %v1387_v21 = vshrl.u32 %v5811_v3, 16  ;;  %v1390_v23 = vshll.u32 %v5811_v3, 16 }
  0xad   : > { %8243 = vst [vmem:[#allocation48_spill] sm:$0xff] %v5809_v31  ;;  %1765 = vrot.lane.b32.xlu2 %v5809_v31, %s5142_s24  ;;  %v5821_v56 = vld [vmem:[#allocation2 + $0xbc] sm:$0x1]  ;;  %v1472_v25 = vrot.slane %v1470_v29, 4 }
  0xae   : > { %v1351_v47 = vsel %vm5290_vm13, %v1346_v61, %v1350_v30  ;;  %v1356_v35 = vrot.slane %v1355_v2, 4  ;;  %v5823_v44 = vld [vmem:[#allocation2 + $0xb8] sm:$0xf]  ;;  %v1389_v27 = vrot.slane %v1387_v21, 4  ;;  %v1392_v37 = vrot.slane %v1390_v23, 5 }
  0xaf   : > { %v1715_v50 = vunpack.c.l.b16 %v1351_v47  ;;  %v1396_v0 = vshll.u32 %v5823_v44, 16  ;;  %v1400_v31 = vshrl.u32 %v5823_v44, 16  ;;  %v1406_v30 = vshll.u32 %v5821_v56, 16 }
  0xb0   : > { %v1361_v9 = vsel %vm5290_vm13, %v1356_v35, %v1360_v51  ;;  %v1393_v61 = vor.u32 %v1392_v37, %v1389_v27  ;;  %v1471_v2 = vsel %vm5796_vm1, %v4791_v41, %v1470_v29  ;;  %v1474_v47 = vsel %vm5796_vm1, %v1472_v25, %v1473_v13  ;;  %v5116_v35 = vld [vmem:[#allocation2 + $0x1c] sm:$0xf] }
  0xb1   : > { %v1716_v52 = vunpack.c.l.b16 %v1361_v9  ;;  %v1398_v21 = vrot.slane %v1396_v0, 5  ;;  %v1402_v23 = vrot.slane %v1400_v31, 4  ;;  %v1408_v8 = vrot.slane %v1406_v30, 5 }
  0xb2   : > { %v1394_v39 = vrot.slane %v1393_v61, 4  ;;  %v1771_v18 = vunpack.c.l.b16 %v1471_v2  ;;  %v1772_v51 = vunpack.c.l.b16 %v1474_v47  ;;  %v1477_v27 = vrot.slane %v5116_v35, 5  ;;  %v5121_v47 = vld [vmem:[#allocation2 + $0x3c] sm:$0xf] }
  0xb3   : > { %v5834_v60 = vpack.c.b16 %v1716_v52, %v1715_v50  ;;  %v1403_v12 = vor.u32 %v1402_v23, %v1398_v21  ;;  %v4793_v29 = vrot.slane %v5450_v15, 9  ;;  %v1484_v31 = vrot.slane %v5446_v28, 5 }
  0xb4   : > { %v1399_v41 = vsel %vm5290_vm13, %v1394_v39, %v1398_v21  ;;  %v5842_v37 = vpack.c.b16 %v1772_v51, %v1771_v18  ;;  %v1480_v50 = vrot.slane %v5117_v34, 5  ;;  %v1801_v30 = vpack.c.b16 %v1770_v33, %v1769_v42  ;;  %v5118_v18 = vld [vmem:[#allocation2 + $0x30] sm:$0xf]  ;;  %v5119_v33 = vld [vmem:[#allocation2 + $0x34] sm:$0xf] }
  0xb5   : > { %1763 = vrot.lane.b32.xlu1 %v5834_v60, %s5142_s24  ;;  %v1404_v13 = vrot.slane %v1403_v12, 4  ;;  %v1719_v0 = vunpack.c.l.b16 %v1399_v41  ;;  %v1479_v9 = vrot.slane %v1477_v27, 4  ;;  %v1486_v61 = vrot.slane %v1484_v31, 4  ;;  %v5120_v21 = vld [vmem:[#allocation2 + $0x38] sm:$0x1] }
  0xb6   : > { %1819 = vrot.lane.b32.xlu2 %v5842_v37, %s5143_s25  ;;  %v1478_v28 = vsel %vm5796_vm1, %v4792_v22, %v1477_v27  ;;  %v1487_v15 = vrot.slane %v5454_v38, 5  ;;  %v4794_v12 = vrot.slane %v5118_v18, 9  ;;  %v1485_v42 = vsel %vm5796_vm1, %v4793_v29, %v1484_v31  ;;  %v5122_v51 = vld [vmem:[#allocation2 + $0x40] sm:$0xf] }
  0xb7   : > { %v1409_v2 = vsel %vm5290_vm13, %v1404_v13, %v1408_v8  ;;  %v1491_v52 = vrot.slane %v5119_v33, 5  ;;  %v1494_v23 = vrot.slane %v5120_v21, 5  ;;  %v1481_v8 = vsel %vm5796_vm1, %v1479_v9, %v1480_v50 }
  0xb8   : > { %v1720_v25 = vunpack.c.l.b16 %v1409_v2  ;;  %v1488_v39 = vsel %vm5796_vm1, %v1486_v61, %v1487_v15  ;;  %v4795_v22 = vrot.slane %v5121_v47, 9  ;;  %v1498_v38 = vrot.slane %v5122_v51, 5  ;;  %v5123_v2 = vld [vmem:[#allocation2 + $0x44] sm:$0x1] }
  0xb9   : > { %v1492_v27 = vsel %vm5796_vm1, %v4794_v12, %v1491_v52  ;;  %v1493_v41 = vrot.slane %v1491_v52, 4  ;;  %v1773_v29 = vunpack.c.l.b16 %v1478_v28  ;;  %v1775_v31 = vunpack.c.l.b16 %v1485_v42  ;;  %v5124_v28 = vld [vmem:[#allocation2 + $0x48] sm:$0xf] }
  0xba   : > { %v5857_v35 = vpack.c.b16 %v1720_v25, %v1719_v0  ;;  %v1777_v13 = vunpack.c.l.b16 %v1492_v27  ;;  %v1500_v34 = vrot.slane %v1498_v38, 4  ;;  %v1774_v50 = vunpack.c.l.b16 %v1481_v8  ;;  %v5125_v25 = vld [vmem:[#allocation2 + $0x4c] sm:$0xf] }
  0xbb   : > { %v1776_v9 = vunpack.c.l.b16 %v1488_v39  ;;  %v1495_v61 = vsel %vm5796_vm1, %v1493_v41, %v1494_v23  ;;  %v1501_v15 = vrot.slane %v5123_v2, 5  ;;  %v1499_v18 = vsel %vm5796_vm1, %v4795_v22, %v1498_v38 }
  0xbc   : > { %1767 = vrot.lane.b32.xlu0 %v5857_v35, %s5142_s24  ;;  %v1778_v0 = vunpack.c.l.b16 %v1495_v61  ;;  %v4796_v12 = vrot.slane %v5124_v28, 9  ;;  %v1505_v42 = vrot.slane %v5125_v25, 5  ;;  %v1508_v33 = vrot.slane %v5465_v17, 5  ;;  %s5154_s24 = smov 72  }
  0xbd   : > { %1817 = vrot.lane.b32.xlu1 %v1801_v30, %s5143_s25  ;;  %v4797_v52 = vrot.slane %v5568_v7, 9  ;;  %v1512_v21 = vrot.slane %v5573_v32, 5  ;;  %v1515_v23 = vrot.slane %v5583_v40, 5  ;;  %v1502_v30 = vsel %vm5796_vm1, %v1500_v34, %v1501_v15 }
  0xbe   : > { %v5872_v8 = vpack.c.b16 %v1778_v0, %v1777_v13  ;;  %v1507_v39 = vrot.slane %v1505_v42, 4  ;;  %v5876_v47 = vpack.c.b16 %v1774_v50, %v1773_v29  ;;  %v5878_v22 = vpack.c.b16 %v1776_v9, %v1775_v31 }
  0xbf   : > { %v1513_v51 = vsel %vm5796_vm1, %v4797_v52, %v1512_v21  ;;  %v1514_v17 = vrot.slane %v1512_v21, 4  ;;  %v1779_v7 = vunpack.c.l.b16 %v1499_v18  ;;  %v1506_v32 = vsel %vm5796_vm1, %v4796_v12, %v1505_v42 }
  0xc0   : > { %1825 = vrot.lane.b32.xlu2 %v5872_v8, %s5143_s25  ;;  %v1783_v40 = vunpack.c.l.b16 %v1513_v51  ;;  %v1519_v38 = vrot.slane %v5505_v45, 5  ;;  %v1780_v27 = vunpack.c.l.b16 %v1502_v30  ;;  %v1509_v41 = vsel %vm5796_vm1, %v1507_v39, %v1508_v33 }
  0xc1   : > { %v1516_v29 = vsel %vm5796_vm1, %v1514_v17, %v1515_v23  ;;  %v4798_v31 = vrot.slane %v5483_v59, 9  ;;  %v1522_v50 = vrot.slane %v5516_v58, 5  ;;  %v1526_v9 = vrot.slane %v5601_v57, 5 }
  0xc2   : > { %v1784_v13 = vunpack.c.l.b16 %v1516_v29  ;;  %v1521_v34 = vrot.slane %v1519_v38, 4  ;;  %v1781_v61 = vunpack.c.l.b16 %v1506_v32  ;;  %v4799_v45 = vrot.slane %v5592_v26, 9 }
  0xc3   : > { %v4800_v2 = vrot.slane %v5659_v19, 9  ;;  %v1782_v15 = vunpack.c.l.b16 %v1509_v41  ;;  %v1528_v59 = vrot.slane %v1526_v9, 4  ;;  %v1529_v18 = vrot.slane %v5609_v53, 5 }
  0xc4   : > { %1821 = vrot.lane.b32.xlu0 %v5876_v47, %s5143_s25  ;;  %v5900_v0 = vpack.c.b16 %v1784_v13, %v1783_v40  ;;  %v1533_v58 = vrot.slane %v5676_v4, 5  ;;  %v1536_v57 = vrot.slane %v5693_v55, 5  ;;  %v5905_v28 = vpack.c.b16 %v1780_v27, %v1779_v7 }
  0xc5   : > { %1823 = vrot.lane.b32.xlu1 %v5878_v22, %s5143_s25  ;;  %v1520_v26 = vsel %vm5796_vm1, %v4798_v31, %v1519_v38  ;;  %v1523_v19 = vsel %vm5796_vm1, %v1521_v34, %v1522_v50  ;;  %v1527_v12 = vsel %vm5796_vm1, %v4799_v45, %v1526_v9  ;;  %v1540_v53 = vrot.slane %v5636_v46, 5 }
  0xc6   : > { %v1534_v25 = vsel %vm5796_vm1, %v4800_v2, %v1533_v58  ;;  %v1535_v42 = vrot.slane %v1533_v58, 4  ;;  %v5916_v4 = vpack.c.b16 %v1782_v15, %v1781_v61  ;;  %v1530_v55 = vsel %vm5796_vm1, %v1528_v59, %v1529_v18 }
  0xc7   : > { %v1789_v33 = vunpack.c.l.b16 %v1534_v25  ;;  %v1785_v52 = vunpack.c.l.b16 %v1520_v26  ;;  %v1786_v21 = vunpack.c.l.b16 %v1523_v19  ;;  %v1547_v30 = vrot.slane %v5721_v54, 5 }
  0xc8   : > { %1831 = vrot.lane.b32.xlu2 %v5900_v0, %s5143_s25  ;;  %v1537_v23 = vsel %vm5796_vm1, %v1535_v42, %v1536_v57  ;;  %v1787_v39 = vunpack.c.l.b16 %v1527_v12  ;;  %v4801_v46 = vrot.slane %v5630_v24, 9  ;;  %v4803_v17 = vrot.slane %v5783_v5, 9 }
  0xc9   : > { %v1790_v51 = vunpack.c.l.b16 %v1537_v23  ;;  %v1788_v7 = vunpack.c.l.b16 %v1530_v55  ;;  %v1542_v32 = vrot.slane %v1540_v53, 4  ;;  %v1543_v40 = vrot.slane %v5644_v10, 5  ;;  %v286_v23 = vld [vmem:[#allocation2 + $0xc0] sm:$0x1] }
  0xca   : > { %v1554_v38 = vrot.slane %v5791_v11, 5  ;;  %v4802_v54 = vrot.slane %v5710_v63, 9  ;;  %v1557_v24 = vrot.slane %v5802_v49, 5  ;;  %v1549_v41 = vrot.slane %v1547_v30, 4 }
  0xcb   : > { %v5933_v27 = vpack.c.b16 %v1790_v51, %v1789_v33  ;;  %v1550_v5 = vrot.slane %v5725_v14, 5  ;;  %v5940_v13 = vpack.c.b16 %v1786_v21, %v1785_v52  ;;  %v5942_v10 = vpack.c.b16 %v1788_v7, %v1787_v39  ;;  %v5986_v21 = vld [vmem:[#allocation2 + $0xc] sm:$0xff] }
  0xcc   : > { %1827 = vrot.lane.b32.xlu0 %v5905_v28, %s5143_s25  ;;  %v1555_v29 = vsel %vm5796_vm1, %v4803_v17, %v1554_v38  ;;  %v1556_v31 = vrot.slane %v1554_v38, 4  ;;  %v1541_v11 = vsel %vm5796_vm1, %v4801_v46, %v1540_v53  ;;  %v1544_v34 = vsel %vm5796_vm1, %v1542_v32, %v1543_v40  ;;  %v498_v51 = vld [vmem:[%s5232_s23 + $0xf0] sm:$0xff]  ;;  %v499_v46 = vld [vmem:[%s5232_s23 + $0xf8] sm:$0xff]  ;;  %s5153_s23 = smov 64  }
  0xcd   : > { %1829 = vrot.lane.b32.xlu1 %v5916_v4, %s5143_s25  ;;  %v1548_v14 = vsel %vm5796_vm1, %v4802_v54, %v1547_v30  ;;  %v1795_v49 = vunpack.c.l.b16 %v1555_v29  ;;  %v1561_v9 = vrot.slane %v5761_v36, 5  ;;  %v1551_v61 = vsel %vm5796_vm1, %v1549_v41, %v1550_v5  ;;  %v5988_v30 = vpop.permute.xlu2 %1745 }
  0xce   : > { %v1558_v63 = vsel %vm5796_vm1, %v1556_v31, %v1557_v24  ;;  %v1568_v45 = vrot.slane %v5823_v44, 5  ;;  %v1791_v2 = vunpack.c.l.b16 %v1541_v11  ;;  %v1792_v15 = vunpack.c.l.b16 %v1544_v34  ;;  %8244 = vst [vmem:[#allocation49_spill] sm:$0xff] %v5988_v30  ;;  %v6014_v31 = vld [vmem:[#allocation2 + $0x30] sm:$0xff] }
  0xcf   : > { %v1796_v50 = vunpack.c.l.b16 %v1558_v63  ;;  %v1793_v59 = vunpack.c.l.b16 %v1548_v14  ;;  %v4804_v18 = vrot.slane %v5749_v43, 9  ;;  %v1794_v58 = vunpack.c.l.b16 %v1551_v61  ;;  %8247 = vst [vmem:[#allocation52_spill] sm:$0xff] %v6014_v31 }
  0xd0   : > { %1837 = vrot.lane.b32.xlu2 %v5933_v27, %s5143_s25  ;;  %v1563_v36 = vrot.slane %v1561_v9, 4  ;;  %v1564_v26 = vrot.slane %v5770_v20, 5  ;;  %v4805_v19 = vrot.slane %v5811_v3, 9  ;;  %v1570_v44 = vrot.slane %v1568_v45, 4 }
  0xd1   : > { %v5963_v57 = vpack.c.b16 %v1796_v50, %v1795_v49  ;;  %v1571_v12 = vrot.slane %v5821_v56, 5  ;;  %v5968_v25 = vpack.c.b16 %v1792_v15, %v1791_v2  ;;  %v5970_v42 = vpack.c.b16 %v1794_v58, %v1793_v59  ;;  %v6017_v49 = vld [vmem:[#allocation2 + $0x18] sm:$0xff]  ;;  %v6038_v15 = vld [vmem:[#allocation2 + $0x48] sm:$0xff]  ;;  %v6050_v58 = vld [vmem:[#allocation2 + $0x60] sm:$0xff] }
  0xd2   : > { %v1562_v43 = vsel %vm5796_vm1, %v4804_v18, %v1561_v9  ;;  %v1565_v20 = vsel %vm5796_vm1, %v1563_v36, %v1564_v26  ;;  %v1569_v3 = vsel %vm5796_vm1, %v4805_v19, %v1568_v45  ;;  %v287_v39 = vsel %vm5197_vm4, 0, %v286_v23  ;;  %v6021_v9 = vld [vmem:[#allocation2 + $0x24] sm:$0xff]  ;;  %v6036_v2 = vld [vmem:[#allocation2 + $0x3c] sm:$0xff]  ;;  %v6052_v36 = vld [vmem:[#allocation2 + $0x6c] sm:$0xff]  ;;  %v6058_v26 = vpop.permute.xlu0 %1737 }
  0xd3   : > { %v1572_v56 = vsel %vm5796_vm1, %v1570_v44, %v1571_v12  ;;  %v1797_v53 = vunpack.c.l.b16 %v1562_v43  ;;  %v1798_v55 = vunpack.c.l.b16 %v1565_v20  ;;  %v1799_v33 = vunpack.c.l.b16 %v1569_v3  ;;  %288 = vst [vmem:[#allocation2 + $0xc0] sm:$0x1] %v287_v39  ;;  %v6048_v18 = vld [vmem:[#allocation2 + $0x78] sm:$0xff]  ;;  %v6066_v12 = vpop.permute.xlu1 %1741  ;;  %v6068_v43 = vld [vmem:[#allocation2 + $0x84] sm:$0xff]  ;;  %v6070_v20 = vld [vmem:[#allocation2 + $0x90] sm:$0xff] }
  0xd4   : > { %1833 = vrot.lane.b32.xlu0 %v5940_v13, %s5143_s25  ;;  %v1800_v52 = vunpack.c.l.b16 %v1572_v56  ;;  %v5996_v7 = vpack.c.bf16 %v498_v51, %v498_v51  ;;  %v5998_v32 = vpack.c.bf16 %v499_v46, %v499_v46  ;;  %8248 = vst [vmem:[#allocation53_spill] sm:$0xff] %v6021_v9  ;;  %v6062_v19 = vld [vmem:[#allocation2 + $0x9c] sm:$0xff] }
  0xd5   : > { %1835 = vrot.lane.b32.xlu1 %v5942_v10, %s5143_s25  ;;  %v5994_v17 = vpack.c.b16 %v1798_v55, %v1797_v53  ;;  %v6025_v61 = vpop.permute.xlu2 %1747  ;;  %8252 = vst [vmem:[#allocation57_spill] sm:$0xff] %v6068_v43  ;;  %v6084_v55 = vld [vmem:[#allocation2 + $0xa8] sm:$0xff]  ;;  %v8258_v39 = vld [vmem:[#allocation30_spill] sm:$0xff] }
  0xd6   : > { %8245 = vst [vmem:[#allocation50_spill] sm:$0xff] %v5996_v7  ;;  %v6000_v40 = vpack.c.b16 %v1800_v52, %v1799_v33  ;;  %v790_v38 = vshrl.u32 %v5996_v7, 16  ;;  %v798_v54 = vshrl.u32 %v5998_v32, 16  ;;  %v793_v41 = vshll.u32 %v5996_v7, 16  ;;  %v6086_v33 = vld [vmem:[#allocation2 + $0xb4] sm:$0xff] }
  0xd7   : > { %8246 = vst [vmem:[#allocation51_spill] sm:$0xff] %v5998_v32  ;;  %v801_v29 = vshll.u32 %v5998_v32, 16  ;;  %v8272_v32 = vld [vmem:[#allocation34_spill] sm:$0xff] }
  0xd8   : > { %1843 = vrot.lane.b32.xlu2 %v5963_v57, %s5143_s25  ;;  %v792_v24 = vrot.slane %v790_v38, 7  ;;  %v6009_v5 = vrot.slane %v798_v54, 7  ;;  %8249 = vst [vmem:[#allocation54_spill] sm:$0xff] %v6025_v61  ;;  %v8260_v38 = vld [vmem:[#allocation20_spill] sm:$0xff]  ;;  %v8261_v54 = vld [vmem:[#allocation19_spill] sm:$0xff] }
  0xd9   : > { %8255 = vst [vmem:[#allocation60_spill] sm:$0xff] %v6086_v33 }
  0xda   : > { %v795_v11 = vor.u32 %v793_v41, %v792_v24  ;;  %v796_v34 = vrot.slane %v792_v24, 4  ;;  %v803_v63 = vor.u32 %v801_v29, %v6009_v5  ;;  %v962_v14 = vld [vmem:[#allocation2 + $0xc0] sm:$0xf]  ;;  %v6080_v56 = vpop.permute.xlu0 %1739  ;;  %v8262_v24 = vld [vmem:[#allocation31_spill] sm:$0xff] }
  0xdb   : > { %v6090_v52 = vpop.permute.xlu1 %1743 }
  0xdc   : > { %1839 = vrot.lane.b32.xlu0 %v5968_v25, %s5143_s25  ;;  %v963_v50 = vsel %vm5281_vm12, %v795_v11, %v962_v14  ;;  %v804_v45 = vsel %vm5271_vm11, %v796_v34, %v803_v63  ;;  %8256 = vst [vmem:[#allocation61_spill] sm:$0xff] %v6090_v52  ;;  %v8265_v11 = vld [vmem:[#allocation18_spill] sm:$0xff]  ;;  %v8266_v34 = vld [vmem:[#allocation27_spill] sm:$0xff]  ;;  %vm2207_vm12 = vcmask 162816  }
  0xdd   : > { %1841 = vrot.lane.b32.xlu1 %v5970_v42, %s5143_s25  ;;  %964 = vst [vmem:[#allocation2 + $0xc0] sm:$0xf] %v963_v50  ;;  %v6042_v59 = vpop.permute.xlu2 %1753  ;;  %v8268_v14 = vld [vmem:[#allocation39_spill] sm:$0xff] }
  0xde   : > { %965 = vst.msk [vmem:[#allocation2 + $0xc4] sm:$0xf] %vm226_vm0, %v804_v45  ;;  %v8270_v45 = vld [vmem:[#allocation38_spill] sm:$0xff]  ;;  %vm2396_vm0 = vcmask 1041408  }
  0xdf   : > { %8250 = vst [vmem:[#allocation55_spill] sm:$0xff] %v6042_v59 }
  0xe0   : > { %1852 = vrot.lane.b32.xlu2 %v5986_v21, %s5144_s26 }
  0xe2   : > { %v6096_v23 = vpop.permute.xlu0 %1749 }
  0xe3   : > { %8257 = vst [vmem:[#allocation62_spill] sm:$0xff] %v6096_v23 }
  0xe4   : > { %1845 = vrot.lane.b32.xlu0 %v5994_v17, %s5143_s25 }
  0xe5   : > { %1847 = vrot.lane.b32.xlu1 %v6000_v40, %s5143_s25  ;;  %v6078_v3 = vld [vmem:[#allocation2 + $0xc0] sm:$0xff] }
  0xe6   : > { %8253 = vst [vmem:[#allocation58_spill] sm:$0xff] %v6078_v3  ;;  %v6187_v23 = vld [vmem:[#allocation2 + $0xc4] sm:$0xf] }
  0xe7   : > { %v1587_v61 = vshrl.u32 %v6187_v23, 16 }
  0xe8   : > { %1858 = vrot.lane.b32.xlu2 %v6014_v31, %s5144_s26 }
  0xe9   : > { %v6064_v44 = vpop.permute.xlu2 %1759 }
  0xea   : > { %8251 = vst [vmem:[#allocation56_spill] sm:$0xff] %v6064_v44  ;;  %v8276_v44 = vld [vmem:[#allocation40_spill] sm:$0xff] }
  0xec   : > { %1854 = vrot.lane.b32.xlu0 %v6017_v49, %s5144_s26 }
  0xed   : > { %1856 = vrot.lane.b32.xlu1 %v6021_v9, %s5144_s26 }
  0xf0   : > { %1864 = vrot.lane.b32.xlu2 %v6034_v62, %s5144_s26 }
  0xf3   : > { %v6102_v46 = vpop.permute.xlu1 %1751 }
  0xf4   : > { %1860 = vrot.lane.b32.xlu0 %v6036_v2, %s5144_s26  ;;  %8259 = vst [vmem:[#allocation30_spill] sm:$0xff] %v6102_v46 }
  0xf5   : > { %1862 = vrot.lane.b32.xlu1 %v6038_v15, %s5144_s26 }
  0xf8   : > { %1870 = vrot.lane.b32.xlu2 %v6048_v18, %s5144_s26 }
  0xfa   : > { %v6110_v41 = vpop.permute.xlu0 %1755 }
  0xfb   : > { %8263 = vst [vmem:[#allocation20_spill] sm:$0xff] %v6110_v41 }
  0xfc   : > { %1866 = vrot.lane.b32.xlu0 %v6050_v58, %s5144_s26 }
  0xfd   : > { %1868 = vrot.lane.b32.xlu1 %v6052_v36, %s5144_s26 }
 0x100   : > { %1876 = vrot.lane.b32.xlu2 %v6062_v19, %s5144_s26 }
 0x104   : > { %1872 = vrot.lane.b32.xlu0 %v6068_v43, %s5144_s26 }
 0x105   : > { %1874 = vrot.lane.b32.xlu1 %v6070_v20, %s5144_s26 }
 0x107   : > { %v6082_v53 = vpop.permute.xlu2 %1765 }
 0x108   : > { %8254 = vst [vmem:[#allocation59_spill] sm:$0xff] %v6082_v53  ;;  %1882 = vrot.lane.b32.xlu2 %v6078_v3, %s5144_s26 }
 0x10b   : > { %v6118_v63 = vpop.permute.xlu1 %1757 }
 0x10c   : > { %1878 = vrot.lane.b32.xlu0 %v6084_v55, %s5144_s26  ;;  %8267 = vst [vmem:[#allocation31_spill] sm:$0xff] %v6118_v63 }
 0x10d   : > { %1880 = vrot.lane.b32.xlu1 %v6086_v33, %s5144_s26 }
 0x110   : > { %1891 = vrot.lane.b32.xlu2 %v8258_v39, %s5145_s27  ;;  %v6100_v51 = vpop.permute.xlu2 %1819 }
 0x114   : > { %1887 = vrot.lane.b32.xlu0 %v8260_v38, %s5145_s27  ;;  %v6126_v38 = vpop.permute.xlu0 %1761 }
 0x115   : > { %1889 = vrot.lane.b32.xlu1 %v8261_v54, %s5145_s27  ;;  %8271 = vst [vmem:[#allocation27_spill] sm:$0xff] %v6126_v38  ;;  %v342_v38 = vld [vmem:[#allocation2 + $0xc8] sm:$0x1] }
 0x118   : > { %1897 = vrot.lane.b32.xlu2 %v8262_v24, %s5145_s27 }
 0x11a   : > { %v6112_v29 = vpop.permute.xlu2 %1825 }
 0x11b   : > { %8264 = vst [vmem:[#allocation19_spill] sm:$0xff] %v6112_v29 }
 0x11c   : > { %1893 = vrot.lane.b32.xlu0 %v8265_v11, %s5145_s27 }
 0x11d   : > { %1895 = vrot.lane.b32.xlu1 %v8266_v34, %s5145_s27 }
 0x120   : > { %1903 = vrot.lane.b32.xlu2 %v8268_v14, %s5145_s27 }
 0x122   : > { %v6122_v50 = vpop.permute.xlu2 %1831 }
 0x123   : > { %8269 = vst [vmem:[#allocation18_spill] sm:$0xff] %v6122_v50 }
 0x124   : > { %1899 = vrot.lane.b32.xlu0 %v8270_v45, %s5145_s27 }
 0x125   : > { %1901 = vrot.lane.b32.xlu1 %v8272_v32, %s5145_s27 }
 0x127   : > { %v6130_v7 = vpop.permute.xlu1 %1763 }
 0x128   : > { %8273 = vst [vmem:[#allocation39_spill] sm:$0xff] %v6130_v7  ;;  %1922 = vrot.lane.b32.xlu2 %v5842_v37, %s5146_s28  ;;  %v343_v7 = vsel %vm5204_vm5, 0, %v342_v38 }
 0x129   : > { %344 = vst [vmem:[#allocation2 + $0xc8] sm:$0x1] %v343_v7 }
 0x12a   : > { %v6134_v53 = vpop.permute.xlu2 %1837 }
 0x12b   : > { %8274 = vst [vmem:[#allocation38_spill] sm:$0xff] %v6134_v53  ;;  %v805_v53 = vrot.slane %v6009_v5, 4 }
 0x12c   : > { %1905 = vrot.lane.b32.xlu0 %v8275_v48, %s5145_s27 }
 0x12d   : > { %1907 = vrot.lane.b32.xlu1 %v8276_v44, %s5145_s27 }
 0x12e   : > { %v6140_v59 = vpop.permute.xlu0 %1767 }
 0x12f   : > { %8277 = vst [vmem:[#allocation34_spill] sm:$0xff] %v6140_v59  ;;  %v6142_v63 = vpop.permute.xlu1 %1817 }
 0x130   : > { %2027 = vrot.lane.b32.xlu2 %v5876_v47, %s5147_s29  ;;  %v966_v7 = vld [vmem:[#allocation2 + $0xc8] sm:$0x1] }
 0x131   : > { %v967_v41 = vsel %vm5197_vm4, %v805_v53, %v966_v7 }
 0x132   : > { %v6148_v37 = vpop.permute.xlu2 %1843  ;;  %968 = vst [vmem:[#allocation2 + $0xc8] sm:$0x1] %v967_v41 }
 0x133   : > { %8279 = vst [vmem:[#allocation45_spill] sm:$0xff] %v6148_v37  ;;  %v8281_v37 = vld [vmem:[#allocation47_spill] sm:$0xff] }
 0x134   : > { %1957 = vrot.lane.b32.xlu0 %v6017_v49, %s5148_s30 }
 0x135   : > { %1992 = vrot.lane.b32.xlu1 %v8261_v54, %s5149_s6 }
 0x136   : > { %v6155_v59 = vpop.permute.xlu0 %1821 }
 0x137   : > { %v6157_v38 = vpop.permute.xlu1 %1823 }
 0x138   : > { %8280 = vst [vmem:[#allocation40_spill] sm:$0xff] %v6157_v38  ;;  %1959 = vrot.lane.b32.xlu2 %v6021_v9, %s5148_s30 }
 0x139   : > { %v6205_v9 = vld [vmem:[#allocation2 + $0xc8] sm:$0x1] }
 0x13a   : > { %v6163_v5 = vpop.permute.xlu2 %1852 }
 0x13c   : > { %1909 = vrot.lane.b32.xlu0 %v8281_v37, %s5145_s27 }
 0x13d   : > { %1924 = vrot.lane.b32.xlu1 %v5876_v47, %s5146_s28  ;;  %v6185_v47 = vld [vmem:[#allocation2 + $0xc0] sm:$0xf] }
 0x13e   : > { %v6169_v54 = vpop.permute.xlu0 %1827 }
 0x13f   : > { %8282 = vst [vmem:[#allocation4_spill] sm:$0xff] %v6169_v54  ;;  %v6171_v46 = vpop.permute.xlu1 %1829  ;;  %v1577_v54 = vshll.u32 %v6185_v47, 16 }
 0x140   : > { %8283 = vst [vmem:[#allocation47_spill] sm:$0xff] %v6171_v46  ;;  %1911 = vrot.lane.b32.xlu2 %v5834_v60, %s5145_s27  ;;  %v1574_v46 = vshrl.u32 %v6185_v47, 16 }
 0x142   : > { %v6175_v53 = vpop.permute.xlu2 %1858  ;;  %v1576_v30 = vrot.slane %v1574_v46, 4 }
 0x143   : > { %8284 = vst [vmem:[#allocation63_spill] sm:$0xff] %v6175_v53  ;;  %v1589_v53 = vrot.slane %v1587_v61, 4 }
 0x144   : > { %1994 = vrot.lane.b32.xlu0 %v8258_v39, %s5149_s6  ;;  %v1583_v39 = vshll.u32 %v6187_v23, 16 }
 0x145   : > { %2029 = vrot.lane.b32.xlu1 %v5878_v22, %s5147_s29 }
 0x146   : > { %v6181_v41 = vpop.permute.xlu0 %1833  ;;  %v1585_v3 = vrot.slane %v1583_v39, 5 }
 0x147   : > { %8285 = vst [vmem:[#allocation64_spill] sm:$0xff] %v6181_v41  ;;  %v6183_v7 = vpop.permute.xlu1 %1835  ;;  %v8288_v41 = vld [vmem:[#allocation48_spill] sm:$0xff] }
 0x148   : > { %8286 = vst [vmem:[#allocation65_spill] sm:$0xff] %v6183_v7  ;;  %1961 = vrot.lane.b32.xlu2 %v6014_v31, %s5148_s30  ;;  %v1579_v31 = vrot.slane %v1577_v54, 5  ;;  %v1590_v52 = vor.u32 %v1589_v53, %v1585_v3 }
 0x14a   : > { %v6195_v29 = vpop.permute.xlu2 %1864  ;;  %v1591_v46 = vrot.slane %v1590_v52, 4 }
 0x14b   : > { %8287 = vst [vmem:[#allocation66_spill] sm:$0xff] %v6195_v29  ;;  %v1580_v29 = vor.u32 %v1579_v31, %v1576_v30 }
 0x14c   : > { %1913 = vrot.lane.b32.xlu0 %v8288_v41, %s5145_s27  ;;  %v1593_v41 = vshll.u32 %v6205_v9, 16 }
 0x14d   : > { %1926 = vrot.lane.b32.xlu1 %v5878_v22, %s5146_s28  ;;  %v1581_v61 = vrot.slane %v1580_v29, 4 }
 0x14e   : > { %v6201_v7 = vpop.permute.xlu0 %1839  ;;  %v1595_v54 = vrot.slane %v1593_v41, 5 }
 0x14f   : > { %8289 = vst [vmem:[#allocation67_spill] sm:$0xff] %v6201_v7  ;;  %v6203_v38 = vpop.permute.xlu1 %1841  ;;  %v1586_v30 = vsel %vm5290_vm13, %v1581_v61, %v1585_v3 }
 0x150   : > { %8290 = vst [vmem:[#allocation68_spill] sm:$0xff] %v6203_v38  ;;  %1915 = vrot.lane.b32.xlu2 %v5857_v35, %s5145_s27  ;;  %v1596_v31 = vsel %vm5290_vm13, %v1591_v46, %v1595_v54  ;;  %v1884_v52 = vunpack.c.l.b16 %v1586_v30 }
 0x151   : > { %v1885_v29 = vunpack.c.l.b16 %v1596_v31 }
 0x152   : > { %v6210_v33 = vpop.permute.xlu2 %1870 }
 0x154   : > { %1996 = vrot.lane.b32.xlu0 %v8265_v11, %s5149_s6 }
 0x155   : > { %2031 = vrot.lane.b32.xlu1 %v5872_v8, %s5147_s29 }
 0x156   : > { %v6216_v22 = vpop.permute.xlu0 %1845 }
 0x157   : > { %8291 = vst [vmem:[#allocation69_spill] sm:$0xff] %v6216_v22  ;;  %v6218_v39 = vpop.permute.xlu1 %1847 }
 0x158   : > { %8292 = vst [vmem:[#allocation70_spill] sm:$0xff] %v6218_v39  ;;  %1998 = vrot.lane.b32.xlu2 %v8266_v34, %s5149_s6  ;;  %v6236_v34 = vpack.c.b16 %v1885_v29, %v1884_v52 }
 0x15a   : > { %v6226_v11 = vpop.permute.xlu2 %1876 }
 0x15b   : > { %8293 = vst [vmem:[#allocation71_spill] sm:$0xff] %v6226_v11 }
 0x15c   : > { %1928 = vrot.lane.b32.xlu0 %v5872_v8, %s5146_s28 }
 0x15d   : > { %1963 = vrot.lane.b32.xlu1 %v6036_v2, %s5148_s30 }
 0x15e   : > { %v6232_v53 = vpop.permute.xlu0 %1854 }
 0x15f   : > { %v6234_v41 = vpop.permute.xlu1 %1856 }
 0x160   : > { %1930 = vrot.lane.b32.xlu2 %v5905_v28, %s5146_s28 }
 0x162   : > { %v6240_v3 = vpop.permute.xlu2 %1882 }
 0x163   : > { %8294 = vst [vmem:[#allocation72_spill] sm:$0xff] %v6240_v3 }
 0x164   : > { %2033 = vrot.lane.b32.xlu0 %v5905_v28, %s5147_s29 }
 0x165   : > { %1917 = vrot.lane.b32.xlu1 %v6236_v34, %s5145_s27 }
 0x166   : > { %v6246_v8 = vpop.permute.xlu0 %1860 }
 0x167   : > { %v6248_v61 = vpop.permute.xlu1 %1862 }
 0x168   : > { %2035 = vrot.lane.b32.xlu2 %v5916_v4, %s5147_s29 }
 0x16a   : > { %v6252_v46 = vpop.permute.xlu2 %1891 }
 0x16c   : > { %1965 = vrot.lane.b32.xlu0 %v6038_v15, %s5148_s30 }
 0x16d   : > { %2000 = vrot.lane.b32.xlu1 %v8262_v24, %s5149_s6 }
 0x16e   : > { %v6258_v54 = vpop.permute.xlu0 %1866 }
 0x16f   : > { %v6260_v28 = vpop.permute.xlu1 %1868 }
 0x170   : > { %1967 = vrot.lane.b32.xlu2 %v6034_v62, %s5148_s30 }
 0x172   : > { %v6264_v30 = vpop.permute.xlu2 %1897 }
 0x174   : > { %1932 = vrot.lane.b32.xlu0 %v5916_v4, %s5146_s28  ;;  %v2343_v4 = vld [vmem:[%s8110_s1 + $0x10] sm:$0x3] }
 0x175   : > { %1934 = vrot.lane.b32.xlu1 %v5900_v0, %s5146_s28  ;;  %v2357_v39 = vunpack.c.l.b16 %v2343_v4 }
 0x176   : > { %v6270_v31 = vpop.permute.xlu0 %1872 }
 0x177   : > { %v6272_v52 = vpop.permute.xlu1 %1874  ;;  %v2360_v22 = vpack.c.b16 %v2357_v39, %v2357_v39 }
 0x178   : > { %8295 = vst [vmem:[#allocation73_spill] sm:$0xff] %v6272_v52  ;;  %1936 = vrot.lane.b32.xlu2 %v5940_v13, %s5146_s28 }
 0x179   : > { %v2398_v38 = vsel %vm2396_vm0, %v2360_v22, 0  ;;  %vm2273_vm0 = vcmask 228352  }
 0x17a   : > { %v6276_v24 = vpop.permute.xlu2 %1903  ;;  %2405 = vmatpush.bf16.msra.mxu0 %v2398_v38  ;;  %5077 = vmatpush.bf16.msra.mxu3 %v2398_v38 }
 0x17c   : > { %2002 = vrot.lane.b32.xlu0 %v8270_v45, %s5149_s6  ;;  %v5053_v45 = vld [vmem:[%s8110_s1 + $0x8] sm:$0xff] }
 0x17d   : > { %2037 = vrot.lane.b32.xlu1 %v5900_v0, %s5147_s29 }
 0x17e   : > { %v6282_v29 = vpop.permute.xlu0 %1878  ;;  %2406 = vmatpush.bf16.msra.mxu0 %v5053_v45  ;;  %5078 = vmatpush.bf16.msra.mxu3 %v5053_v45 }
 0x17f   : > { %8296 = vst [vmem:[#allocation74_spill] sm:$0xff] %v6282_v29  ;;  %v6287_v3 = vpop.permute.xlu1 %1880 }
 0x180   : > { %8297 = vst [vmem:[#allocation75_spill] sm:$0xff] %v6287_v3  ;;  %2004 = vrot.lane.b32.xlu2 %v8272_v32, %s5149_s6  ;;  %v5052_v32 = vld [vmem:[%s8110_s1] sm:$0xff] }
 0x182   : > { %v1923_v11 = vpop.permute.xlu2 %1922  ;;  %2407 = vmatpush.bf16.msra.mxu0 %v5052_v32  ;;  %5079 = vmatpush.bf16.msra.mxu3 %v5052_v32 }
 0x184   : > { %1938 = vrot.lane.b32.xlu0 %v5942_v10, %s5146_s28 }
 0x185   : > { %1969 = vrot.lane.b32.xlu1 %v6050_v58, %s5148_s30 }
 0x186   : > { %v1888_v0 = vpop.permute.xlu0 %1887 }
 0x187   : > { %v1890_v4 = vpop.permute.xlu1 %1889 }
 0x188   : > { %1942 = vrot.lane.b32.xlu2 %v5968_v25, %s5146_s28 }
 0x18a   : > { %v2028_v22 = vpop.permute.xlu2 %2027 }
 0x18c   : > { %2039 = vrot.lane.b32.xlu0 %v5940_v13, %s5147_s29 }
 0x18d   : > { %1940 = vrot.lane.b32.xlu1 %v5933_v27, %s5146_s28 }
 0x18e   : > { %v6307_v38 = vpop.permute.xlu0 %1893 }
 0x18f   : > { %v6309_v39 = vpop.permute.xlu1 %1895 }
 0x190   : > { %2006 = vrot.lane.b32.xlu2 %v8268_v14, %s5149_s6  ;;  %v5034_v14 = vld [vmem:[#allocation2] sm:$0xff] }
 0x191   : > { %v2062_v7 = vsel %vm2059_vm8, %v5034_v14, %v6058_v26 }
 0x192   : > { %v1960_v45 = vpop.permute.xlu2 %1959 }
 0x194   : > { %1944 = vrot.lane.b32.xlu0 %v5970_v42, %s5146_s28 }
 0x195   : > { %1971 = vrot.lane.b32.xlu1 %v6052_v36, %s5148_s30 }
 0x196   : > { %v6317_v13 = vpop.permute.xlu0 %1899 }
 0x197   : > { %v6319_v3 = vpop.permute.xlu1 %1901 }
 0x198   : > { %1975 = vrot.lane.b32.xlu2 %v6068_v43, %s5148_s30 }
 0x19a   : > { %v6329_v29 = vpop.permute.xlu2 %1911 }
 0x19b   : > { %8298 = vst [vmem:[#allocation76_spill] sm:$0xff] %v6329_v29 }
 0x19c   : > { %2041 = vrot.lane.b32.xlu0 %v5942_v10, %s5147_s29  ;;  %v2110_v10 = vsel %vm2108_vm10, %v2062_v7, %v6142_v63 }
 0x19d   : > { %1946 = vrot.lane.b32.xlu1 %v5963_v57, %s5146_s28  ;;  %v2143_v43 = vsel %vm8183_vm9, %v2110_v10, %v6163_v5 }
 0x19e   : > { %v6327_v32 = vpop.permute.xlu0 %1905  ;;  %v2176_v29 = vsel %vm2174_vm14, %v2143_v43, %v1888_v0 }
 0x19f   : > { %v6331_v52 = vpop.permute.xlu1 %1907  ;;  %v2209_v26 = vsel %vm2207_vm12, %v2176_v29, %v1923_v11 }
 0x1a0   : > { %1973 = vrot.lane.b32.xlu2 %v6048_v18, %s5148_s30 }
 0x1a2   : > { %v1962_v10 = vpop.permute.xlu2 %1961 }
 0x1a4   : > { %2010 = vrot.lane.b32.xlu0 %v8276_v44, %s5149_s6 }
 0x1a5   : > { %2045 = vrot.lane.b32.xlu1 %v5968_v25, %s5147_s29  ;;  %v2065_v25 = vsel %vm2059_vm8, %v5986_v21, %v6080_v56  ;;  %v1602_v56 = vrot.slane %v6187_v23, 5  ;;  %v345_v23 = vld [vmem:[#allocation2 + $0xd4] sm:$0x1] }
 0x1a6   : > { %v1958_v14 = vpop.permute.xlu0 %1957  ;;  %v2112_v43 = vsel %vm2108_vm10, %v2065_v25, %v6100_v51 }
 0x1a7   : > { %v2242_v63 = vsel %vm2240_vm15, %v2209_v26, %v1958_v14  ;;  %v1993_v7 = vpop.permute.xlu1 %1992  ;;  %v2145_v29 = vsel %vm8183_vm9, %v2112_v43, %v6232_v53  ;;  %v4806_v53 = vrot.slane %v6185_v47, 9  ;;  %v1605_v14 = vrot.slane %v6205_v9, 5 }
 0x1a8   : > { %v2275_v5 = vsel %vm2273_vm0, %v2242_v63, %v1993_v7  ;;  %1977 = vrot.lane.b32.xlu2 %v6070_v20, %s5148_s30  ;;  %v2178_v26 = vsel %vm2174_vm14, %v2145_v29, %v1890_v4  ;;  %v1604_v4 = vrot.slane %v1602_v56, 4  ;;  %v346_v9 = vsel %vm5204_vm5, 0, %v345_v23 }
 0x1a9   : > { %v2308_v44 = vsel %vm2306_vm6, %v2275_v5, %v2028_v22  ;;  %v289_v22 = vld [vmem:[#allocation2 + $0xcc] sm:$0x1]  ;;  %347 = vst [vmem:[#allocation2 + $0xd4] sm:$0x1] %v346_v9 }
 0x1aa   : > { %4888 = vmatmul.msk.bf16.vlgmr.msra.gmra.mxu0 %vm2363_vm3, %v2308_v44 }
 0x1ac   : > { %2008 = vrot.lane.b32.xlu0 %v8275_v48, %s5149_s6  ;;  %v290_v48 = vsel %vm5197_vm4, 0, %v289_v22  ;;  %vm6518_vm4 = vmand %vm351_vm7, %vm236_vm2  ;;  %vm8320_vm2 = vsmask.f32 7938 }
 0x1ad   : > { %2043 = vrot.lane.b32.xlu1 %v5933_v27, %s5147_s29  ;;  %291 = vst [vmem:[#allocation2 + $0xcc] sm:$0x1] %v290_v48  ;;  %v6372_v27 = vpop.permute.xlu2 %1915  ;;  %vm6549_vm5 = vmand %vm351_vm7, %vm8320_vm2 }
 0x1ae   : > { %v6362_v11 = vpop.permute.xlu0 %1909  ;;  %vm8331_vm7 = vmmov %vm8320_vm2  ;;  %vm8332_vm2 = vcmask 60416  }
 0x1af   : > { %v1925_v0 = vpop.permute.xlu1 %1924 }
 0x1b0   : > { %v2211_v21 = vsel %vm2207_vm12, %v2178_v26, %v1925_v0  ;;  %1948 = vrot.lane.b32.xlu2 %v5994_v17, %s5146_s28 }
 0x1b1   : > { %v2244_v51 = vsel %vm2240_vm15, %v2211_v21, %v1960_v45 }
 0x1b4   : > { %2012 = vrot.lane.b32.xlu0 %v8281_v37, %s5149_s6  ;;  %v1606_v37 = vsel %vm5796_vm1, %v1604_v4, %v1605_v14  ;;  %v1022_v4 = vld [vmem:[#allocation2 + $0xd4] sm:$0x1] }
 0x1b5   : > { %2047 = vrot.lane.b32.xlu1 %v5970_v42, %s5147_s29  ;;  %v1603_v42 = vsel %vm5796_vm1, %v4806_v53, %v1602_v56  ;;  %v6393_v47 = vpop.permute.xlu2 %1998  ;;  %v1920_v44 = vunpack.c.l.b16 %v1606_v37 }
 0x1b6   : > { %v1995_v1 = vpop.permute.xlu0 %1994  ;;  %v1919_v45 = vunpack.c.l.b16 %v1603_v42  ;;  %v8300_v42 = vld [vmem:[#allocation48_spill] sm:$0xff] }
 0x1b7   : > { %v2277_v63 = vsel %vm2273_vm0, %v2244_v51, %v1995_v1  ;;  %v2030_v7 = vpop.permute.xlu1 %2029 }
 0x1b8   : > { %v2310_v5 = vsel %vm2306_vm6, %v2277_v63, %v2030_v7  ;;  %2014 = vrot.lane.b32.xlu2 %v5834_v60, %s5149_s6  ;;  %v2068_v60 = vsel %vm2059_vm8, %v6017_v49, %v6066_v12  ;;  %v6411_v49 = vpack.c.b16 %v1920_v44, %v1919_v45  ;;  %v8301_v45 = vld [vmem:[#allocation61_spill] sm:$0xff] }
 0x1b9   : > { %v2114_v25 = vsel %vm2108_vm10, %v2068_v60, %v6155_v59  ;;  %v8302_v44 = vld [vmem:[#allocation53_spill] sm:$0xff] }
 0x1ba   : > { %4889 = vmatmul.msk.bf16.gmra.mxu0 %vm2363_vm3, %v2310_v5  ;;  %v2147_v43 = vsel %vm8183_vm9, %v2114_v25, %v6234_v41  ;;  %v1627_v5 = vshll.u32 %v1022_v4, 16  ;;  %v2071_v25 = vsel %vm2059_vm8, %v8302_v44, %v8301_v45  ;;  %v8306_v45 = vld [vmem:[#allocation49_spill] sm:$0xff]  ;;  %v8307_v44 = vld [vmem:[#allocation52_spill] sm:$0xff] }
 0x1bb   : > { %v2180_v0 = vsel %vm2174_vm14, %v2147_v43, %v6252_v46  ;;  %v1021_v46 = vld [vmem:[#allocation2 + $0xd0] sm:$0xf] }
 0x1bc   : > { %1950 = vrot.lane.b32.xlu0 %v6000_v40, %s5146_s28  ;;  %v1617_v51 = vshll.u32 %v1021_v46, 16  ;;  %v1629_v9 = vrot.slane %v1627_v5, 5 }
 0x1bd   : > { %1979 = vrot.lane.b32.xlu1 %v6062_v19, %s5148_s30  ;;  %v1020_v19 = vld [vmem:[#allocation2 + $0xcc] sm:$0xf]  ;;  %v6420_v12 = vpop.permute.xlu2 %1930 }
 0x1be   : > { %v6404_v50 = vpop.permute.xlu0 %1913  ;;  %v1608_v26 = vshrl.u32 %v1020_v19, 16  ;;  %v1611_v48 = vshll.u32 %v1020_v19, 16  ;;  %v1619_v14 = vrot.slane %v1617_v51, 5 }
 0x1bf   : > { %v1927_v29 = vpop.permute.xlu1 %1926 }
 0x1c0   : > { %v2213_v22 = vsel %vm2207_vm12, %v2180_v0, %v1927_v29  ;;  %1981 = vrot.lane.b32.xlu2 %v6084_v55, %s5148_s30  ;;  %v1621_v55 = vshrl.u32 %v1021_v46, 16  ;;  %v1613_v53 = vrot.slane %v1611_v48, 5  ;;  %v8303_v0 = vld [vmem:[#allocation40_spill] sm:$0xff] }
 0x1c1   : > { %v2246_v59 = vsel %vm2240_vm15, %v2213_v22, %v1962_v10  ;;  %v8299_v10 = vld [vmem:[#allocation60_spill] sm:$0xff]  ;;  %v2116_v22 = vsel %vm2108_vm10, %v2071_v25, %v8303_v0  ;;  %v2074_v25 = vsel %vm2059_vm8, %v8307_v44, %v8306_v45 }
 0x1c2   : > { %v1623_v63 = vrot.slane %v1621_v55, 4 }
 0x1c4   : > { %2049 = vrot.lane.b32.xlu0 %v5963_v57, %s5147_s29  ;;  %v1610_v57 = vrot.slane %v1608_v26, 4  ;;  %v1624_v23 = vor.u32 %v1623_v63, %v1619_v14  ;;  %v8304_v26 = vld [vmem:[#allocation63_spill] sm:$0xff] }
 0x1c5   : > { %1952 = vrot.lane.b32.xlu1 %v6411_v49, %s5146_s28  ;;  %v2149_v48 = vsel %vm8183_vm9, %v2116_v22, %v8304_v26 }
 0x1c6   : > { %v1997_v41 = vpop.permute.xlu0 %1996  ;;  %v1614_v7 = vor.u32 %v1613_v53, %v1610_v57  ;;  %v1625_v60 = vrot.slane %v1624_v23, 4  ;;  %v1636_v57 = vrot.slane %v1021_v46, 5 }
 0x1c7   : > { %v2279_v21 = vsel %vm2273_vm0, %v2246_v59, %v1997_v41  ;;  %v2032_v56 = vpop.permute.xlu1 %2031 }
 0x1c8   : > { %v2312_v1 = vsel %vm2306_vm6, %v2279_v21, %v2032_v56  ;;  %1983 = vrot.lane.b32.xlu2 %v8299_v10, %s5148_s30  ;;  %v1615_v37 = vrot.slane %v1614_v7, 4  ;;  %v1630_v41 = vsel %vm5290_vm13, %v1625_v60, %v1629_v9  ;;  %v2182_v21 = vsel %vm2174_vm14, %v2149_v48, %v6307_v38  ;;  %v5051_v56 = vld [vmem:[#allocation2 + $0xcc] sm:$0xff]  ;;  %v8305_v10 = vld [vmem:[#allocation58_spill] sm:$0xff] }
 0x1c9   : > { %v1990_v55 = vunpack.c.l.b16 %v1630_v41  ;;  %v4807_v7 = vrot.slane %v1020_v19, 9  ;;  %v1638_v5 = vrot.slane %v1636_v57, 4 }
 0x1ca   : > { %4890 = vmatmul.msk.bf16.gmra.mxu0 %vm2363_vm3, %v2312_v1  ;;  %v1620_v29 = vsel %vm5290_vm13, %v1615_v37, %v1619_v14 }
 0x1cb   : > { %v1989_v51 = vunpack.c.l.b16 %v1620_v29  ;;  %v1637_v37 = vsel %vm5796_vm1, %v4807_v7, %v1636_v57 }
 0x1cc   : > { %2016 = vrot.lane.b32.xlu0 %v8300_v42, %s5149_s6 }
 0x1cd   : > { %2051 = vrot.lane.b32.xlu1 %v5994_v17, %s5147_s29  ;;  %v2036_v17 = vpop.permute.xlu2 %2035  ;;  %v1991_v14 = vpack.c.b16 %v1990_v55, %v1989_v51 }
 0x1ce   : > { %v1929_v43 = vpop.permute.xlu0 %1928 }
 0x1cf   : > { %v1964_v59 = vpop.permute.xlu1 %1963  ;;  %v2215_v1 = vsel %vm2207_vm12, %v2182_v21, %v1929_v43  ;;  %v8308_v43 = vld [vmem:[#allocation19_spill] sm:$0xff] }
 0x1d0   : > { %2018 = vrot.lane.b32.xlu2 %v5857_v35, %s5149_s6  ;;  %v2248_v53 = vsel %vm2240_vm15, %v2215_v1, %v1964_v59  ;;  %v1639_v35 = vrot.slane %v1022_v4, 5  ;;  %v2118_v29 = vsel %vm2108_vm10, %v2074_v25, %v8308_v43  ;;  %v362_v43 = vld [vmem:[#allocation3 + $0xc] sm:$0x1] }
 0x1d1   : > { %v2281_v38 = vsel %vm2273_vm0, %v2248_v53, %v6393_v47  ;;  %v2024_v47 = vunpack.c.l.b16 %v1637_v37  ;;  %v2151_v22 = vsel %vm8183_vm9, %v2118_v29, %v6246_v8 }
 0x1d2   : > { %v1640_v9 = vsel %vm5796_vm1, %v1638_v5, %v1639_v35  ;;  %v8311_v5 = vld [vmem:[#allocation62_spill] sm:$0xff]  ;;  %v8312_v35 = vld [vmem:[#allocation47_spill] sm:$0xff] }
 0x1d3   : > { %v2025_v19 = vunpack.c.l.b16 %v1640_v9  ;;  %v8313_v9 = vld [vmem:[#allocation66_spill] sm:$0xff] }
 0x1d4   : > { %1985 = vrot.lane.b32.xlu0 %v8305_v10, %s5148_s30 }
 0x1d5   : > { %1987 = vrot.lane.b32.xlu1 %v5051_v56, %s5148_s30  ;;  %v1968_v46 = vpop.permute.xlu2 %1967  ;;  %v2026_v0 = vpack.c.b16 %v2025_v19, %v2024_v47 }
 0x1d6   : > { %v2034_v63 = vpop.permute.xlu0 %2033 }
 0x1d7   : > { %v6453_v23 = vpop.permute.xlu1 %1917  ;;  %v2314_v42 = vsel %vm2306_vm6, %v2281_v38, %v2034_v63 }
 0x1d8   : > { %2022 = vrot.lane.b32.xlu2 %v1991_v14, %s5149_s6 }
 0x1da   : > { %4891 = vmatmul.msk.bf16.gmra.mxu0 %vm2363_vm3, %v2314_v42 }
 0x1dc   : > { %2053 = vrot.lane.b32.xlu0 %v6000_v40, %s5147_s29  ;;  %v2184_v40 = vsel %vm2174_vm14, %v2151_v22, %v6309_v39  ;;  %v8316_v22 = vld [vmem:[#allocation30_spill] sm:$0xff] }
 0x1dd   : > { %2020 = vrot.lane.b32.xlu1 %v6236_v34, %s5149_s6  ;;  %v2217_v34 = vsel %vm2207_vm12, %v2184_v40, %v6420_v12  ;;  %v1937_v59 = vpop.permute.xlu2 %1936  ;;  %v8309_v12 = vld [vmem:[#allocation54_spill] sm:$0xff]  ;;  %v2083_v40 = vsel %vm2059_vm8, %v6034_v62, %v8316_v22 }
 0x1de   : > { %v1966_v4 = vpop.permute.xlu0 %1965  ;;  %v2077_v55 = vsel %vm2059_vm8, %v6036_v2, %v8309_v12 }
 0x1df   : > { %v2001_v60 = vpop.permute.xlu1 %2000  ;;  %v2250_v41 = vsel %vm2240_vm15, %v2217_v34, %v1966_v4 }
 0x1e0   : > { %v2283_v26 = vsel %vm2273_vm0, %v2250_v41, %v2001_v60  ;;  %v8317_v41 = vld [vmem:[#allocation20_spill] sm:$0xff] }
 0x1e1   : > { %v2316_v8 = vsel %vm2306_vm6, %v2283_v26, %v2036_v17  ;;  %v2089_v26 = vsel %vm2059_vm8, %v6052_v36, %v8317_v41 }
 0x1e4   : > { %2055 = vrot.lane.b32.xlu0 %v6411_v49, %s5147_s29  ;;  %v8310_v49 = vld [vmem:[#allocation4_spill] sm:$0xff] }
 0x1e5   : > { %2057 = vrot.lane.b32.xlu1 %v2026_v0, %s5147_s29  ;;  %v2005_v39 = vpop.permute.xlu2 %2004  ;;  %v2120_v1 = vsel %vm2108_vm10, %v2077_v55, %v8310_v49 }
 0x1e6   : > { %v1933_v48 = vpop.permute.xlu0 %1932  ;;  %v2153_v57 = vsel %vm8183_vm9, %v2120_v1, %v6248_v61  ;;  %v2080_v61 = vsel %vm2059_vm8, %v6038_v15, %v8311_v5  ;;  %v365_v5 = vld [vmem:[#allocation3 + $0x18] sm:$0x1] }
 0x1e7   : > { %v1935_v21 = vpop.permute.xlu1 %1934  ;;  %v2186_v53 = vsel %vm2174_vm14, %v2153_v57, %v6264_v30  ;;  %v2122_v42 = vsel %vm2108_vm10, %v2080_v61, %v8312_v35  ;;  %v417_v57 = vld [vmem:[#allocation3 + $0x14] sm:$0x1] }
 0x1e8   : > { %v2219_v17 = vsel %vm2207_vm12, %v2186_v53, %v1933_v48  ;;  %v8318_v48 = vld [vmem:[#allocation18_spill] sm:$0xff] }
 0x1e9   : > { %v2252_v14 = vsel %vm2240_vm15, %v2219_v17, %v1968_v46  ;;  %v2155_v46 = vsel %vm8183_vm9, %v2122_v42, %v8313_v9  ;;  %v8323_v42 = vld [vmem:[#allocation31_spill] sm:$0xff] }
 0x1ea   : > { %4892 = vmatmul.msk.bf16.gmra.mxu0 %vm2363_vm3, %v2316_v8  ;;  %v2188_v47 = vsel %vm2174_vm14, %v2155_v46, %v6317_v13  ;;  %v363_v13 = vsel %vm6518_vm4, 0, %v362_v43  ;;  %v8324_v9 = vld [vmem:[#allocation55_spill] sm:$0xff] }
 0x1eb   : > { %v2221_v19 = vsel %vm2207_vm12, %v2188_v47, %v1935_v21  ;;  %364 = vst [vmem:[#allocation3 + $0xc] sm:$0x1] %v363_v13  ;;  %v2124_v21 = vsel %vm2108_vm10, %v2083_v40, %v8318_v48  ;;  %v2086_v46 = vsel %vm2059_vm8, %v6050_v58, %v8324_v9  ;;  %v8325_v47 = vld [vmem:[#allocation38_spill] sm:$0xff]  ;;  %v359_v58 = vld [vmem:[#allocation3] sm:$0x1] }
 0x1ed   : > { %v6497_v38 = vpop.permute.xlu2 %1942 }
 0x1ee   : > { %v2003_v56 = vpop.permute.xlu0 %2002 }
 0x1ef   : > { %v2038_v51 = vpop.permute.xlu1 %2037  ;;  %v2285_v2 = vsel %vm2273_vm0, %v2252_v14, %v2003_v56 }
 0x1f0   : > { %v2318_v7 = vsel %vm2306_vm6, %v2285_v2, %v2038_v51  ;;  %v2157_v51 = vsel %vm8183_vm9, %v2124_v21, %v6258_v54  ;;  %v414_v21 = vld [vmem:[#allocation3 + $0x8] sm:$0x1] }
 0x1f1   : > { %v2190_v62 = vsel %vm2174_vm14, %v2157_v51, %v6319_v3 }
 0x1f2   : > { %v2223_v55 = vsel %vm2207_vm12, %v2190_v62, %v1937_v59  ;;  %v8327_v62 = vld [vmem:[#allocation56_spill] sm:$0xff] }
 0x1f5   : > { %v2007_v4 = vpop.permute.xlu2 %2006 }
 0x1f6   : > { %v6494_v10 = vpop.permute.xlu0 %1938 }
 0x1f7   : > { %v1970_v63 = vpop.permute.xlu1 %1969 }
 0x1f8   : > { %v2254_v60 = vsel %vm2240_vm15, %v2221_v19, %v1970_v63 }
 0x1f9   : > { %v2287_v15 = vsel %vm2273_vm0, %v2254_v60, %v2005_v39  ;;  %v8319_v39 = vld [vmem:[#allocation65_spill] sm:$0xff] }
 0x1fa   : > { %4893 = vmatmul.msk.bf16.gmra.mxu0 %vm2363_vm3, %v2318_v7  ;;  %v2128_v56 = vsel %vm2108_vm10, %v2089_v26, %v8319_v39 }
 0x1fb   : > { %v2161_v12 = vsel %vm8183_vm9, %v2128_v56, %v6210_v33  ;;  %v415_v56 = vsel %vm6549_vm5, 0, %v414_v21 }
 0x1fc   : > { %v2194_v36 = vsel %vm2174_vm14, %v2161_v12, %v6327_v32  ;;  %v418_v32 = vsel %vm6549_vm5, 0, %v417_v57  ;;  %416 = vst [vmem:[#allocation3 + $0x8] sm:$0x1] %v415_v56 }
 0x1fd   : > { %v1976_v0 = vpop.permute.xlu2 %1975  ;;  %419 = vst [vmem:[#allocation3 + $0x14] sm:$0x1] %v418_v32 }
 0x1fe   : > { %v2040_v30 = vpop.permute.xlu0 %2039 }
 0x1ff   : > { %v1941_v37 = vpop.permute.xlu1 %1940  ;;  %v2320_v29 = vsel %vm2306_vm6, %v2287_v15, %v2040_v30  ;;  %v366_v30 = vsel %vm6518_vm4, 0, %v365_v5 }
 0x200   : > { %v2227_v1 = vsel %vm2207_vm12, %v2194_v36, %v1941_v37  ;;  %367 = vst [vmem:[#allocation3 + $0x18] sm:$0x1] %v366_v30  ;;  %v2092_v37 = vsel %vm2059_vm8, %v6048_v18, %v8323_v42  ;;  %v6585_v18 = vld [vmem:[%s8111_s2] ss:$0 sm:$0xff]  ;;  %v8328_v36 = vld [vmem:[#allocation57_spill] sm:$0xff] }
 0x201   : > { %v2260_v53 = vsel %vm2240_vm15, %v2227_v1, %v1976_v0  ;;  %v2130_v19 = vsel %vm2108_vm10, %v2092_v37, %v8325_v47  ;;  %v420_v0 = vld [vmem:[#allocation3 + $0x20] sm:$0x1] }
 0x202   : > { %v2163_v15 = vsel %vm8183_vm9, %v2130_v19, %v6270_v31  ;;  %v360_v31 = vsel %vm6518_vm4, 0, %v359_v58  ;;  %v421_v40 = vsel %vm6549_vm5, 0, %v420_v0 }
 0x203   : > { %v2196_v43 = vsel %vm2174_vm14, %v2163_v15, %v6331_v52  ;;  %361 = vst [vmem:[#allocation3] sm:$0x1] %v360_v31  ;;  %v2990_v19 = vld [vmem:[#allocation3 + $0x8] sm:$0x1] }
 0x204   : > { %422 = vst [vmem:[#allocation3 + $0x20] sm:$0x1] %v421_v40  ;;  %v3062_v31 = vshll.u32 %v2990_v19, 16  ;;  %v423_v40 = vld [vmem:[#allocation3 + $0x2c] sm:$0x1] }
 0x205   : > { %v1974_v33 = vpop.permute.xlu2 %1973 }
 0x206   : > { %v6513_v45 = vpop.permute.xlu0 %1944 }
 0x207   : > { %v1972_v44 = vpop.permute.xlu1 %1971 }
 0x208   : > { %v2256_v54 = vsel %vm2240_vm15, %v2223_v55, %v1972_v44  ;;  %v2095_v55 = vsel %vm2059_vm8, %v8328_v36, %v8327_v62 }
 0x209   : > { %v2289_v17 = vsel %vm2273_vm0, %v2256_v54, %v2007_v4  ;;  %v8326_v4 = vld [vmem:[#allocation64_spill] sm:$0xff]  ;;  %v8329_v54 = vld [vmem:[#allocation67_spill] sm:$0xff] }
 0x20a   : > { %4894 = vmatmul.msk.bf16.gmra.mxu0 %vm2363_vm3, %v2320_v29  ;;  %v2126_v60 = vsel %vm2108_vm10, %v2086_v46, %v8326_v4  ;;  %v2229_v29 = vsel %vm2207_vm12, %v2196_v43, %v6497_v38  ;;  %v2132_v57 = vsel %vm2108_vm10, %v2095_v55, %v8329_v54  ;;  %v2880_v54 = vld [vmem:[#allocation3 + $0x14] sm:$0x1] }
 0x20b   : > { %v2159_v44 = vsel %vm8183_vm9, %v2126_v60, %v6260_v28 }
 0x20c   : > { %v2192_v13 = vsel %vm2174_vm14, %v2159_v44, %v6276_v24 }
 0x20d   : > { %v1978_v35 = vpop.permute.xlu2 %1977  ;;  %v2225_v28 = vsel %vm2207_vm12, %v2192_v13, %v6494_v10 }
 0x20e   : > { %v2042_v34 = vpop.permute.xlu0 %2041  ;;  %v2262_v52 = vsel %vm2240_vm15, %v2229_v29, %v1978_v35 }
 0x20f   : > { %v6534_v8 = vpop.permute.xlu1 %1946  ;;  %v2322_v2 = vsel %vm2306_vm6, %v2289_v17, %v2042_v34  ;;  %v2258_v34 = vsel %vm2240_vm15, %v2225_v28, %v1974_v33  ;;  %v2988_v33 = vld [vmem:[#allocation3] sm:$0xf] }
 0x210   : > { %v3043_v30 = vshrl.u32 %v2988_v33, 16  ;;  %v3046_v35 = vshll.u32 %v2988_v33, 16 }
 0x212   : > { %v3045_v4 = vrot.slane %v3043_v30, 4  ;;  %v3048_v60 = vrot.slane %v3046_v35, 5 }
 0x214   : > { %v3049_v29 = vor.u32 %v3048_v60, %v3045_v4  ;;  %v371_v4 = vld [vmem:[#allocation3 + $0x30] sm:$0x1] }
 0x215   : > { %v6607_v51 = vpop.permute.xlu2 %1948 }
 0x216   : > { %v2011_v3 = vpop.permute.xlu0 %2010 }
 0x217   : > { %v2293_v59 = vsel %vm2273_vm0, %v2260_v53, %v2011_v3  ;;  %v2046_v14 = vpop.permute.xlu1 %2045  ;;  %v2989_v53 = vld [vmem:[#allocation3 + $0x4] sm:$0xf] }
 0x218   : > { %v2326_v63 = vsel %vm2306_vm6, %v2293_v59, %v2046_v14  ;;  %v8330_v3 = vld [vmem:[#allocation73_spill] sm:$0xff]  ;;  %v3052_v46 = vshll.u32 %v2989_v53, 16  ;;  %v3056_v15 = vshrl.u32 %v2989_v53, 16 }
 0x219   : > { %4897 = vmatmul.msk.bf16.vlgmr.msra.gmra.mxu3 %vm2363_vm3, %v2326_v63  ;;  %v2165_v17 = vsel %vm8183_vm9, %v2132_v57, %v8330_v3  ;;  %v368_v14 = vld [vmem:[#allocation3 + $0x24] sm:$0x1]  ;;  %vm6626_vm9 = vmand %vm8332_vm2, %vm8331_vm7 }
 0x21a   : > { %4895 = vmatmul.msk.bf16.gmra.mxu0 %vm2363_vm3, %v2322_v2  ;;  %v2198_v63 = vsel %vm2174_vm14, %v2165_v17, %v6362_v11  ;;  %v2876_v2 = vld [vmem:[#allocation3 + $0xc] sm:$0xf]  ;;  %v3054_v13 = vrot.slane %v3052_v46, 5  ;;  %v3058_v0 = vrot.slane %v3056_v15, 4  ;;  %vm8336_vm7 = vmmov %vm8332_vm2  ;;  %vm8340_vm2 = vcmask 97280  }
 0x21b   : > { %v2231_v11 = vsel %vm2207_vm12, %v2198_v63, %v6513_v45 }
 0x21d   : > { %v2015_v28 = vpop.permute.xlu2 %2014 }
 0x21e   : > { %v2009_v7 = vpop.permute.xlu0 %2008 }
 0x21f   : > { %v2044_v61 = vpop.permute.xlu1 %2043  ;;  %v2291_v26 = vsel %vm2273_vm0, %v2258_v34, %v2009_v7  ;;  %v3050_v34 = vrot.slane %v3049_v29, 4  ;;  %v2883_v29 = vld [vmem:[#allocation3 + $0x18] sm:$0xf] }
 0x220   : > { %v2324_v39 = vsel %vm2306_vm6, %v2291_v26, %v2044_v61  ;;  %v369_v61 = vsel %vm6518_vm4, 0, %v368_v14 }
 0x221   : > { %370 = vst [vmem:[#allocation3 + $0x24] sm:$0x1] %v369_v61 }
 0x226   : > { %v2013_v22 = vpop.permute.xlu0 %2012 }
 0x227   : > { %v2295_v24 = vsel %vm2273_vm0, %v2262_v52, %v2013_v22  ;;  %v2048_v41 = vpop.permute.xlu1 %2047  ;;  %v2409_v38 = vpop.f32.mrf.mxu0 }
 0x228   : > { %v2410_v48 = vadd.f32 %v6585_v18, %v2409_v38  ;;  %v2328_v10 = vsel %vm2306_vm6, %v2295_v24, %v2048_v41  ;;  %v3059_v24 = vor.u32 %v3058_v0, %v3054_v13  ;;  %v3064_v41 = vrot.slane %v3062_v31, 5 }
 0x229   : > { %4898 = vmatmul.msk.bf16.gmra.mxu3 %vm2363_vm3, %v2328_v10 }
 0x22a   : > { %v2489_v12 = vmax.f32 %v2410_v48, 0.0  ;;  %4896 = vmatmul.msk.bf16.gmra.mxu0 %vm2363_vm3, %v2324_v39  ;;  %v424_v48 = vsel %vm6549_vm5, 0, %v423_v40  ;;  %v3055_v39 = vsel %vm5290_vm13, %v3050_v34, %v3054_v13  ;;  %v3060_v56 = vrot.slane %v3059_v24, 4 }
 0x22b   : > { %425 = vst [vmem:[#allocation3 + $0x2c] sm:$0x1] %v424_v48  ;;  %v3702_v55 = vunpack.c.l.b16 %v3055_v39 }
 0x22c   : > { %v2521_v1 = vpack.c.bf16 %v2489_v12, %v2489_v12  ;;  %v3065_v57 = vsel %vm5290_vm13, %v3060_v56, %v3064_v41 }
 0x22d   : > { %v3703_v17 = vunpack.c.l.b16 %v3065_v57 }
 0x22e   : > { %v2554_v32 = vshrl.u32 %v2521_v1, 16  ;;  %v6617_v59 = vpop.permute.xlu0 %1950  ;;  %v2557_v37 = vshll.u32 %v2521_v1, 16 }
 0x22f   : > { %v1980_v7 = vpop.permute.xlu1 %1979  ;;  %v2411_v5 = vpop.f32.mrf.mxu0  ;;  %v3734_v61 = vpack.c.b16 %v3703_v17, %v3702_v55 }
 0x230   : > { %v2556_v42 = vrot.slane %v2554_v32, 7  ;;  %v2412_v9 = vadd.f32 %v6585_v18, %v2411_v5  ;;  %v2264_v43 = vsel %vm2240_vm15, %v2231_v11, %v1980_v7 }
 0x231   : > { %v2297_v45 = vsel %vm2273_vm0, %v2264_v43, %v2015_v28  ;;  %3750 = vrot.lane.b32.xlu2 %v3734_v61, %s5143_s25  ;;  %v372_v43 = vsel %vm6518_vm4, 0, %v371_v4  ;;  %v8339_v28 = vld [vmem:[#allocation71_spill] sm:$0xff]  ;;  %v5126_v61 = vld [vmem:[#allocation2 + $0x9c] sm:$0xff] }
 0x232   : > { %v2559_v44 = vor.u32 %v2557_v37, %v2556_v42  ;;  %v2490_v58 = vmax.f32 %v2412_v9, 0.0  ;;  %v2560_v1 = vrot.slane %v2556_v42, 4  ;;  %v1982_v42 = vpop.permute.xlu2 %1981  ;;  %v8337_v9 = vld [vmem:[#allocation27_spill] sm:$0xff]  ;;  %373 = vst [vmem:[#allocation3 + $0x30] sm:$0x1] %v372_v43 }
 0x233   : > { %v2098_v46 = vsel %vm2059_vm8, %v6070_v20, %v8337_v9 }
 0x234   : > { %v2877_v52 = vsel %vm6626_vm9, %v2559_v44, %v2876_v2  ;;  %v2522_v22 = vpack.c.bf16 %v2490_v58, %v2490_v58  ;;  %v8338_v58 = vld [vmem:[#allocation68_spill] sm:$0xff] }
 0x235   : > { %2878 = vst [vmem:[#allocation3 + $0xc] sm:$0xf] %v2877_v52  ;;  %v2134_v13 = vsel %vm2108_vm10, %v2098_v46, %v8338_v58 }
 0x236   : > { %v2562_v38 = vshrl.u32 %v2522_v22, 16  ;;  %v2050_v26 = vpop.permute.xlu0 %2049  ;;  %v2565_v10 = vshll.u32 %v2522_v22, 16  ;;  %v2167_v20 = vsel %vm8340_vm2, %v2134_v13, %v8339_v28 }
 0x237   : > { %v2414_v21 = vpop.f32.mrf.mxu0  ;;  %v2330_v36 = vsel %vm2306_vm6, %v2297_v45, %v2050_v26  ;;  %v6645_v32 = vpop.permute.xlu1 %1952  ;;  %v8341_v45 = vld [vmem:[#allocation76_spill] sm:$0xff] }
 0x238   : > { %v2564_v12 = vrot.slane %v2562_v38, 7  ;;  %v2415_v62 = vadd.f32 %v6585_v18, %v2414_v21  ;;  %v2200_v40 = vsel %vm2174_vm14, %v2167_v20, %v8341_v45 }
 0x239   : > { %4899 = vmatmul.msk.bf16.gmra.mxu3 %vm2363_vm3, %v2330_v36  ;;  %v2233_v34 = vsel %vm2207_vm12, %v2200_v40, %v6534_v8  ;;  %v426_v36 = vld [vmem:[#allocation3 + $0x38] sm:$0x1] }
 0x23a   : > { %v2567_v33 = vor.u32 %v2565_v10, %v2564_v12  ;;  %v2569_v53 = vrot.slane %v2564_v12, 4  ;;  %v2491_v3 = vmax.f32 %v2415_v62, 0.0  ;;  %v2266_v26 = vsel %vm2240_vm15, %v2233_v34, %v1982_v42 }
 0x23c   : > { %v2568_v63 = vsel %vm5271_vm11, %v2560_v1, %v2567_v33  ;;  %v2881_v2 = vsel %vm6518_vm4, %v2569_v53, %v2880_v54  ;;  %v2523_v7 = vpack.c.bf16 %v2491_v3, %v2491_v3  ;;  %v2991_v5 = vld [vmem:[#allocation3 + $0xc] sm:$0xf]  ;;  %v427_v53 = vsel %vm6549_vm5, 0, %v426_v36  ;;  %v6673_v3 = vpop.permute.xlu2 %1983 }
 0x23d   : > { %2879 = vst.msk [vmem:[#allocation3 + $0x10] sm:$0xf] %vm8336_vm7, %v2568_v63  ;;  %v3067_v30 = vshrl.u32 %v2991_v5, 16  ;;  %v3070_v35 = vshll.u32 %v2991_v5, 16  ;;  %v4905_v55 = vrot.slane %v2991_v5, 9 }
 0x23e   : > { %2882 = vst [vmem:[#allocation3 + $0x14] sm:$0x1] %v2881_v2  ;;  %v2571_v37 = vshrl.u32 %v2523_v7, 16  ;;  %v2017_v11 = vpop.permute.xlu0 %2016  ;;  %v2574_v15 = vshll.u32 %v2523_v7, 16 }
 0x23f   : > { %v2416_v19 = vpop.f32.mrf.mxu0  ;;  %v3069_v0 = vrot.slane %v3067_v30, 4  ;;  %v3072_v31 = vrot.slane %v3070_v35, 5  ;;  %v2052_v48 = vpop.permute.xlu1 %2051  ;;  %v2299_v12 = vsel %vm2273_vm0, %v2266_v26, %v2017_v11  ;;  %428 = vst [vmem:[#allocation3 + $0x38] sm:$0x1] %v427_v53  ;;  %v8342_v30 = vld [vmem:[#allocation39_spill] sm:$0xff] }
 0x240   : > { %v2573_v60 = vrot.slane %v2571_v37, 7  ;;  %v2417_v44 = vadd.f32 %v6585_v18, %v2416_v19  ;;  %v2332_v7 = vsel %vm2306_vm6, %v2299_v12, %v2052_v48  ;;  %v2101_v5 = vsel %vm2059_vm8, %v5126_v61, %v8342_v30  ;;  %v2887_v35 = vld [vmem:[#allocation3 + $0x20] sm:$0x1]  ;;  %v8344_v48 = vld [vmem:[#allocation74_spill] sm:$0xff]  ;;  %v8345_v53 = vld [vmem:[#allocation59_spill] sm:$0xff] }
 0x241   : > { %v3073_v21 = vor.u32 %v3072_v31, %v3069_v0  ;;  %v8346_v30 = vld [vmem:[#allocation69_spill] sm:$0xff] }
 0x242   : > { %v2576_v52 = vor.u32 %v2574_v15, %v2573_v60  ;;  %v2492_v22 = vmax.f32 %v2417_v44, 0.0  ;;  %v2577_v11 = vrot.slane %v2573_v60, 4 }
 0x243   : > { %v3074_v37 = vrot.slane %v3073_v21, 4 }
 0x244   : > { %v2884_v24 = vsel %vm6626_vm9, %v2576_v52, %v2883_v29  ;;  %v2524_v41 = vpack.c.bf16 %v2492_v22, %v2492_v22  ;;  %v2992_v38 = vld [vmem:[#allocation3 + $0x10] sm:$0xf]  ;;  %v8343_v52 = vld [vmem:[#allocation45_spill] sm:$0xff] }
 0x245   : > { %2885 = vst [vmem:[#allocation3 + $0x18] sm:$0xf] %v2884_v24  ;;  %v2993_v10 = vld [vmem:[#allocation3 + $0x14] sm:$0x1]  ;;  %v3076_v39 = vshll.u32 %v2992_v38, 16  ;;  %v3080_v56 = vshrl.u32 %v2992_v38, 16  ;;  %v2136_v60 = vsel %vm2108_vm10, %v2101_v5, %v8343_v52 }
 0x246   : > { %v2579_v62 = vshrl.u32 %v2524_v41, 16  ;;  %v3483_v1 = vrot.slane %v2992_v38, 5  ;;  %v3086_v33 = vshll.u32 %v2993_v10, 16  ;;  %v2582_v63 = vshll.u32 %v2524_v41, 16  ;;  %v6679_v42 = vpop.permute.xlu0 %1985  ;;  %v374_v38 = vld [vmem:[#allocation3 + $0x3c] sm:$0x1] }
 0x247   : > { %v2419_v8 = vpop.f32.mrf.mxu0  ;;  %v3078_v54 = vrot.slane %v3076_v39, 5  ;;  %v3082_v57 = vrot.slane %v3080_v56, 4  ;;  %v3486_v20 = vrot.slane %v2993_v10, 5  ;;  %v2169_v10 = vsel %vm8340_vm2, %v2136_v60, %v8344_v48 }
 0x248   : > { %v2581_v17 = vrot.slane %v2579_v62, 7  ;;  %v2420_v2 = vadd.f32 %v6585_v18, %v2419_v8  ;;  %v3484_v46 = vsel %vm5796_vm1, %v4905_v55, %v3483_v1  ;;  %v3088_v58 = vrot.slane %v3086_v33, 5  ;;  %v2890_v55 = vld [vmem:[#allocation3 + $0x24] sm:$0xf]  ;;  %v5127_v33 = vld [vmem:[#allocation2 + $0xa8] sm:$0xff] }
 0x249   : > { %4900 = vmatmul.msk.bf16.gmra.mxu3 %vm2363_vm3, %v2332_v7  ;;  %v3083_v9 = vor.u32 %v3082_v57, %v3078_v54  ;;  %v3079_v44 = vsel %vm5290_vm13, %v3074_v37, %v3078_v54  ;;  %v3485_v13 = vrot.slane %v3483_v1, 4  ;;  %v375_v39 = vsel %vm6518_vm4, 0, %v374_v38  ;;  %v2894_v38 = vld [vmem:[#allocation3 + $0x2c] sm:$0x1] }
 0x24a   : > { %v2584_v19 = vor.u32 %v2582_v63, %v2581_v17  ;;  %v2586_v4 = vrot.slane %v2581_v17, 4  ;;  %v2493_v15 = vmax.f32 %v2420_v2, 0.0  ;;  %v3704_v24 = vunpack.c.l.b16 %v3079_v44  ;;  %376 = vst [vmem:[#allocation3 + $0x3c] sm:$0x1] %v375_v39  ;;  %v2019_v2 = vpop.permute.xlu2 %2018  ;;  %v6724_v44 = vpop.permute.xlu1 %1987 }
 0x24b   : > { %v3084_v43 = vrot.slane %v3083_v9, 4  ;;  %v3487_v26 = vsel %vm5796_vm1, %v3485_v13, %v3486_v20  ;;  %v3784_v54 = vunpack.c.l.b16 %v3484_v46  ;;  %v2104_v17 = vsel %vm2059_vm8, %v5127_v33, %v8345_v53 }
 0x24c   : > { %v2585_v29 = vsel %vm5271_vm11, %v2577_v11, %v2584_v19  ;;  %v2888_v0 = vsel %vm6518_vm4, %v2586_v4, %v2887_v35  ;;  %v2525_v31 = vpack.c.bf16 %v2493_v15, %v2493_v15  ;;  %v2994_v28 = vld [vmem:[#allocation3 + $0x18] sm:$0xf]  ;;  %v3785_v57 = vunpack.c.l.b16 %v3487_v26 }
 0x24d   : > { %2886 = vst.msk [vmem:[#allocation3 + $0x1c] sm:$0xf] %vm8336_vm7, %v2585_v29  ;;  %v3089_v22 = vsel %vm5290_vm13, %v3084_v43, %v3088_v58  ;;  %v3091_v45 = vshrl.u32 %v2994_v28, 16  ;;  %v3094_v40 = vshll.u32 %v2994_v28, 16  ;;  %v2202_v63 = vsel %vm2174_vm14, %v2169_v10, %v6404_v50  ;;  %vm8348_vm7 = vmmov %vm8340_vm2 }
 0x24e   : > { %2889 = vst [vmem:[#allocation3 + $0x20] sm:$0x1] %v2888_v0  ;;  %v2588_v34 = vshrl.u32 %v2525_v31, 16  ;;  %v3705_v41 = vunpack.c.l.b16 %v3089_v22  ;;  %v2591_v12 = vshll.u32 %v2525_v31, 16  ;;  %v2138_v5 = vsel %vm2108_vm10, %v2104_v17, %v8346_v30  ;;  %v2054_v37 = vpop.permute.xlu0 %2053 }
 0x24f   : > { %v2421_v21 = vpop.f32.mrf.mxu0  ;;  %v3093_v1 = vrot.slane %v3091_v45, 4  ;;  %v3096_v8 = vrot.slane %v3094_v40, 5  ;;  %v2235_v35 = vsel %vm2207_vm12, %v2202_v63, %v6607_v51  ;;  %v6717_v9 = vpack.c.b16 %v3785_v57, %v3784_v54 }
 0x250   : > { %v6701_v56 = vrot.slane %v2588_v34, 7  ;;  %v2422_v62 = vadd.f32 %v6585_v18, %v2421_v21  ;;  %v6704_v36 = vpack.c.b16 %v3705_v41, %v3704_v24  ;;  %v2268_v46 = vsel %vm2240_vm15, %v2235_v35, %v6673_v3  ;;  %v429_v41 = vld [vmem:[#allocation3 + $0x44] sm:$0x1] }
 0x251   : > { %v4906_v4 = vrot.slane %v2994_v28, 9  ;;  %v2301_v15 = vsel %vm2273_vm0, %v2268_v46, %v2019_v2  ;;  %v3097_v51 = vor.u32 %v3096_v8, %v3093_v1  ;;  %v430_v57 = vsel %vm6549_vm5, 0, %v429_v41  ;;  %v377_v46 = vld [vmem:[#allocation3 + $0x48] sm:$0x1] }
 0x252   : > { %v2593_v7 = vor.u32 %v2591_v12, %v6701_v56  ;;  %v2494_v61 = vmax.f32 %v2422_v62, 0.0  ;;  %3752 = vrot.lane.b32.xlu0 %v6704_v36, %s5143_s25  ;;  %v2594_v29 = vrot.slane %v6701_v56, 4  ;;  %v2334_v3 = vsel %vm2306_vm6, %v2301_v15, %v2054_v37  ;;  %431 = vst [vmem:[#allocation3 + $0x44] sm:$0x1] %v430_v57 }
 0x253   : > { %v3098_v10 = vrot.slane %v3097_v51, 4  ;;  %vm8349_vm2 = vcmask 60416  }
 0x254   : > { %v2891_v50 = vsel %vm6626_vm9, %v2593_v7, %v2890_v55  ;;  %v2526_v11 = vpack.c.bf16 %v2494_v61, %v2494_v61  ;;  %v2995_v19 = vld [vmem:[#allocation3 + $0x1c] sm:$0xf]  ;;  %v8347_v55 = vld [vmem:[#allocation75_spill] sm:$0xff] }
 0x255   : > { %2892 = vst [vmem:[#allocation3 + $0x24] sm:$0xf] %v2891_v50  ;;  %v2996_v43 = vld [vmem:[#allocation3 + $0x20] sm:$0x1]  ;;  %v3490_v58 = vrot.slane %v2995_v19, 5  ;;  %v3100_v13 = vshll.u32 %v2995_v19, 16  ;;  %v2171_v1 = vsel %vm8348_vm7, %v2138_v5, %v8347_v55  ;;  %vm8351_vm7 = vmmov %vm8349_vm2 }
 0x256   : > { %v2596_v0 = vshrl.u32 %v2526_v11, 16  ;;  %v3104_v31 = vshrl.u32 %v2995_v19, 16  ;;  %v3493_v60 = vrot.slane %v2996_v43, 5  ;;  %v2599_v40 = vshll.u32 %v2526_v11, 16  ;;  %v2021_v11 = vpop.permute.xlu1 %2020 }
 0x257   : > { %v2424_v20 = vpop.f32.mrf.mxu0  ;;  %v3491_v52 = vsel %vm5796_vm1, %v4906_v4, %v3490_v58  ;;  %v3492_v28 = vrot.slane %v3490_v58, 4  ;;  %v3102_v22 = vrot.slane %v3100_v13, 5  ;;  %v3110_v21 = vshll.u32 %v2996_v43, 16 }
 0x258   : > { %v2598_v45 = vrot.slane %v2596_v0, 7  ;;  %v2425_v34 = vadd.f32 %v6585_v18, %v2424_v20  ;;  %v3106_v24 = vrot.slane %v3104_v31, 4  ;;  %v3786_v48 = vunpack.c.l.b16 %v3491_v52  ;;  %v2897_v0 = vld [vmem:[#allocation3 + $0x30] sm:$0xf]  ;;  %v2056_v20 = vpop.permute.xlu0 %2055 }
 0x259   : > { %4901 = vmatmul.msk.bf16.gmra.mxu3 %vm2363_vm3, %v2334_v3  ;;  %v3494_v26 = vsel %vm5796_vm1, %v3492_v28, %v3493_v60  ;;  %v3103_v8 = vsel %vm5290_vm13, %v3098_v10, %v3102_v22  ;;  %v3112_v61 = vrot.slane %v3110_v21, 5  ;;  %v2204_v35 = vsel %vm2174_vm14, %v2171_v1, %v6372_v27  ;;  %v432_v10 = vld [vmem:[#allocation3 + $0x50] sm:$0x1] }
 0x25a   : > { %v2601_v39 = vor.u32 %v2599_v40, %v2598_v45  ;;  %v2603_v56 = vrot.slane %v2598_v45, 4  ;;  %v2495_v12 = vmax.f32 %v2425_v34, 0.0  ;;  %v3787_v62 = vunpack.c.l.b16 %v3494_v26 }
 0x25b   : > { %v3107_v54 = vor.u32 %v3106_v24, %v3102_v22  ;;  %v2237_v50 = vsel %vm2207_vm12, %v2204_v35, %v6617_v59  ;;  %v3706_v15 = vunpack.c.l.b16 %v3103_v8  ;;  %v378_v43 = vsel %vm6518_vm4, 0, %v377_v46 }
 0x25c   : > { %v2602_v33 = vsel %vm5271_vm11, %v2594_v29, %v2601_v39  ;;  %v2895_v53 = vsel %vm6518_vm4, %v2603_v56, %v2894_v38  ;;  %v2527_v17 = vpack.c.bf16 %v2495_v12, %v2495_v12  ;;  %v6744_v63 = vpack.c.b16 %v3787_v62, %v3786_v48  ;;  %v2997_v2 = vld [vmem:[#allocation3 + $0x24] sm:$0xf]  ;;  %379 = vst [vmem:[#allocation3 + $0x48] sm:$0x1] %v378_v43 }
 0x25d   : > { %2893 = vst.msk [vmem:[#allocation3 + $0x28] sm:$0xf] %vm8349_vm2, %v2602_v33  ;;  %v3108_v7 = vrot.slane %v3107_v54, 4  ;;  %v3115_v30 = vshrl.u32 %v2997_v2, 16  ;;  %v3118_v5 = vshll.u32 %v2997_v2, 16  ;;  %v2270_v29 = vsel %vm2240_vm15, %v2237_v50, %v6679_v42 }
 0x25e   : > { %2896 = vst [vmem:[#allocation3 + $0x2c] sm:$0x1] %v2895_v53  ;;  %v2605_v37 = vshrl.u32 %v2527_v17, 16  ;;  %3834 = vrot.lane.b32.xlu2 %v6744_v63, %s5145_s27  ;;  %v2608_v27 = vshll.u32 %v2527_v17, 16  ;;  %v2303_v31 = vsel %vm2273_vm0, %v2270_v29, %v2021_v11  ;;  %v4907_v21 = vrot.slane %v2997_v2, 9 }
 0x25f   : > { %v2426_v19 = vpop.f32.mrf.mxu0  ;;  %v3113_v4 = vsel %vm5290_vm13, %v3108_v7, %v3112_v61  ;;  %v3117_v59 = vrot.slane %v3115_v30, 4  ;;  %v3120_v3 = vrot.slane %v3118_v5, 5  ;;  %v2336_v42 = vsel %vm2306_vm6, %v2303_v31, %v2056_v20  ;;  %v2901_v53 = vld [vmem:[#allocation3 + $0x38] sm:$0x1]  ;;  %v380_v31 = vld [vmem:[#allocation3 + $0x54] sm:$0x1] }
 0x260   : > { %v2607_v58 = vrot.slane %v2605_v37, 7  ;;  %v2427_v51 = vadd.f32 %v6585_v18, %v2426_v19  ;;  %v3707_v13 = vunpack.c.l.b16 %v3113_v4  ;;  %v433_v1 = vsel %vm6549_vm5, 0, %v432_v10 }
 0x261   : > { %v3121_v24 = vor.u32 %v3120_v3, %v3117_v59  ;;  %434 = vst [vmem:[#allocation3 + $0x50] sm:$0x1] %v433_v1  ;;  %v2058_v1 = vpop.permute.xlu1 %2057 }
 0x262   : > { %v2610_v52 = vor.u32 %v2608_v27, %v2607_v58  ;;  %v2496_v28 = vmax.f32 %v2427_v51, 0.0  ;;  %v6761_v60 = vpack.c.b16 %v3707_v13, %v3706_v15  ;;  %v2611_v56 = vrot.slane %v2607_v58, 4  ;;  %v5128_v27 = vld [vmem:[#allocation2 + $0xb4] sm:$0xff]  ;;  %v8350_v51 = vld [vmem:[#allocation34_spill] sm:$0xff] }
 0x263   : > { %v3122_v17 = vrot.slane %v3121_v24, 4  ;;  %v2107_v13 = vsel %vm2059_vm8, %v5128_v27, %v8350_v51  ;;  %vm8354_vm8 = vcmask 97280   ;;  %v2911_v27 = vld [vmem:[#allocation3 + $0x48] sm:$0xf] }
 0x264   : > { %v2898_v22 = vsel %vm6626_vm9, %v2610_v52, %v2897_v0  ;;  %v2528_v45 = vpack.c.bf16 %v2496_v28, %v2496_v28  ;;  %3754 = vrot.lane.b32.xlu1 %v6761_v60, %s5143_s25  ;;  %v2998_v40 = vld [vmem:[#allocation3 + $0x28] sm:$0xf] }
 0x265   : > { %2899 = vst [vmem:[#allocation3 + $0x30] sm:$0xf] %v2898_v22  ;;  %v2999_v34 = vld [vmem:[#allocation3 + $0x2c] sm:$0x1]  ;;  %v3124_v41 = vshll.u32 %v2998_v40, 16  ;;  %v3128_v38 = vshrl.u32 %v2998_v40, 16 }
 0x266   : > { %v2613_v26 = vshrl.u32 %v2528_v45, 16  ;;  %v3134_v48 = vshll.u32 %v2999_v34, 16  ;;  %v3497_v39 = vrot.slane %v2998_v40, 5  ;;  %v2616_v54 = vshll.u32 %v2528_v45, 16  ;;  %v8352_v52 = vld [vmem:[#allocation70_spill] sm:$0xff] }
 0x267   : > { %v2429_v12 = vpop.f32.mrf.mxu0  ;;  %v3126_v62 = vrot.slane %v3124_v41, 5  ;;  %v3130_v55 = vrot.slane %v3128_v38, 4  ;;  %v3500_v61 = vrot.slane %v2999_v34, 5  ;;  %v2140_v28 = vsel %vm2108_vm10, %v2107_v13, %v8352_v52  ;;  %v8353_v41 = vld [vmem:[#allocation72_spill] sm:$0xff] }
 0x268   : > { %v2615_v8 = vrot.slane %v2613_v26, 7  ;;  %v2430_v57 = vadd.f32 %v6585_v18, %v2429_v12  ;;  %v3498_v33 = vsel %vm5796_vm1, %v4907_v21, %v3497_v39  ;;  %v3499_v7 = vrot.slane %v3497_v39, 4  ;;  %v2904_v26 = vld [vmem:[#allocation3 + $0x3c] sm:$0xf]  ;;  %v2023_v12 = vpop.permute.xlu2 %2022 }
 0x269   : > { %4902 = vmatmul.msk.bf16.gmra.mxu3 %vm2363_vm3, %v2336_v42  ;;  %v3131_v2 = vor.u32 %v3130_v55, %v3126_v62  ;;  %v3136_v37 = vrot.slane %v3134_v48, 5  ;;  %v3127_v46 = vsel %vm5290_vm13, %v3122_v17, %v3126_v62  ;;  %v3788_v19 = vunpack.c.l.b16 %v3498_v33 }
 0x26a   : > { %v2618_v30 = vor.u32 %v2616_v54, %v2615_v8  ;;  %v2620_v5 = vrot.slane %v2615_v8, 4  ;;  %v2497_v35 = vmax.f32 %v2430_v57, 0.0  ;;  %v3501_v11 = vsel %vm5796_vm1, %v3499_v7, %v3500_v61  ;;  %v435_v8 = vld [vmem:[#allocation3 + $0x5c] sm:$0x1] }
 0x26b   : > { %v3132_v50 = vrot.slane %v3131_v2, 4  ;;  %v3789_v58 = vunpack.c.l.b16 %v3501_v11  ;;  %v3708_v59 = vunpack.c.l.b16 %v3127_v46  ;;  %v381_v45 = vsel %vm6518_vm4, 0, %v380_v31  ;;  %v2908_v2 = vld [vmem:[#allocation3 + $0x44] sm:$0x1] }
 0x26c   : > { %v2619_v4 = vsel %vm5271_vm11, %v2611_v56, %v2618_v30  ;;  %v2902_v15 = vsel %vm6518_vm4, %v2620_v5, %v2901_v53  ;;  %v2529_v43 = vpack.c.bf16 %v2497_v35, %v2497_v35  ;;  %382 = vst [vmem:[#allocation3 + $0x54] sm:$0x1] %v381_v45  ;;  %v2173_v38 = vsel %vm8354_vm8, %v2140_v28, %v8353_v41 }
 0x26d   : > { %2900 = vst.msk [vmem:[#allocation3 + $0x34] sm:$0xf] %vm8351_vm7, %v2619_v4  ;;  %v3137_v29 = vsel %vm5290_vm13, %v3132_v50, %v3136_v37  ;;  %v6787_v20 = vpack.c.b16 %v3789_v58, %v3788_v19  ;;  %v2206_v48 = vsel %vm2174_vm14, %v2173_v38, %v6453_v23  ;;  %v436_v54 = vsel %vm6549_vm5, 0, %v435_v8  ;;  %v383_v19 = vld [vmem:[#allocation3 + $0x60] sm:$0x1] }
 0x26e   : > { %2903 = vst [vmem:[#allocation3 + $0x38] sm:$0x1] %v2902_v15  ;;  %v2622_v0 = vshrl.u32 %v2529_v43, 16  ;;  %v3709_v3 = vunpack.c.l.b16 %v3137_v29  ;;  %v2625_v42 = vshll.u32 %v2529_v43, 16  ;;  %v2239_v39 = vsel %vm2207_vm12, %v2206_v48, %v6645_v32  ;;  %vm8355_vm12 = vmmov %vm8349_vm2 }
 0x26f   : > { %v2431_v22 = vpop.f32.mrf.mxu0  ;;  %v2272_v56 = vsel %vm2240_vm15, %v2239_v39, %v6724_v44  ;;  %437 = vst [vmem:[#allocation3 + $0x5c] sm:$0x1] %v436_v54  ;;  %v384_v58 = vsel %vm6518_vm4, 0, %v383_v19 }
 0x270   : > { %v2624_v40 = vrot.slane %v2622_v0, 7  ;;  %v2432_v34 = vadd.f32 %v6585_v18, %v2431_v22  ;;  %v6794_v24 = vpack.c.b16 %v3709_v3, %v3708_v59  ;;  %v2305_v57 = vsel %vm2273_vm0, %v2272_v56, %v2023_v12  ;;  %385 = vst [vmem:[#allocation3 + $0x60] sm:$0x1] %v384_v58  ;;  %v389_v59 = vld [vmem:[#allocation3 + $0x78] sm:$0x1]  ;;  %vm8357_vm0 = vmmov %vm8349_vm2 }
 0x271   : > { %v2338_v17 = vsel %vm2306_vm6, %v2305_v57, %v2058_v1  ;;  %v390_v31 = vsel %vm6518_vm4, 0, %v389_v59  ;;  %v386_v57 = vld [vmem:[#allocation3 + $0x6c] sm:$0x1]  ;;  %vm8359_vm7 = vmmov %vm8357_vm0 }
 0x272   : > { %v2627_v10 = vor.u32 %v2625_v42, %v2624_v40  ;;  %v2498_v21 = vmax.f32 %v2432_v34, 0.0  ;;  %3756 = vrot.lane.b32.xlu2 %v6794_v24, %s5143_s25  ;;  %v2628_v7 = vrot.slane %v2624_v40, 4  ;;  %391 = vst [vmem:[#allocation3 + $0x78] sm:$0x1] %v390_v31  ;;  %v2915_v42 = vld [vmem:[#allocation3 + $0x50] sm:$0x1]  ;;  %vm8360_vm8 = vmmov %vm8357_vm0 }
 0x273   : > { %v438_v34 = vld [vmem:[#allocation3 + $0x68] sm:$0x1]  ;;  %v2918_v54 = vld [vmem:[#allocation3 + $0x54] sm:$0xf]  ;;  %v447_v31 = vld [vmem:[#allocation3 + $0x8c] sm:$0x1] }
 0x274   : > { %v2905_v62 = vsel %vm6626_vm9, %v2627_v10, %v2904_v26  ;;  %v2530_v55 = vpack.c.bf16 %v2498_v21, %v2498_v21  ;;  %v439_v48 = vsel %vm6549_vm5, 0, %v438_v34 }
 0x275   : > { %2906 = vst [vmem:[#allocation3 + $0x3c] sm:$0xf] %v2905_v62  ;;  %v444_v62 = vld [vmem:[#allocation3 + $0x80] sm:$0x1] }
 0x276   : > { %v2630_v23 = vshrl.u32 %v2530_v55, 16  ;;  %v2633_v53 = vshll.u32 %v2530_v55, 16  ;;  %440 = vst [vmem:[#allocation3 + $0x68] sm:$0x1] %v439_v48  ;;  %v395_v48 = vld [vmem:[#allocation3 + $0x90] sm:$0x1] }
 0x277   : > { %v2434_v33 = vpop.f32.mrf.mxu0 }
 0x278   : > { %v2632_v32 = vrot.slane %v2630_v23, 7  ;;  %v2435_v44 = vadd.f32 %v6585_v18, %v2434_v33  ;;  %v445_v23 = vsel %vm6549_vm5, 0, %v444_v62  ;;  %v396_v62 = vsel %vm6518_vm4, 0, %v395_v48 }
 0x279   : > { %4903 = vmatmul.msk.bf16.gmra.mxu3 %vm2363_vm3, %v2338_v17  ;;  %vm8356_vm3 = vmmov %vm8349_vm2  ;;  %446 = vst [vmem:[#allocation3 + $0x80] sm:$0x1] %v445_v23  ;;  %v2939_v23 = vld [vmem:[#allocation3 + $0x78] sm:$0xf] }
 0x27a   : > { %v2635_v61 = vor.u32 %v2633_v53, %v2632_v32  ;;  %v2637_v30 = vrot.slane %v2632_v32, 4  ;;  %v2499_v5 = vmax.f32 %v2435_v44, 0.0  ;;  %v387_v53 = vsel %vm6518_vm4, 0, %v386_v57  ;;  %397 = vst [vmem:[#allocation3 + $0x90] sm:$0x1] %v396_v62  ;;  %vm8358_vm2 = vmmov %vm8357_vm0 }
 0x27b   : > { %388 = vst [vmem:[#allocation3 + $0x6c] sm:$0x1] %v387_v53 }
 0x27c   : > { %v2636_v35 = vsel %vm5271_vm11, %v2628_v7, %v2635_v61  ;;  %v2909_v37 = vsel %vm6518_vm4, %v2637_v30, %v2908_v2  ;;  %v2531_v46 = vpack.c.bf16 %v2499_v5, %v2499_v5  ;;  %v392_v2 = vld [vmem:[#allocation3 + $0x84] sm:$0x1] }
 0x27d   : > { %2907 = vst.msk [vmem:[#allocation3 + $0x40] sm:$0xf] %vm8355_vm12, %v2636_v35  ;;  %v393_v61 = vsel %vm6518_vm4, 0, %v392_v2  ;;  %vm8361_vm12 = vmmov %vm8357_vm0 }
 0x27e   : > { %2910 = vst [vmem:[#allocation3 + $0x44] sm:$0x1] %v2909_v37  ;;  %v2639_v50 = vshrl.u32 %v2531_v46, 16  ;;  %v2642_v15 = vshll.u32 %v2531_v46, 16 }
 0x27f   : > { %v2436_v11 = vpop.f32.mrf.mxu0  ;;  %394 = vst [vmem:[#allocation3 + $0x84] sm:$0x1] %v393_v61 }
 0x280   : > { %v2641_v4 = vrot.slane %v2639_v50, 7  ;;  %v2437_v43 = vadd.f32 %v6585_v18, %v2436_v11  ;;  %v2922_v50 = vld [vmem:[#allocation3 + $0x5c] sm:$0x1]  ;;  %v441_v11 = vld [vmem:[#allocation3 + $0x74] sm:$0x1] }
 0x282   : > { %v2644_v51 = vor.u32 %v2642_v15, %v2641_v4  ;;  %v2500_v13 = vmax.f32 %v2437_v43, 0.0  ;;  %v2645_v40 = vrot.slane %v2641_v4, 4  ;;  %v442_v43 = vsel %vm6549_vm5, 0, %v441_v11 }
 0x283   : > { %443 = vst [vmem:[#allocation3 + $0x74] sm:$0x1] %v442_v43  ;;  %v6871_v43 = vld [vmem:[#allocation3 + $0x38] sm:$0x1] }
 0x284   : > { %v2912_v29 = vsel %vm6626_vm9, %v2644_v51, %v2911_v27  ;;  %v2532_v0 = vpack.c.bf16 %v2500_v13, %v2500_v13 }
 0x285   : > { %2913 = vst [vmem:[#allocation3 + $0x48] sm:$0xf] %v2912_v29 }
 0x286   : > { %v2647_v3 = vshrl.u32 %v2532_v0, 16  ;;  %v2650_v22 = vshll.u32 %v2532_v0, 16 }
 0x287   : > { %v2439_v52 = vpop.f32.mrf.mxu0 }
 0x288   : > { %v2649_v28 = vrot.slane %v2647_v3, 7  ;;  %v2440_v45 = vadd.f32 %v6585_v18, %v2439_v52 }
 0x28a   : > { %v2652_v41 = vor.u32 %v2650_v22, %v2649_v28  ;;  %v2654_v38 = vrot.slane %v2649_v28, 4  ;;  %v2501_v26 = vmax.f32 %v2440_v45, 0.0  ;;  %v448_v45 = vsel %vm6549_vm5, 0, %v447_v31 }
 0x28b   : > { %449 = vst [vmem:[#allocation3 + $0x8c] sm:$0x1] %v448_v45 }
 0x28c   : > { %v2653_v10 = vsel %vm5271_vm11, %v2645_v40, %v2652_v41  ;;  %v2916_v21 = vsel %vm6518_vm4, %v2654_v38, %v2915_v42  ;;  %v2533_v39 = vpack.c.bf16 %v2501_v26, %v2501_v26  ;;  %v6855_v40 = vld [vmem:[#allocation3 + $0x30] sm:$0xf]  ;;  %v2925_v42 = vld [vmem:[#allocation3 + $0x60] sm:$0xf] }
 0x28d   : > { %2914 = vst.msk [vmem:[#allocation3 + $0x4c] sm:$0xf] %vm8356_vm3, %v2653_v10  ;;  %v3139_v10 = vshrl.u32 %v6855_v40, 16  ;;  %vm8362_vm3 = vmmov %vm8357_vm0 }
 0x28e   : > { %2917 = vst [vmem:[#allocation3 + $0x50] sm:$0x1] %v2916_v21  ;;  %v2656_v56 = vshrl.u32 %v2533_v39, 16  ;;  %v2659_v1 = vshll.u32 %v2533_v39, 16  ;;  %v3142_v21 = vshll.u32 %v6855_v40, 16 }
 0x28f   : > { %v2441_v12 = vpop.f32.mrf.mxu0  ;;  %v3141_v53 = vrot.slane %v3139_v10, 4 }
 0x290   : > { %v2658_v55 = vrot.slane %v2656_v56, 7  ;;  %v2442_v8 = vadd.f32 %v6585_v18, %v2441_v12 }
 0x292   : > { %v2661_v33 = vor.u32 %v2659_v1, %v2658_v55  ;;  %v2502_v32 = vmax.f32 %v2442_v8, 0.0  ;;  %v2662_v46 = vrot.slane %v2658_v55, 4 }
 0x294   : > { %v2919_v44 = vsel %vm6626_vm9, %v2661_v33, %v2918_v54  ;;  %v2534_v17 = vpack.c.bf16 %v2502_v32, %v2502_v32 }
 0x295   : > { %2920 = vst [vmem:[#allocation3 + $0x54] sm:$0xf] %v2919_v44  ;;  %v3144_v44 = vrot.slane %v3142_v21, 5 }
 0x296   : > { %v2664_v7 = vshrl.u32 %v2534_v17, 16  ;;  %v2667_v35 = vshll.u32 %v2534_v17, 16 }
 0x297   : > { %v2444_v30 = vpop.f32.mrf.mxu0 }
 0x298   : > { %v2666_v5 = vrot.slane %v2664_v7, 7  ;;  %v2445_v37 = vadd.f32 %v6585_v18, %v2444_v30 }
 0x29a   : > { %v2669_v19 = vor.u32 %v2667_v35, %v2666_v5  ;;  %v2671_v4 = vrot.slane %v2666_v5, 4  ;;  %v2503_v15 = vmax.f32 %v2445_v37, 0.0  ;;  %v2929_v5 = vld [vmem:[#allocation3 + $0x68] sm:$0x1]  ;;  %v6867_v37 = vld [vmem:[#allocation3 + $0x34] sm:$0xf] }
 0x29c   : > { %v2670_v58 = vsel %vm5271_vm11, %v2662_v46, %v2669_v19  ;;  %v2923_v27 = vsel %vm6518_vm4, %v2671_v4, %v2922_v50  ;;  %v2535_v51 = vpack.c.bf16 %v2503_v15, %v2503_v15  ;;  %v2454_v13 = vpop.f32.mrf.mxu3  ;;  %v450_v19 = vld [vmem:[#allocation3 + $0x98] sm:$0x1] }
 0x29d   : > { %2921 = vst.msk [vmem:[#allocation3 + $0x58] sm:$0xf] %vm8357_vm0, %v2670_v58  ;;  %v2455_v29 = vadd.f32 %v6585_v18, %v2454_v13  ;;  %v451_v15 = vsel %vm6549_vm5, 0, %v450_v19  ;;  %v3145_v58 = vor.u32 %v3144_v44, %v3141_v53  ;;  %v3504_v53 = vrot.slane %v6867_v37, 5 }
 0x29e   : > { %2924 = vst [vmem:[#allocation3 + $0x5c] sm:$0x1] %v2923_v27  ;;  %v2673_v0 = vshrl.u32 %v2535_v51, 16  ;;  %v2676_v28 = vshll.u32 %v2535_v51, 16  ;;  %v4908_v27 = vrot.slane %v6855_v40, 9 }
 0x29f   : > { %v2507_v59 = vmax.f32 %v2455_v29, 0.0  ;;  %v2446_v3 = vpop.f32.mrf.mxu0  ;;  %452 = vst [vmem:[#allocation3 + $0x98] sm:$0x1] %v451_v15 }
 0x2a0   : > { %v2675_v52 = vrot.slane %v2673_v0, 7  ;;  %v2447_v22 = vadd.f32 %v6585_v18, %v2446_v3 }
 0x2a1   : > { %v2539_v34 = vpack.c.bf16 %v2507_v59, %v2507_v59  ;;  %v3148_v59 = vshll.u32 %v6867_v37, 16 }
 0x2a2   : > { %v2678_v41 = vor.u32 %v2676_v28, %v2675_v52  ;;  %v2504_v38 = vmax.f32 %v2447_v22, 0.0  ;;  %v2679_v61 = vrot.slane %v2675_v52, 4  ;;  %v3152_v28 = vshrl.u32 %v6867_v37, 16  ;;  %v2943_v22 = vld [vmem:[#allocation3 + $0x80] sm:$0x1] }
 0x2a3   : > { %v2707_v26 = vshrl.u32 %v2539_v34, 16  ;;  %v2710_v1 = vshll.u32 %v2539_v34, 16 }
 0x2a4   : > { %v2926_v39 = vsel %vm6626_vm9, %v2678_v41, %v2925_v42  ;;  %v2536_v56 = vpack.c.bf16 %v2504_v38, %v2504_v38  ;;  %v2456_v12 = vpop.f32.mrf.mxu3  ;;  %v3158_v42 = vshll.u32 %v6871_v43, 16 }
 0x2a5   : > { %2927 = vst [vmem:[#allocation3 + $0x60] sm:$0xf] %v2926_v39  ;;  %v2709_v55 = vrot.slane %v2707_v26, 7  ;;  %v2457_v8 = vadd.f32 %v6585_v18, %v2456_v12  ;;  %v6888_v39 = vld [vmem:[%s8111_s2] ss:$0 sm:$0xff] }
 0x2a6   : > { %v2681_v54 = vshrl.u32 %v2536_v56, 16  ;;  %v2684_v2 = vshll.u32 %v2536_v56, 16  ;;  %v6891_v56 = vrot.slane %v3145_v58, 4  ;;  %v6893_v12 = vld [vmem:[#allocation3 + $0x3c] sm:$0xf] }
 0x2a7   : > { %v2712_v57 = vor.u32 %v2710_v1, %v2709_v55  ;;  %v2508_v33 = vmax.f32 %v2457_v8, 0.0  ;;  %v2449_v32 = vpop.f32.mrf.mxu0  ;;  %v2713_v34 = vrot.slane %v2709_v55, 4  ;;  %v2932_v1 = vld [vmem:[#allocation3 + $0x6c] sm:$0xf]  ;;  %v2946_v58 = vld [vmem:[#allocation3 + $0x84] sm:$0xf] }
 0x2a8   : > { %v2683_v17 = vrot.slane %v2681_v54, 7  ;;  %v2450_v7 = vadd.f32 %v6585_v18, %v2449_v32  ;;  %v6901_v54 = vrot.slane %v3148_v59, 5  ;;  %v6905_v32 = vrot.slane %v3152_v28, 4 }
 0x2a9   : > { %v2940_v30 = vsel %vm6626_vm9, %v2712_v57, %v2939_v23  ;;  %v2540_v35 = vpack.c.bf16 %v2508_v33, %v2508_v33 }
 0x2aa   : > { %2941 = vst [vmem:[#allocation3 + $0x78] sm:$0xf] %v2940_v30  ;;  %v2686_v46 = vor.u32 %v2684_v2, %v2683_v17  ;;  %v2688_v50 = vrot.slane %v2683_v17, 4  ;;  %v2505_v11 = vmax.f32 %v2450_v7, 0.0  ;;  %v6909_v2 = vrot.slane %v3158_v42, 5 }
 0x2ab   : > { %v2715_v4 = vshrl.u32 %v2540_v35, 16  ;;  %v2718_v31 = vshll.u32 %v2540_v35, 16  ;;  %v3163_v7 = vshrl.u32 %v6893_v12, 16 }
 0x2ac   : > { %v2687_v51 = vsel %vm5271_vm11, %v2679_v61, %v2686_v46  ;;  %v2930_v13 = vsel %vm6518_vm4, %v2688_v50, %v2929_v5  ;;  %v2537_v29 = vpack.c.bf16 %v2505_v11, %v2505_v11  ;;  %v2459_v0 = vpop.f32.mrf.mxu3  ;;  %v398_v46 = vld [vmem:[#allocation3 + $0x9c] sm:$0x1]  ;;  %v3166_v50 = vshll.u32 %v6893_v12, 16 }
 0x2ad   : > { %2928 = vst.msk [vmem:[#allocation3 + $0x64] sm:$0xf] %vm8358_vm2, %v2687_v51  ;;  %v2717_v3 = vrot.slane %v2715_v4, 7  ;;  %v2460_v52 = vadd.f32 %v6585_v18, %v2459_v0  ;;  %v399_v15 = vsel %vm6518_vm4, 0, %v398_v46  ;;  %vm8363_vm2 = vmmov %vm8357_vm0 }
 0x2ae   : > { %2931 = vst [vmem:[#allocation3 + $0x68] sm:$0x1] %v2930_v13  ;;  %v2690_v45 = vshrl.u32 %v2537_v29, 16  ;;  %v2693_v21 = vshll.u32 %v2537_v29, 16  ;;  %v3151_v13 = vsel %vm5290_vm13, %v6891_v56, %v6901_v54  ;;  %v3507_v29 = vrot.slane %v6871_v43, 5 }
 0x2af   : > { %v2720_v41 = vor.u32 %v2718_v31, %v2717_v3  ;;  %v2722_v38 = vrot.slane %v2717_v3, 4  ;;  %v2509_v26 = vmax.f32 %v2460_v52, 0.0  ;;  %v2451_v48 = vpop.f32.mrf.mxu0  ;;  %400 = vst [vmem:[#allocation3 + $0x9c] sm:$0x1] %v399_v15  ;;  %v6959_v15 = vunpack.c.l.b16 %v3151_v13 }
 0x2b0   : > { %v6883_v10 = vrot.slane %v2690_v45, 7  ;;  %v2452_v18 = vadd.f32 %v6888_v39, %v2451_v48  ;;  %v6931_v45 = vrot.slane %v3163_v7, 4 }
 0x2b1   : > { %v2721_v62 = vsel %vm5271_vm11, %v2713_v34, %v2720_v41  ;;  %v2944_v55 = vsel %vm6518_vm4, %v2722_v38, %v2943_v22  ;;  %v2541_v8 = vpack.c.bf16 %v2509_v26, %v2509_v26  ;;  %v6899_v23 = vld [vmem:[#allocation3 + $0x78] sm:$0xf]  ;;  %v6929_v22 = vrot.slane %v3504_v53, 4  ;;  %v2936_v34 = vld [vmem:[#allocation3 + $0x74] sm:$0x1] }
 0x2b2   : > { %2942 = vst.msk [vmem:[#allocation3 + $0x7c] sm:$0xf] %vm8359_vm7, %v2721_v62  ;;  %v2695_v57 = vor.u32 %v2693_v21, %v6883_v10  ;;  %v2506_v33 = vmax.f32 %v2452_v18, 0.0  ;;  %v3283_v17 = vshrl.u32 %v6899_v23, 16  ;;  %v3286_v35 = vshll.u32 %v6899_v23, 16  ;;  %vm8364_vm7 = vmmov %vm8357_vm0 }
 0x2b3   : > { %2945 = vst [vmem:[#allocation3 + $0x80] sm:$0x1] %v2944_v55  ;;  %v2724_v44 = vshrl.u32 %v2541_v8, 16  ;;  %v2727_v19 = vshll.u32 %v2541_v8, 16  ;;  %v6937_v26 = vld [vmem:[#allocation3 + $0x4] sm:$0xf] }
 0x2b4   : > { %v2933_v61 = vsel %vm6626_vm9, %v2695_v57, %v2932_v1  ;;  %v2538_v30 = vpack.c.bf16 %v2506_v33, %v2506_v33  ;;  %v2461_v5 = vpop.f32.mrf.mxu3  ;;  %v3285_v3 = vrot.slane %v3283_v17, 4  ;;  %v3288_v31 = vrot.slane %v3286_v35, 5  ;;  %v453_v17 = vld [vmem:[#allocation3 + $0xa4] sm:$0x1] }
 0x2b5   : > { %2934 = vst [vmem:[#allocation3 + $0x6c] sm:$0xf] %v2933_v61  ;;  %v6916_v11 = vrot.slane %v2724_v44, 7  ;;  %v2462_v4 = vadd.f32 %v6888_v39, %v2461_v5  ;;  %v3476_v48 = vrot.slane %v6937_v26, 5  ;;  %v6940_v21 = vrot.slane %v3166_v50, 5 }
 0x2b6   : > { %v2698_v51 = vshrl.u32 %v2538_v30, 16  ;;  %v2701_v28 = vshll.u32 %v2538_v30, 16  ;;  %v2696_v18 = vrot.slane %v6883_v10, 4  ;;  %v3155_v1 = vor.u32 %v6905_v32, %v6901_v54 }
 0x2b7   : > { %v2729_v0 = vor.u32 %v2727_v19, %v6916_v11  ;;  %v2510_v59 = vmax.f32 %v2462_v4, 0.0  ;;  %v3289_v57 = vor.u32 %v3288_v31, %v3285_v3  ;;  %v454_v5 = vsel %vm6549_vm5, 0, %v453_v17  ;;  %v2950_v19 = vld [vmem:[#allocation3 + $0x8c] sm:$0x1]  ;;  %v5131_v31 = vld [vmem:[#allocation3] sm:$0xf] }
 0x2b8   : > { %v2700_v52 = vrot.slane %v2698_v51, 7  ;;  %v2730_v50 = vrot.slane %v6916_v11, 4  ;;  %455 = vst [vmem:[#allocation3 + $0xa4] sm:$0x1] %v454_v5  ;;  %v3478_v13 = vrot.slane %v3476_v48, 4  ;;  %v6989_v17 = vsel %vm5796_vm1, %v6929_v22, %v3507_v29 }
 0x2b9   : > { %v2947_v42 = vsel %vm6626_vm9, %v2729_v0, %v2946_v58  ;;  %v2542_v41 = vpack.c.bf16 %v2510_v59, %v2510_v59  ;;  %v6935_v38 = vld [vmem:[#allocation3 + $0x7c] sm:$0xf]  ;;  %v6967_v58 = vsel %vm5796_vm1, %v4908_v27, %v3504_v53  ;;  %v3290_v3 = vrot.slane %v3289_v57, 4  ;;  %v2953_v29 = vld [vmem:[#allocation3 + $0x90] sm:$0xf] }
 0x2ba   : > { %2948 = vst [vmem:[#allocation3 + $0x84] sm:$0xf] %v2947_v42  ;;  %v2703_v56 = vor.u32 %v2701_v28, %v2700_v52  ;;  %v2705_v62 = vrot.slane %v2700_v52, 4  ;;  %v6943_v55 = vld [vmem:[#allocation3 + $0x80] sm:$0x1]  ;;  %v3292_v33 = vshll.u32 %v6935_v38, 16 }
 0x2bb   : > { %v2732_v8 = vshrl.u32 %v2542_v41, 16  ;;  %v3296_v44 = vshrl.u32 %v6935_v38, 16  ;;  %v2735_v61 = vshll.u32 %v2542_v41, 16  ;;  %v3302_v4 = vshll.u32 %v6943_v55, 16  ;;  %v5132_v28 = vld [vmem:[#allocation3 + $0x8] sm:$0x1] }
 0x2bc   : > { %v2704_v7 = vsel %vm5271_vm11, %v2696_v18, %v2703_v56  ;;  %v2937_v10 = vsel %vm6518_vm4, %v2705_v62, %v2936_v34  ;;  %v2464_v30 = vpop.f32.mrf.mxu3  ;;  %v3294_v35 = vrot.slane %v3292_v33, 5  ;;  %v4904_v52 = vrot.slane %v5131_v31, 9  ;;  %v6979_v41 = vld [vmem:[#allocation3 + $0x40] sm:$0xf] }
 0x2bd   : > { %2935 = vst.msk [vmem:[#allocation3 + $0x70] sm:$0xf] %vm8360_vm8, %v2704_v7  ;;  %v2734_v54 = vrot.slane %v2732_v8, 7  ;;  %v2465_v32 = vadd.f32 %v6888_v39, %v2464_v30  ;;  %v3298_v46 = vrot.slane %v3296_v44, 4  ;;  %v3479_v42 = vrot.slane %v5132_v28, 5 }
 0x2be   : > { %2938 = vst [vmem:[#allocation3 + $0x74] sm:$0x1] %v2937_v10  ;;  %v3295_v53 = vsel %vm5290_vm13, %v3290_v3, %v3294_v35  ;;  %v3304_v56 = vrot.slane %v3302_v4, 5  ;;  %v3156_v33 = vrot.slane %v3155_v1, 4  ;;  %v401_v44 = vld [vmem:[#allocation3 + $0xa8] sm:$0x1]  ;;  %v3169_v7 = vor.u32 %v6940_v21, %v6931_v45 }
 0x2bf   : > { %v2737_v51 = vor.u32 %v2735_v61, %v2734_v54  ;;  %v2739_v0 = vrot.slane %v2734_v54, 4  ;;  %v2511_v59 = vmax.f32 %v2465_v32, 0.0  ;;  %v3299_v11 = vor.u32 %v3298_v46, %v3294_v35 }
 0x2c0   : > { %v3722_v30 = vunpack.c.l.b16 %v3295_v53  ;;  %v402_v5 = vsel %vm6518_vm4, 0, %v401_v44  ;;  %v3172_v1 = vshll.u32 %v6979_v41, 16  ;;  %v3477_v22 = vsel %vm5796_vm1, %v4904_v52, %v3476_v48 }
 0x2c1   : > { %v2738_v40 = vsel %vm5271_vm11, %v2730_v50, %v2737_v51  ;;  %v2951_v37 = vsel %vm6518_vm4, %v2739_v0, %v2950_v19  ;;  %v2543_v27 = vpack.c.bf16 %v2511_v59, %v2511_v59  ;;  %v6977_v34 = vld [vmem:[#allocation3 + $0x84] sm:$0xf]  ;;  %v3300_v18 = vrot.slane %v3299_v11, 4  ;;  %403 = vst [vmem:[#allocation3 + $0xa8] sm:$0x1] %v402_v5 }
 0x2c2   : > { %2949 = vst.msk [vmem:[#allocation3 + $0x88] sm:$0xf] %vm8361_vm12, %v2738_v40  ;;  %v3307_v62 = vshrl.u32 %v6977_v34, 16  ;;  %v3310_v8 = vshll.u32 %v6977_v34, 16  ;;  %v3480_v45 = vsel %vm5796_vm1, %v3478_v13, %v3479_v42  ;;  %v3176_v51 = vshrl.u32 %v6979_v41, 16 }
 0x2c3   : > { %2952 = vst [vmem:[#allocation3 + $0x8c] sm:$0x1] %v2951_v37  ;;  %v2741_v57 = vshrl.u32 %v2543_v27, 16  ;;  %v3305_v61 = vsel %vm5290_vm13, %v3300_v18, %v3304_v56  ;;  %v2744_v43 = vshll.u32 %v2543_v27, 16  ;;  %v3790_v0 = vunpack.c.l.b16 %v6967_v58  ;;  %v456_v18 = vld [vmem:[#allocation3 + $0xb0] sm:$0x1] }
 0x2c4   : > { %v2466_v10 = vpop.f32.mrf.mxu3  ;;  %v3723_v35 = vunpack.c.l.b16 %v3305_v61  ;;  %v3309_v21 = vrot.slane %v3307_v62, 4  ;;  %v3312_v46 = vrot.slane %v3310_v8, 5  ;;  %v3791_v59 = vunpack.c.l.b16 %v6989_v17 }
 0x2c5   : > { %v2743_v54 = vrot.slane %v2741_v57, 7  ;;  %v2467_v32 = vadd.f32 %v6888_v39, %v2466_v10  ;;  %v4909_v26 = vrot.slane %v6893_v12, 9  ;;  %v3511_v3 = vrot.slane %v6979_v41, 5 }
 0x2c6   : > { %v7005_v4 = vpack.c.b16 %v3723_v35, %v3722_v30  ;;  %v3782_v31 = vunpack.c.l.b16 %v3477_v22  ;;  %v3783_v52 = vunpack.c.l.b16 %v3480_v45  ;;  %v3161_v28 = vsel %vm5290_vm13, %v3156_v33, %v6909_v2 }
 0x2c7   : > { %v2746_v50 = vor.u32 %v2744_v43, %v2743_v54  ;;  %v2512_v19 = vmax.f32 %v2467_v32, 0.0  ;;  %v3313_v40 = vor.u32 %v3312_v46, %v3309_v21  ;;  %v7025_v56 = vrot.slane %v3169_v7, 4  ;;  %v2957_v32 = vld [vmem:[#allocation3 + $0x98] sm:$0x1] }
 0x2c8   : > { %3770 = vrot.lane.b32.xlu0 %v7005_v4, %s5143_s25  ;;  %v7027_v62 = vrot.slane %v3172_v1, 5  ;;  %v3178_v8 = vrot.slane %v3176_v51, 4  ;;  %v457_v2 = vsel %vm6549_vm5, 0, %v456_v18  ;;  %v3814_v43 = vpack.c.b16 %v3783_v52, %v3782_v31 }
 0x2c9   : > { %v2954_v48 = vsel %vm6626_vm9, %v2746_v50, %v2953_v29  ;;  %v2544_v11 = vpack.c.bf16 %v2512_v19, %v2512_v19  ;;  %v7016_v13 = vld [vmem:[#allocation3 + $0x88] sm:$0xf]  ;;  %458 = vst [vmem:[#allocation3 + $0xb0] sm:$0x1] %v457_v2  ;;  %v3711_v7 = vunpack.c.l.b16 %v3161_v28  ;;  %v3314_v35 = vrot.slane %v3313_v40, 4 }
 0x2ca   : > { %2955 = vst [vmem:[#allocation3 + $0x90] sm:$0xf] %v2954_v48  ;;  %v7021_v42 = vld [vmem:[#allocation3 + $0x8c] sm:$0x1]  ;;  %v3316_v37 = vshll.u32 %v7016_v13, 16  ;;  %v3320_v27 = vshrl.u32 %v7016_v13, 16 }
 0x2cb   : > { %v2749_v53 = vshrl.u32 %v2544_v11, 16  ;;  %v3326_v61 = vshll.u32 %v7021_v42, 16  ;;  %v2752_v30 = vshll.u32 %v2544_v11, 16  ;;  %v3005_v29 = vld [vmem:[#allocation3 + $0x44] sm:$0x1]  ;;  %v3513_v22 = vrot.slane %v3511_v3, 4 }
 0x2cc   : > { %v2469_v57 = vpop.f32.mrf.mxu3  ;;  %v3318_v44 = vrot.slane %v3316_v37, 5  ;;  %v3322_v10 = vrot.slane %v3320_v27, 4  ;;  %v2747_v45 = vrot.slane %v2743_v54, 4  ;;  %v3179_v11 = vor.u32 %v3178_v8, %v7027_v62 }
 0x2cd   : > { %v2751_v33 = vrot.slane %v2749_v53, 7  ;;  %v2470_v5 = vadd.f32 %v6888_v39, %v2469_v57  ;;  %v3328_v48 = vrot.slane %v3326_v61, 5  ;;  %v3514_v40 = vrot.slane %v3005_v29, 5 }
 0x2ce   : > { %v3323_v1 = vor.u32 %v3322_v10, %v3318_v44  ;;  %v3319_v19 = vsel %vm5290_vm13, %v3314_v35, %v3318_v44  ;;  %v3182_v18 = vshll.u32 %v3005_v29, 16  ;;  %v404_v10 = vld [vmem:[#allocation3 + $0xb4] sm:$0x1]  ;;  %vm4216_vm8 = vcmask 326656  }
 0x2cf   : > { %v2754_v21 = vor.u32 %v2752_v30, %v2751_v33  ;;  %v2756_v46 = vrot.slane %v2751_v33, 4  ;;  %v2513_v50 = vmax.f32 %v2470_v5, 0.0  ;;  %v3724_v57 = vunpack.c.l.b16 %v3319_v19 }
 0x2d0   : > { %v3324_v51 = vrot.slane %v3323_v1, 4  ;;  %3830 = vrot.lane.b32.xlu0 %v3814_v43, %s5145_s27  ;;  %v3515_v61 = vsel %vm5796_vm1, %v3513_v22, %v3514_v40  ;;  %v405_v33 = vsel %vm6518_vm4, 0, %v404_v10  ;;  %v3175_v30 = vsel %vm5290_vm13, %v7025_v56, %v7027_v62 }
 0x2d1   : > { %v2755_v31 = vsel %vm5271_vm11, %v2747_v45, %v2754_v21  ;;  %v2958_v52 = vsel %vm6518_vm4, %v2756_v46, %v2957_v32  ;;  %v2545_v28 = vpack.c.bf16 %v2513_v50, %v2513_v50  ;;  %v7043_v54 = vld [vmem:[#allocation3 + $0x90] sm:$0xf]  ;;  %v3180_v5 = vrot.slane %v3179_v11, 4  ;;  %v7064_v32 = vld [vmem:[#allocation3 + $0x48] sm:$0xf] }
 0x2d2   : > { %2956 = vst.msk [vmem:[#allocation3 + $0x94] sm:$0xf] %vm8362_vm3, %v2755_v31  ;;  %v3329_v37 = vsel %vm5290_vm13, %v3324_v51, %v3328_v48  ;;  %v3331_v27 = vshrl.u32 %v7043_v54, 16  ;;  %v3334_v53 = vshll.u32 %v7043_v54, 16  ;;  %v3512_v43 = vsel %vm5796_vm1, %v4909_v26, %v3511_v3  ;;  %v2960_v45 = vld [vmem:[#allocation3 + $0x9c] sm:$0xf] }
 0x2d3   : > { %2959 = vst [vmem:[#allocation3 + $0x98] sm:$0x1] %v2958_v52  ;;  %v2758_v8 = vshrl.u32 %v2545_v28, 16  ;;  %v3725_v44 = vunpack.c.l.b16 %v3329_v37  ;;  %v2761_v1 = vshll.u32 %v2545_v28, 16  ;;  %v3184_v21 = vrot.slane %v3182_v18, 5 }
 0x2d4   : > { %v2471_v2 = vpop.f32.mrf.mxu3  ;;  %406 = vst [vmem:[#allocation3 + $0xb4] sm:$0x1] %v405_v33  ;;  %v3333_v56 = vrot.slane %v3331_v27, 4  ;;  %v3336_v62 = vrot.slane %v3334_v53, 5  ;;  %v3793_v41 = vunpack.c.l.b16 %v3515_v61  ;;  %v7073_v26 = vpack.c.b16 %v3711_v7, %v6959_v15  ;;  %v459_v27 = vld [vmem:[#allocation3 + $0xbc] sm:$0x1] }
 0x2d5   : > { %v7066_v35 = vrot.slane %v2758_v8, 7  ;;  %v2472_v29 = vadd.f32 %v6888_v39, %v2471_v2  ;;  %v7069_v22 = vpack.c.b16 %v3725_v44, %v3724_v57  ;;  %v3187_v3 = vshrl.u32 %v7064_v32, 16 }
 0x2d6   : > { %v7082_v50 = vpack.c.b16 %v3791_v59, %v3790_v0  ;;  %v3185_v19 = vsel %vm5290_vm13, %v3180_v5, %v3184_v21  ;;  %v7086_v51 = vunpack.c.l.b16 %v3175_v30  ;;  %v3792_v48 = vunpack.c.l.b16 %v3512_v43 }
 0x2d7   : > { %v2763_v12 = vor.u32 %v2761_v1, %v7066_v35  ;;  %v2514_v46 = vmax.f32 %v2472_v29, 0.0  ;;  %3772 = vrot.lane.b32.xlu1 %v7069_v22, %s5143_s25  ;;  %v4910_v58 = vrot.slane %v7064_v32, 9  ;;  %v3190_v17 = vshll.u32 %v7064_v32, 16 }
 0x2d8   : > { %3758 = vrot.lane.b32.xlu0 %v7073_v26, %s5143_s25  ;;  %v3337_v59 = vor.u32 %v3336_v62, %v3333_v56  ;;  %v7100_v28 = vpack.c.b16 %v3793_v41, %v3792_v48  ;;  %v3546_v37 = vrot.slane %v6935_v38, 5  ;;  %v7103_v53 = vunpack.c.l.b16 %v3185_v19  ;;  %v2964_v38 = vld [vmem:[#allocation3 + $0xa4] sm:$0x1]  ;;  %v7120_v48 = vld [vmem:[#allocation3 + $0x4c] sm:$0xf] }
 0x2d9   : > { %v2961_v15 = vsel %vm6626_vm9, %v2763_v12, %v2960_v45  ;;  %v2546_v7 = vpack.c.bf16 %v2514_v46, %v2514_v46  ;;  %v7092_v11 = vld [vmem:[#allocation3 + $0x94] sm:$0xf]  ;;  %v7105_v18 = vrot.slane %v3187_v3, 4  ;;  %v460_v61 = vsel %vm6549_vm5, 0, %v459_v27 }
 0x2da   : > { %2962 = vst [vmem:[#allocation3 + $0x9c] sm:$0xf] %v2961_v15  ;;  %v7096_v0 = vld [vmem:[#allocation3 + $0x98] sm:$0x1]  ;;  %v3340_v31 = vshll.u32 %v7092_v11, 16  ;;  %v3344_v52 = vshrl.u32 %v7092_v11, 16 }
 0x2db   : > { %v2766_v40 = vshrl.u32 %v2546_v7, 16  ;;  %v3350_v10 = vshll.u32 %v7096_v0, 16  ;;  %v2769_v33 = vshll.u32 %v2546_v7, 16  ;;  %461 = vst [vmem:[#allocation3 + $0xbc] sm:$0x1] %v460_v61  ;;  %v7111_v5 = vrot.slane %v3190_v17, 5 }
 0x2dc   : > { %v2474_v8 = vpop.f32.mrf.mxu3  ;;  %v3342_v57 = vrot.slane %v3340_v31, 5  ;;  %v3346_v44 = vrot.slane %v3344_v52, 4  ;;  %v3338_v43 = vrot.slane %v3337_v59, 4  ;;  %v4914_v29 = vrot.slane %v6899_v23, 9 }
 0x2dd   : > { %v2768_v2 = vrot.slane %v2766_v40, 7  ;;  %v2475_v30 = vadd.f32 %v6888_v39, %v2474_v8  ;;  %v3553_v45 = vrot.slane %v7016_v13, 5  ;;  %v2764_v56 = vrot.slane %v7066_v35, 4 }
 0x2de   : > { %v3347_v1 = vor.u32 %v3346_v44, %v3342_v57  ;;  %v3343_v12 = vsel %vm5290_vm13, %v3338_v43, %v3342_v57  ;;  %v3352_v3 = vrot.slane %v3350_v10, 5  ;;  %v3548_v19 = vrot.slane %v3546_v37, 4  ;;  %v407_v57 = vld [vmem:[#allocation3 + $0xc0] sm:$0x1] }
 0x2df   : > { %v2771_v62 = vor.u32 %v2769_v33, %v2768_v2  ;;  %v2773_v21 = vrot.slane %v2768_v2, 4  ;;  %v2515_v41 = vmax.f32 %v2475_v30, 0.0  ;;  %3832 = vrot.lane.b32.xlu1 %v6717_v9, %s5145_s27  ;;  %v3549_v15 = vrot.slane %v6943_v55, 5 }
 0x2e0   : > { %v3348_v46 = vrot.slane %v3347_v1, 4  ;;  %v3555_v59 = vrot.slane %v3553_v45, 4  ;;  %v3726_v27 = vunpack.c.l.b16 %v3343_v12  ;;  %v3196_v44 = vshll.u32 %v7120_v48, 16 }
 0x2e1   : > { %v2772_v23 = vsel %vm5271_vm11, %v2764_v56, %v2771_v62  ;;  %v2965_v13 = vsel %vm6518_vm4, %v2773_v21, %v2964_v38  ;;  %v2547_v35 = vpack.c.bf16 %v2515_v41, %v2515_v41  ;;  %v7127_v7 = vld [vmem:[#allocation3 + $0x9c] sm:$0xf]  ;;  %v3547_v10 = vsel %vm5796_vm1, %v4914_v29, %v3546_v37  ;;  %v2967_v56 = vld [vmem:[#allocation3 + $0xa8] sm:$0xf] }
 0x2e2   : > { %2963 = vst.msk [vmem:[#allocation3 + $0xa0] sm:$0xf] %vm8357_vm0, %v2772_v23  ;;  %v3353_v17 = vsel %vm5290_vm13, %v3348_v46, %v3352_v3  ;;  %v3355_v31 = vshrl.u32 %v7127_v7, 16  ;;  %v3358_v52 = vshll.u32 %v7127_v7, 16  ;;  %v3550_v61 = vsel %vm5796_vm1, %v3548_v19, %v3549_v15 }
 0x2e3   : > { %2966 = vst [vmem:[#allocation3 + $0xa4] sm:$0x1] %v2965_v13  ;;  %v2775_v40 = vshrl.u32 %v2547_v35, 16  ;;  %v3727_v8 = vunpack.c.l.b16 %v3353_v17  ;;  %v3556_v2 = vrot.slane %v7021_v42, 5  ;;  %v408_v33 = vsel %vm6518_vm4, 0, %v407_v57 }
 0x2e4   : > { %v2476_v55 = vpop.f32.mrf.mxu3  ;;  %v2778_v38 = vshll.u32 %v2547_v35, 16  ;;  %409 = vst [vmem:[#allocation3 + $0xc0] sm:$0x1] %v408_v33  ;;  %v4915_v62 = vrot.slane %v6977_v34, 9  ;;  %v3357_v29 = vrot.slane %v3355_v31, 4  ;;  %v3360_v21 = vrot.slane %v3358_v52, 5 }
 0x2e5   : > { %v7142_v30 = vrot.slane %v2775_v40, 7  ;;  %v2477_v43 = vadd.f32 %v6888_v39, %v2476_v55  ;;  %v7145_v1 = vpack.c.b16 %v3727_v8, %v3726_v27  ;;  %v3557_v37 = vsel %vm5796_vm1, %v3555_v59, %v3556_v2  ;;  %v462_v8 = vld [vmem:[#allocation3 + $0xc8] sm:$0x1]  ;;  %v3008_v57 = vld [vmem:[#allocation3 + $0x50] sm:$0x1] }
 0x2e6   : > { %v3803_v12 = vunpack.c.l.b16 %v3550_v61  ;;  %v3200_v46 = vshrl.u32 %v7120_v48, 16  ;;  %v3554_v34 = vsel %vm5796_vm1, %v4915_v62, %v3553_v45  ;;  %v7160_v3 = vpack.c.b16 %v7103_v53, %v7086_v51 }
 0x2e7   : > { %v2780_v42 = vor.u32 %v2778_v38, %v7142_v30  ;;  %v2516_v41 = vmax.f32 %v2477_v43, 0.0  ;;  %3838 = vrot.lane.b32.xlu1 %v7082_v50, %s5145_s27  ;;  %3774 = vrot.lane.b32.xlu2 %v7145_v1, %s5143_s25  ;;  %v3518_v19 = vrot.slane %v7120_v48, 5  ;;  %v7163_v23 = vrot.slane %v3196_v44, 5 }
 0x2e8   : > { %v3802_v15 = vunpack.c.l.b16 %v3547_v10  ;;  %v3805_v17 = vunpack.c.l.b16 %v3557_v37  ;;  %v3361_v45 = vor.u32 %v3360_v21, %v3357_v29  ;;  %v3193_v53 = vor.u32 %v7111_v5, %v7105_v18  ;;  %v2971_v5 = vld [vmem:[#allocation3 + $0xb0] sm:$0x1] }
 0x2e9   : > { %v2968_v13 = vsel %vm6626_vm9, %v2780_v42, %v2967_v56  ;;  %v2548_v35 = vpack.c.bf16 %v2516_v41, %v2516_v41  ;;  %v7167_v59 = vld [vmem:[#allocation3 + $0xa0] sm:$0xf]  ;;  %v3804_v27 = vunpack.c.l.b16 %v3554_v34  ;;  %v3202_v44 = vrot.slane %v3200_v46, 4 }
 0x2ea   : > { %2969 = vst [vmem:[#allocation3 + $0xa8] sm:$0xf] %v2968_v13  ;;  %v7169_v31 = vld [vmem:[#allocation3 + $0xa4] sm:$0x1]  ;;  %v3364_v52 = vshll.u32 %v7167_v59, 16  ;;  %v3368_v51 = vshrl.u32 %v7167_v59, 16  ;;  %v7175_v40 = vpack.c.b16 %v3803_v12, %v3802_v15  ;;  %v7187_v29 = vsel %vm5796_vm1, %v4910_v58, %v3518_v19 }
 0x2eb   : > { %v2783_v48 = vshrl.u32 %v2548_v35, 16  ;;  %v3374_v2 = vshll.u32 %v7169_v31, 16  ;;  %v463_v33 = vsel %vm6549_vm5, 0, %v462_v8  ;;  %v2786_v43 = vshll.u32 %v2548_v35, 16 }
 0x2ec   : > { %v2479_v55 = vpop.f32.mrf.mxu3  ;;  %v3366_v10 = vrot.slane %v3364_v52, 5  ;;  %v3370_v61 = vrot.slane %v3368_v51, 4  ;;  %v7181_v18 = vpack.c.b16 %v3805_v17, %v3804_v27  ;;  %464 = vst [vmem:[#allocation3 + $0xc8] sm:$0x1] %v463_v33  ;;  %v3362_v62 = vrot.slane %v3361_v45, 4 }
 0x2ed   : > { %v2785_v38 = vrot.slane %v2783_v48, 7  ;;  %v2480_v56 = vadd.f32 %v6888_v39, %v2479_v55  ;;  %v3521_v21 = vrot.slane %v3008_v57, 5  ;;  %v2781_v42 = vrot.slane %v7142_v30, 4 }
 0x2ee   : > { %v3371_v37 = vor.u32 %v3370_v61, %v3366_v10  ;;  %v3367_v34 = vsel %vm5290_vm13, %v3362_v62, %v3366_v10  ;;  %v3376_v13 = vrot.slane %v3374_v2, 5  ;;  %v3520_v35 = vrot.slane %v3518_v19, 4 }
 0x2ef   : > { %v2788_v41 = vor.u32 %v2786_v43, %v2785_v38  ;;  %v2790_v12 = vrot.slane %v2785_v38, 4  ;;  %v2517_v46 = vmax.f32 %v2480_v56, 0.0  ;;  %3850 = vrot.lane.b32.xlu1 %v7175_v40, %s5145_s27  ;;  %3852 = vrot.lane.b32.xlu2 %v7181_v18, %s5145_s27  ;;  %v3203_v45 = vor.u32 %v3202_v44, %v7163_v23 }
 0x2f0   : > { %v3372_v32 = vrot.slane %v3371_v37, 4  ;;  %v3560_v27 = vrot.slane %v7092_v11, 5  ;;  %v3728_v8 = vunpack.c.l.b16 %v3367_v34  ;;  %v3206_v10 = vshll.u32 %v3008_v57, 16  ;;  %v7214_v37 = vld [vmem:[#allocation3 + $0x58] sm:$0xf] }
 0x2f1   : > { %v2789_v58 = vsel %vm5271_vm11, %v2781_v42, %v2788_v41  ;;  %v2972_v30 = vsel %vm6518_vm4, %v2790_v12, %v2971_v5  ;;  %v2549_v15 = vpack.c.bf16 %v2517_v46, %v2517_v46  ;;  %v3030_v17 = vld [vmem:[#allocation3 + $0xa8] sm:$0xf]  ;;  %v7207_v44 = vsel %vm5796_vm1, %v3520_v35, %v3521_v21  ;;  %v2974_v42 = vld [vmem:[#allocation3 + $0xb4] sm:$0xf] }
 0x2f2   : > { %2970 = vst.msk [vmem:[#allocation3 + $0xac] sm:$0xf] %vm8363_vm2, %v2789_v58  ;;  %v3377_v52 = vsel %vm5290_vm13, %v3372_v32, %v3376_v13  ;;  %v3379_v51 = vshrl.u32 %v3030_v17, 16  ;;  %v3382_v48 = vshll.u32 %v3030_v17, 16  ;;  %v7209_v38 = vrot.slane %v3193_v53, 4 }
 0x2f3   : > { %2973 = vst [vmem:[#allocation3 + $0xb0] sm:$0x1] %v2972_v30  ;;  %v2792_v19 = vshrl.u32 %v2549_v15, 16  ;;  %v3729_v55 = vunpack.c.l.b16 %v3377_v52  ;;  %v2795_v61 = vshll.u32 %v2549_v15, 16  ;;  %v3562_v57 = vrot.slane %v3560_v27, 4 }
 0x2f4   : > { %v2481_v2 = vpop.f32.mrf.mxu3  ;;  %v3381_v33 = vrot.slane %v3379_v51, 4  ;;  %v3384_v62 = vrot.slane %v3382_v48, 5  ;;  %v7219_v12 = vrot.slane %v3203_v45, 4  ;;  %v7229_v34 = vrot.slane %v3206_v10, 5  ;;  %v7267_v11 = vld [vmem:[#allocation3 + $0x54] sm:$0xf] }
 0x2f5   : > { %v2794_v43 = vrot.slane %v2792_v19, 7  ;;  %v2482_v56 = vadd.f32 %v6888_v39, %v2481_v2  ;;  %v7212_v5 = vpack.c.b16 %v3729_v55, %v3728_v8  ;;  %v3563_v32 = vrot.slane %v7096_v0, 5 }
 0x2f6   : > { %v4916_v13 = vrot.slane %v7043_v54, 9  ;;  %v4918_v52 = vrot.slane %v3030_v17, 9  ;;  %v3385_v51 = vor.u32 %v3384_v62, %v3381_v33  ;;  %v3567_v2 = vrot.slane %v7167_v59, 5 }
 0x2f7   : > { %v2797_v21 = vor.u32 %v2795_v61, %v2794_v43  ;;  %v2518_v46 = vmax.f32 %v2482_v56, 0.0  ;;  %3760 = vrot.lane.b32.xlu1 %v7160_v3, %s5143_s25  ;;  %3840 = vrot.lane.b32.xlu2 %v7100_v28, %s5145_s27  ;;  %v3564_v8 = vsel %vm5796_vm1, %v3562_v57, %v3563_v32  ;;  %v2798_v55 = vrot.slane %v2794_v43, 4 }
 0x2f8   : > { %3776 = vrot.lane.b32.xlu0 %v7212_v5, %s5143_s25  ;;  %v3386_v32 = vrot.slane %v3385_v51, 4  ;;  %v3569_v51 = vrot.slane %v3567_v2, 4  ;;  %v8369_v47 = vsel %vm5290_vm13, %v7219_v12, %v7229_v34  ;;  %vm4249_vm12 = vcmask 392192  }
 0x2f9   : > { %v2975_v30 = vsel %vm6626_vm9, %v2797_v21, %v2974_v42  ;;  %v2550_v15 = vpack.c.bf16 %v2518_v46, %v2518_v46  ;;  %v3031_v45 = vld [vmem:[#allocation3 + $0xac] sm:$0xf]  ;;  %vm4282_vm3 = vcmask 457728   ;;  %vm4460_vm2 = vcmask 588800  }
 0x2fa   : > { %2976 = vst [vmem:[#allocation3 + $0xb4] sm:$0xf] %v2975_v30  ;;  %v3032_v48 = vld [vmem:[#allocation3 + $0xb0] sm:$0x1]  ;;  %v3392_v19 = vshrl.u32 %v3031_v45, 16  ;;  %v3574_v0 = vrot.slane %v3031_v45, 5 }
 0x2fb   : > { %v2800_v10 = vshrl.u32 %v2550_v15, 16  ;;  %v3577_v61 = vrot.slane %v3032_v48, 5  ;;  %v3388_v42 = vshll.u32 %v3031_v45, 16  ;;  %v2803_v46 = vshll.u32 %v2550_v15, 16  ;;  %v2978_v30 = vld [vmem:[#allocation3 + $0xbc] sm:$0x1] }
 0x2fc   : > { %v2484_v56 = vpop.f32.mrf.mxu3  ;;  %v3394_v17 = vrot.slane %v3392_v19, 4  ;;  %v3575_v33 = vsel %vm5796_vm1, %v4918_v52, %v3574_v0  ;;  %v3576_v62 = vrot.slane %v3574_v0, 4  ;;  %v3398_v35 = vshll.u32 %v3032_v48, 16 }
 0x2fd   : > { %v2802_v21 = vrot.slane %v2800_v10, 7  ;;  %v2485_v57 = vadd.f32 %v6888_v39, %v2484_v56  ;;  %v3810_v54 = vunpack.c.l.b16 %v3575_v33  ;;  %v3390_v41 = vrot.slane %v3388_v42, 5 }
 0x2fe   : > { %v3578_v43 = vsel %vm5796_vm1, %v3576_v62, %v3577_v61  ;;  %v3561_v15 = vsel %vm5796_vm1, %v4916_v13, %v3560_v27  ;;  %v3570_v27 = vrot.slane %v7169_v31, 5  ;;  %v3400_v13 = vrot.slane %v3398_v35, 5 }
 0x2ff   : > { %v2805_v59 = vor.u32 %v2803_v46, %v2802_v21  ;;  %v2807_v58 = vrot.slane %v2802_v21, 4  ;;  %v2519_v19 = vmax.f32 %v2485_v57, 0.0  ;;  %v3811_v53 = vunpack.c.l.b16 %v3578_v43 }
 0x300   : > { %3836 = vrot.lane.b32.xlu0 %v6787_v20, %s5145_s27  ;;  %v3391_v45 = vsel %vm5290_vm13, %v3386_v32, %v3390_v41  ;;  %v3395_v52 = vor.u32 %v3394_v17, %v3390_v41  ;;  %v3807_v41 = vunpack.c.l.b16 %v3564_v8  ;;  %v3571_v31 = vsel %vm5796_vm1, %v3569_v51, %v3570_v27  ;;  %v2981_v32 = vld [vmem:[#allocation3 + $0xc0] sm:$0xf] }
 0x301   : > { %v2806_v48 = vsel %vm5271_vm11, %v2798_v55, %v2805_v59  ;;  %v2979_v0 = vsel %vm6518_vm4, %v2807_v58, %v2978_v30  ;;  %v2551_v10 = vpack.c.bf16 %v2519_v19, %v2519_v19  ;;  %v7263_v61 = vpack.c.b16 %v3811_v53, %v3810_v54  ;;  %v7265_v56 = vld [vmem:[#allocation3 + $0xb4] sm:$0xf] }
 0x302   : > { %2977 = vst.msk [vmem:[#allocation3 + $0xb8] sm:$0xf] %vm8364_vm7, %v2806_v48  ;;  %v3396_v17 = vrot.slane %v3395_v52, 4  ;;  %v3806_v58 = vunpack.c.l.b16 %v3561_v15  ;;  %v4917_v53 = vrot.slane %v7127_v7, 9  ;;  %v3224_v54 = vshrl.u32 %v7214_v37, 16 }
 0x303   : > { %2980 = vst [vmem:[#allocation3 + $0xbc] sm:$0x1] %v2979_v0  ;;  %v2809_v33 = vshrl.u32 %v2551_v10, 16  ;;  %3858 = vrot.lane.b32.xlu2 %v7263_v61, %s5145_s27  ;;  %v3730_v42 = vunpack.c.l.b16 %v3391_v45  ;;  %v3403_v35 = vshrl.u32 %v7265_v56, 16  ;;  %v2812_v21 = vshll.u32 %v2551_v10, 16 }
 0x304   : > { %v2486_v55 = vpop.f32.mrf.mxu3  ;;  %v3401_v62 = vsel %vm5290_vm13, %v3396_v17, %v3400_v13  ;;  %v7281_v30 = vpack.c.b16 %v3807_v41, %v3806_v58  ;;  %v3406_v7 = vshll.u32 %v7265_v56, 16  ;;  %v3211_v43 = vshrl.u32 %v7267_v11, 16  ;;  %v7301_v13 = vld [vmem:[#allocation3 + $0x18] sm:$0xff] }
 0x305   : > { %v2811_v8 = vrot.slane %v2809_v33, 7  ;;  %v2487_v46 = vadd.f32 %v6888_v39, %v2486_v55  ;;  %v3731_v57 = vunpack.c.l.b16 %v3401_v62  ;;  %v3214_v59 = vshll.u32 %v7267_v11, 16 }
 0x306   : > { %v3568_v52 = vsel %vm5796_vm1, %v4917_v53, %v3567_v2  ;;  %v3809_v39 = vunpack.c.l.b16 %v3571_v31  ;;  %v8365_v51 = vsel %vm5290_vm13, %v7209_v38, %v7163_v23  ;;  %v8366_v0 = vshll.u32 %v7214_v37, 16 }
 0x307   : > { %v2814_v19 = vor.u32 %v2812_v21, %v2811_v8  ;;  %v2520_v15 = vmax.f32 %v2487_v46, 0.0  ;;  %v7286_v45 = vpack.c.b16 %v3731_v57, %v3730_v42  ;;  %v3714_v48 = vunpack.c.l.b16 %v8365_v51  ;;  %v2985_v51 = vld [vmem:[#allocation3 + $0xc8] sm:$0x1] }
 0x308   : > { %3854 = vrot.lane.b32.xlu0 %v7281_v30, %s5145_s27  ;;  %v7299_v10 = vrot.slane %v8366_v0, 5  ;;  %v3226_v27 = vrot.slane %v3224_v54, 4  ;;  %v8367_v17 = vunpack.c.l.b16 %v7187_v29  ;;  %v8368_v33 = vunpack.c.l.b16 %v7207_v44 }
 0x309   : > { %v2982_v2 = vsel %vm6626_vm9, %v2814_v19, %v2981_v32  ;;  %v2552_v41 = vpack.c.bf16 %v2520_v15, %v2520_v15  ;;  %3778 = vrot.lane.b32.xlu1 %v7286_v45, %s5143_s25  ;;  %v3034_v38 = vld [vmem:[#allocation3 + $0xb8] sm:$0xf]  ;;  %v3405_v58 = vrot.slane %v3403_v35, 4  ;;  %v3808_v53 = vunpack.c.l.b16 %v3568_v52  ;;  %v3011_v52 = vld [vmem:[#allocation3 + $0x5c] sm:$0x1]  ;;  %vm8370_vm9 = vmmov %vm8357_vm0 }
 0x30a   : > { %v7311_v23 = vpack.c.b16 %v8368_v33, %v8367_v17  ;;  %2983 = vst [vmem:[#allocation3 + $0xc0] sm:$0xf] %v2982_v2  ;;  %v3715_v54 = vunpack.c.l.b16 %v8369_v47  ;;  %v3035_v55 = vld [vmem:[#allocation3 + $0xbc] sm:$0x1]  ;;  %v3581_v62 = vrot.slane %v3034_v38, 5  ;;  %v3408_v42 = vrot.slane %v3406_v7, 5 }
 0x30b   : > { %v2817_v31 = vshrl.u32 %v2552_v41, 16  ;;  %3867 = vrot.lane.b32.xlu2 %v7301_v13, %s5148_s30  ;;  %v3412_v29 = vshll.u32 %v3034_v38, 16  ;;  %v3213_v44 = vrot.slane %v3211_v43, 4  ;;  %v3216_v21 = vrot.slane %v3214_v59, 5 }
 0x30c   : > { %v7320_v46 = vpack.c.b16 %v3809_v39, %v3808_v53  ;;  %v3583_v35 = vrot.slane %v3581_v62, 4  ;;  %v3416_v57 = vshrl.u32 %v3034_v38, 16  ;;  %v3227_v32 = vor.u32 %v3226_v27, %v7299_v10 }
 0x30d   : > { %v2819_v19 = vrot.slane %v2817_v31, 7  ;;  %v2820_v15 = vshll.u32 %v2552_v41, 16  ;;  %v3584_v12 = vrot.slane %v3035_v55, 5  ;;  %v3414_v34 = vrot.slane %v3412_v29, 5 }
 0x30e   : > { %v4919_v7 = vrot.slane %v7265_v56, 9  ;;  %v3409_v0 = vor.u32 %v3408_v42, %v3405_v58  ;;  %v3418_v2 = vrot.slane %v3416_v57, 4  ;;  %v3422_v17 = vshll.u32 %v3035_v55, 16 }
 0x30f   : > { %v2815_v33 = vrot.slane %v2811_v8, 4  ;;  %v2822_v43 = vor.u32 %v2820_v15, %v2819_v19  ;;  %v2824_v59 = vrot.slane %v2819_v19, 4  ;;  %v3585_v39 = vsel %vm5796_vm1, %v3583_v35, %v3584_v12  ;;  %v3013_v35 = vld [vmem:[#allocation3 + $0x64] sm:$0xf]  ;;  %v7348_v12 = vld [vmem:[#allocation3 + $0xc] sm:$0xff] }
 0x310   : > { %3842 = vrot.lane.b32.xlu0 %v7311_v23, %s5145_s27  ;;  %v7328_v27 = vpack.c.b16 %v3715_v54, %v3714_v48  ;;  %v3419_v41 = vor.u32 %v3418_v2, %v3414_v34  ;;  %v3525_v38 = vrot.slane %v7214_v37, 5  ;;  %v3217_v53 = vor.u32 %v3216_v21, %v3213_v44 }
 0x311   : > { %v2823_v56 = vsel %vm5271_vm11, %v2815_v33, %v2822_v43  ;;  %v2986_v8 = vsel %vm6518_vm4, %v2824_v59, %v2985_v51  ;;  %3856 = vrot.lane.b32.xlu1 %v7320_v46, %s5145_s27  ;;  %v3582_v58 = vsel %vm5796_vm1, %v4919_v7, %v3581_v62  ;;  %v3230_v47 = vshll.u32 %v3011_v52, 16 }
 0x312   : > { %2984 = vst.msk [vmem:[#allocation3 + $0xc4] sm:$0xf] %vm8370_vm9, %v2823_v56  ;;  %v3813_v48 = vunpack.c.l.b16 %v3585_v39  ;;  %v3410_v54 = vrot.slane %v3409_v0, 4  ;;  %v3420_v55 = vrot.slane %v3419_v41, 4  ;;  %v3424_v37 = vrot.slane %v3422_v17, 5 }
 0x313   : > { %2987 = vst [vmem:[#allocation3 + $0xc8] sm:$0x1] %v2986_v8  ;;  %3762 = vrot.lane.b32.xlu2 %v7328_v27, %s5143_s25  ;;  %v3228_v14 = vrot.slane %v3227_v32, 4  ;;  %v3812_v42 = vunpack.c.l.b16 %v3582_v58  ;;  %v3527_v62 = vrot.slane %v3525_v38, 4  ;;  %v3232_v21 = vrot.slane %v3230_v47, 5 }
 0x314   : > { %v3415_v31 = vsel %vm5290_vm13, %v3410_v54, %v3414_v34  ;;  %v3425_v29 = vsel %vm5290_vm13, %v3420_v55, %v3424_v37  ;;  %v3528_v19 = vrot.slane %v3011_v52, 5  ;;  %v3218_v15 = vrot.slane %v3217_v53, 4  ;;  %v3014_v47 = vld [vmem:[#allocation3 + $0x68] sm:$0x1] }
 0x315   : > { %v3733_v44 = vunpack.c.l.b16 %v3425_v29  ;;  %v7346_v57 = vpack.c.b16 %v3813_v48, %v3812_v42  ;;  %v3732_v51 = vunpack.c.l.b16 %v3415_v31  ;;  %v4911_v32 = vrot.slane %v7267_v11, 9  ;;  %v3012_v11 = vld [vmem:[#allocation3 + $0x60] sm:$0xf] }
 0x316   : > { %v3233_v7 = vsel %vm5290_vm13, %v3228_v14, %v3232_v21  ;;  %v3529_v34 = vsel %vm5796_vm1, %v3527_v62, %v3528_v19  ;;  %v3223_v0 = vsel %vm5290_vm13, %v3218_v15, %v7299_v10  ;;  %v3244_v52 = vshll.u32 %v3013_v35, 16  ;;  %v7376_v31 = vld [vmem:[#allocation3 + $0x3c] sm:$0xff] }
 0x317   : > { %v3248_v2 = vshrl.u32 %v3013_v35, 16  ;;  %v7362_v17 = vpack.c.b16 %v3733_v44, %v3732_v51  ;;  %v3526_v33 = vsel %vm5796_vm1, %v4911_v32, %v3525_v38  ;;  %v3717_v43 = vunpack.c.l.b16 %v3233_v7  ;;  %v7384_v51 = vld [vmem:[#allocation3 + $0x24] sm:$0xff]  ;;  %v7386_v7 = vpop.permute.xlu2 %3750 }
 0x318   : > { %3860 = vrot.lane.b32.xlu0 %v7346_v57, %s5145_s27  ;;  %v3532_v59 = vrot.slane %v3013_v35, 5  ;;  %v3797_v39 = vunpack.c.l.b16 %v3529_v34  ;;  %v3716_v41 = vunpack.c.l.b16 %v3223_v0  ;;  %v3235_v53 = vshrl.u32 %v3012_v11, 16  ;;  %v7388_v34 = vld [vmem:[#allocation3 + $0x30] sm:$0xff] }
 0x319   : > { %3865 = vrot.lane.b32.xlu1 %v7348_v12, %s5148_s30  ;;  %v3238_v10 = vshll.u32 %v3012_v11, 16  ;;  %v3246_v56 = vrot.slane %v3244_v52, 5  ;;  %v3250_v8 = vrot.slane %v3248_v2, 4  ;;  %v3796_v58 = vunpack.c.l.b16 %v3526_v33  ;;  %v3016_v52 = vld [vmem:[#allocation3 + $0x70] sm:$0xf] }
 0x31a   : > { %v7368_v48 = vpack.c.b16 %v3717_v43, %v3716_v41  ;;  %v3534_v54 = vrot.slane %v3532_v59, 4  ;;  %v3535_v38 = vrot.slane %v3014_v47, 5  ;;  %v3237_v37 = vrot.slane %v3235_v53, 4  ;;  %v3015_v53 = vld [vmem:[#allocation3 + $0x6c] sm:$0xf] }
 0x31b   : > { %3780 = vrot.lane.b32.xlu2 %v7362_v17, %s5143_s25  ;;  %v7370_v55 = vpack.c.b16 %v3797_v39, %v3796_v58  ;;  %v3240_v14 = vrot.slane %v3238_v10, 5  ;;  %v3251_v42 = vor.u32 %v3250_v8, %v3246_v56  ;;  %v4912_v29 = vrot.slane %v3012_v11, 9  ;;  %v7402_v8 = vld [vmem:[#allocation3 + $0x48] sm:$0xff] }
 0x31c   : > { %v3536_v62 = vsel %vm5796_vm1, %v3534_v54, %v3535_v38  ;;  %v3254_v44 = vshll.u32 %v3014_v47, 16  ;;  %v3272_v39 = vshrl.u32 %v3016_v52, 16  ;;  %v3259_v58 = vshrl.u32 %v3015_v53, 16 }
 0x31d   : > { %v3533_v21 = vsel %vm5796_vm1, %v4912_v29, %v3532_v59  ;;  %v3241_v35 = vor.u32 %v3240_v14, %v3237_v37  ;;  %v3252_v19 = vrot.slane %v3251_v42, 4  ;;  %v3799_v15 = vunpack.c.l.b16 %v3536_v62  ;;  %v7412_v42 = vld [vmem:[#allocation3 + $0x60] sm:$0xff]  ;;  %v3017_v29 = vld [vmem:[#allocation3 + $0x74] sm:$0x1] }
 0x31e   : > { %v3256_v32 = vrot.slane %v3254_v44, 5  ;;  %v3798_v0 = vunpack.c.l.b16 %v3533_v21  ;;  %v3268_v59 = vshll.u32 %v3016_v52, 16  ;;  %v3262_v47 = vshll.u32 %v3015_v53, 16 }
 0x31f   : > { %v3242_v2 = vrot.slane %v3241_v35, 4  ;;  %v3274_v38 = vrot.slane %v3272_v39, 4  ;;  %v3539_v14 = vrot.slane %v3016_v52, 5  ;;  %v3261_v62 = vrot.slane %v3259_v58, 4  ;;  %v7414_v35 = vpop.permute.xlu0 %3752 }
 0x320   : > { %3764 = vrot.lane.b32.xlu0 %v7368_v48, %s5143_s25  ;;  %v3257_v11 = vsel %vm5290_vm13, %v3252_v19, %v3256_v32  ;;  %v7396_v33 = vpack.c.b16 %v3799_v15, %v3798_v0  ;;  %v3270_v54 = vrot.slane %v3268_v59, 5  ;;  %v3264_v44 = vrot.slane %v3262_v47, 5  ;;  %v7418_v0 = vld [vmem:[#allocation3 + $0x6c] sm:$0xff]  ;;  %v5064_v47 = vld [vmem:[#allocation3 + $0x78] sm:$0xff] }
 0x321   : > { %3844 = vrot.lane.b32.xlu1 %v7370_v55, %s5145_s27  ;;  %v3247_v43 = vsel %vm5290_vm13, %v3242_v2, %v3246_v56  ;;  %v3719_v41 = vunpack.c.l.b16 %v3257_v11  ;;  %v7408_v56 = vpop.permute.xlu2 %3834  ;;  %v3541_v19 = vrot.slane %v3539_v14, 4  ;;  %v3278_v15 = vshll.u32 %v3017_v29, 16  ;;  %v7420_v11 = vld [vmem:[#allocation3 + $0x54] sm:$0xff] }
 0x322   : > { %8371 = vst [vmem:[#allocation60_spill] sm:$0xff] %v7396_v33  ;;  %v3718_v10 = vunpack.c.l.b16 %v3247_v43  ;;  %v3275_v21 = vor.u32 %v3274_v38, %v3270_v54  ;;  %v3542_v32 = vrot.slane %v3017_v29, 5  ;;  %v3265_v52 = vor.u32 %v3264_v44, %v3261_v62 }
 0x323   : > { %3873 = vrot.lane.b32.xlu2 %v7376_v31, %s5148_s30  ;;  %v4913_v43 = vrot.slane %v3015_v53, 9  ;;  %v3280_v39 = vrot.slane %v3278_v15, 5  ;;  %v5054_v15 = vld [vmem:[#allocation3] sm:$0xff]  ;;  %vm4569_vm11 = vcmask 1045504   ;;  %vm4315_vm0 = vcmask 523264  }
 0x324   : > { %v7404_v37 = vpack.c.b16 %v3719_v41, %v3718_v10  ;;  %v3276_v2 = vrot.slane %v3275_v21, 4  ;;  %v3543_v59 = vsel %vm5796_vm1, %v3541_v19, %v3542_v32  ;;  %v7430_v10 = vld [vmem:[#allocation3 + $0x84] sm:$0xff]  ;;  %v3266_v53 = vrot.slane %v3265_v52, 4 }
 0x325   : > { %v3540_v58 = vsel %vm5796_vm1, %v4913_v43, %v3539_v14  ;;  %v3801_v38 = vunpack.c.l.b16 %v3543_v59  ;;  %v4074_v52 = vsel %vm2108_vm10, %v5054_v15, %v7386_v7  ;;  %vm4536_vm7 = vcmask 621568  }
 0x326   : > { %v3281_v29 = vsel %vm5290_vm13, %v3276_v2, %v3280_v39  ;;  %v3800_v21 = vunpack.c.l.b16 %v3540_v58  ;;  %v3271_v19 = vsel %vm5290_vm13, %v3266_v53, %v3270_v54  ;;  %v7447_v2 = vpop.permute.xlu1 %3754  ;;  %v7459_v58 = vld [vmem:[#allocation3 + $0x90] sm:$0xff] }
 0x327   : > { %v3721_v32 = vunpack.c.l.b16 %v3281_v29  ;;  %v3720_v14 = vunpack.c.l.b16 %v3271_v19  ;;  %v8373_v19 = vld [vmem:[#allocation26_spill] sm:$0xff] }
 0x328   : > { %3869 = vrot.lane.b32.xlu0 %v7384_v51, %s5148_s30  ;;  %v4397_v15 = vunpack.c.l.b16 %v8373_v19  ;;  %v8375_v19 = vld [vmem:[#allocation11_spill] sm:$0xff] }
 0x329   : > { %3871 = vrot.lane.b32.xlu1 %v7388_v34, %s5148_s30  ;;  %v7426_v41 = vpop.permute.xlu2 %3756  ;;  %v7452_v59 = vpack.c.b16 %v3721_v32, %v3720_v14 }
 0x32b   : > { %3846 = vrot.lane.b32.xlu2 %v7396_v33, %s5145_s27  ;;  %v7441_v33 = vpack.c.b16 %v3801_v38, %v3800_v21 }
 0x330   : > { %3875 = vrot.lane.b32.xlu0 %v7402_v8, %s5148_s30 }
 0x331   : > { %3766 = vrot.lane.b32.xlu1 %v7404_v37, %s5143_s25 }
 0x333   : > { %3879 = vrot.lane.b32.xlu2 %v7412_v42, %s5148_s30 }
 0x338   : > { %3881 = vrot.lane.b32.xlu0 %v7418_v0, %s5148_s30 }
 0x339   : > { %3877 = vrot.lane.b32.xlu1 %v7420_v11, %s5148_s30 }
 0x33a   : > { %v3771_v62 = vpop.permute.xlu0 %3770 }
 0x33b   : > { %3885 = vrot.lane.b32.xlu2 %v7430_v10, %s5148_s30  ;;  %v4104_v44 = vsel %vm2108_vm10, %v5064_v47, %v3771_v62  ;;  %v8372_v62 = vld [vmem:[#allocation25_spill] sm:$0xff] }
 0x33c   : > { %v4396_v21 = vunpack.c.l.b16 %v8372_v62  ;;  %v8374_v62 = vld [vmem:[#allocation10_spill] sm:$0xff] }
 0x33e   : > { %v4420_v14 = vpack.c.b16 %v4397_v15, %v4396_v21  ;;  %v4380_v21 = vunpack.c.l.b16 %v8374_v62  ;;  %v4381_v15 = vunpack.c.l.b16 %v8375_v19 }
 0x340   : > { %3848 = vrot.lane.b32.xlu0 %v7441_v33, %s5145_s27 }
 0x341   : > { %3883 = vrot.lane.b32.xlu1 %v5064_v47, %s5148_s30  ;;  %v7450_v43 = vpop.permute.xlu2 %3774 }
 0x342   : > { %v3831_v54 = vpop.permute.xlu0 %3830 }
 0x343   : > { %3768 = vrot.lane.b32.xlu2 %v7452_v59, %s5143_s25  ;;  %v7457_v39 = vsel %vm2174_vm14, %v4074_v52, %v3831_v54 }
 0x348   : > { %3887 = vrot.lane.b32.xlu0 %v7459_v58, %s5148_s30 }
 0x349   : > { %3916 = vrot.lane.b32.xlu1 %v7452_v59, %s5147_s29  ;;  %v3773_v7 = vpop.permute.xlu1 %3772  ;;  %v3853_v38 = vpop.permute.xlu2 %3852 }
 0x34a   : > { %v4107_v53 = vsel %vm2108_vm10, %v7430_v10, %v3773_v7  ;;  %v3759_v54 = vpop.permute.xlu0 %3758 }
 0x34b   : > { %v7468_v29 = vsel %vm2174_vm14, %v4107_v53, %v3853_v38  ;;  %3951 = vrot.lane.b32.xlu2 %v7441_v33, %s5150_s17 }
 0x350   : > { %3986 = vrot.lane.b32.xlu0 %v5064_v47, %s5151_s21  ;;  %v4086_v47 = vsel %vm2108_vm10, %v7388_v34, %v3759_v54  ;;  %v4412_v54 = vpack.c.b16 %v4381_v15, %v4380_v21 }
 0x351   : > { %4021 = vrot.lane.b32.xlu1 %v7005_v4, %s5152_s22  ;;  %v3833_v32 = vpop.permute.xlu1 %3832  ;;  %v3841_v52 = vpop.permute.xlu2 %3840 }
 0x353   : > { %4056 = vrot.lane.b32.xlu2 %v7175_v40, %s5153_s23 }
 0x358   : > { %4444 = vrot.lane.b32.xlu0 %v4420_v14, %s5154_s24 }
 0x359   : > { %3900 = vrot.lane.b32.xlu1 %v6704_v36, %s5147_s29  ;;  %v3839_v7 = vpop.permute.xlu1 %3838 }
 0x35a   : > { %v4129_v38 = vsel %vm2174_vm14, %v4086_v47, %v3839_v7 }
 0x35b   : > { %3935 = vrot.lane.b32.xlu2 %v6717_v9, %s5150_s17  ;;  %v4077_v9 = vsel %vm2108_vm10, %v7348_v12, %v7414_v35  ;;  %v8376_v12 = vld [vmem:[#allocation32_spill] sm:$0xff] }
 0x35c   : > { %v4123_v47 = vsel %vm2174_vm14, %v4077_v9, %v3833_v32  ;;  %v4398_v35 = vunpack.c.l.b16 %v8376_v12  ;;  %v8377_v32 = vld [vmem:[#allocation33_spill] sm:$0xff] }
 0x35d   : > { %v7487_v53 = vpop.permute.xlu2 %3858  ;;  %v4399_v21 = vunpack.c.l.b16 %v8377_v32  ;;  %v8380_v32 = vld [vmem:[#allocation8_spill] sm:$0xff] }
 0x360   : > { %3970 = vrot.lane.b32.xlu0 %v7301_v13, %s5151_s21 }
 0x361   : > { %4005 = vrot.lane.b32.xlu1 %v6761_v60, %s5152_s22  ;;  %v3851_v14 = vpop.permute.xlu1 %3850 }
 0x362   : > { %v7496_v36 = vsel %vm2174_vm14, %v4104_v44, %v3851_v14 }
 0x363   : > { %4040 = vrot.lane.b32.xlu2 %v6744_v63, %s5153_s23 }
 0x365   : > { %v3868_v7 = vpop.permute.xlu2 %3867 }
 0x366   : > { %v7505_v62 = vsel %vm2240_vm15, %v4123_v47, %v3868_v7 }
 0x368   : > { %4428 = vrot.lane.b32.xlu0 %v4412_v54, %s5154_s24 }
 0x369   : > { %3918 = vrot.lane.b32.xlu1 %v7005_v4, %s5147_s29  ;;  %v3761_v14 = vpop.permute.xlu1 %3760  ;;  %v4421_v4 = vpack.c.b16 %v4399_v21, %v4398_v35  ;;  %v4383_v21 = vunpack.c.l.b16 %v8380_v32 }
 0x36a   : > { %v3777_v44 = vpop.permute.xlu0 %3776 }
 0x36b   : > { %3953 = vrot.lane.b32.xlu2 %v7175_v40, %s5150_s17  ;;  %v4110_v40 = vsel %vm2108_vm10, %v7459_v58, %v7450_v43  ;;  %v4089_v43 = vsel %vm2108_vm10, %v7376_v31, %v3761_v14 }
 0x36c   : > { %v4131_v32 = vsel %vm2174_vm14, %v4089_v43, %v3841_v52 }
 0x36d   : > { %v3763_v19 = vpop.permute.xlu2 %3762 }
 0x370   : > { %3988 = vrot.lane.b32.xlu0 %v7430_v10, %s5151_s21 }
 0x371   : > { %4023 = vrot.lane.b32.xlu1 %v7069_v22, %s5152_s22 }
 0x372   : > { %v7518_v15 = vpop.permute.xlu0 %3836 }
 0x373   : > { %4058 = vrot.lane.b32.xlu2 %v7181_v18, %s5153_s23 }
 0x375   : > { %v3781_v9 = vpop.permute.xlu2 %3780 }
 0x378   : > { %4446 = vrot.lane.b32.xlu0 %v4421_v4, %s5154_s24  ;;  %v7542_v4 = vld [vmem:[#allocation3 + $0x9c] sm:$0xff] }
 0x379   : > { %3902 = vrot.lane.b32.xlu1 %v6761_v60, %s5147_s29  ;;  %v8379_v60 = vld [vmem:[#allocation7_spill] sm:$0xff] }
 0x37a   : > { %v3855_v10 = vpop.permute.xlu0 %3854  ;;  %v4382_v35 = vunpack.c.l.b16 %v8379_v60 }
 0x37b   : > { %v3779_v54 = vpop.permute.xlu1 %3778  ;;  %v7529_v47 = vsel %vm2174_vm14, %v4110_v40, %v3855_v10  ;;  %3937 = vrot.lane.b32.xlu2 %v6744_v63, %s5150_s17  ;;  %v4092_v63 = vsel %vm2108_vm10, %v7402_v8, %v3763_v19  ;;  %v4113_v40 = vsel %vm2108_vm10, %v7542_v4, %v3777_v44  ;;  %v7561_v19 = vld [vmem:[#allocation3 + $0xb4] sm:$0xff] }
 0x37c   : > { %v4413_v60 = vpack.c.b16 %v4383_v21, %v4382_v35  ;;  %v4119_v44 = vsel %vm2108_vm10, %v7561_v19, %v3781_v9  ;;  %v8382_v9 = vld [vmem:[#allocation29_spill] sm:$0xff] }
 0x37d   : > { %v3874_v7 = vpop.permute.xlu2 %3873  ;;  %v4401_v43 = vunpack.c.l.b16 %v8382_v9 }
 0x37e   : > { %v7534_v12 = vsel %vm2240_vm15, %v4129_v38, %v3874_v7 }
 0x37f   : > { %8378 = vst [vmem:[#allocation48_spill] sm:$0xff] %v7534_v12 }
 0x380   : > { %3972 = vrot.lane.b32.xlu0 %v7384_v51, %s5151_s21 }
 0x381   : > { %4007 = vrot.lane.b32.xlu1 %v6794_v24, %s5152_s22 }
 0x382   : > { %v3843_v38 = vpop.permute.xlu0 %3842 }
 0x383   : > { %v3857_v10 = vpop.permute.xlu1 %3856  ;;  %v7551_v7 = vsel %vm2174_vm14, %v4092_v63, %v3843_v38  ;;  %4042 = vrot.lane.b32.xlu2 %v6787_v20, %s5153_s23 }
 0x384   : > { %v7556_v14 = vsel %vm2174_vm14, %v4113_v40, %v3857_v10 }
 0x385   : > { %v7559_v12 = vpop.permute.xlu2 %3846 }
 0x388   : > { %4430 = vrot.lane.b32.xlu0 %v4413_v60, %s5154_s24 }
 0x389   : > { %3920 = vrot.lane.b32.xlu1 %v7069_v22, %s5147_s29  ;;  %v8381_v22 = vld [vmem:[#allocation28_spill] sm:$0xff] }
 0x38a   : > { %v3861_v63 = vpop.permute.xlu0 %3860  ;;  %v4400_v21 = vunpack.c.l.b16 %v8381_v22  ;;  %v4080_v22 = vsel %vm2108_vm10, %v7301_v13, %v7447_v2  ;;  %v4083_v13 = vsel %vm2108_vm10, %v7384_v51, %v7426_v41 }
 0x38b   : > { %v3866_v38 = vpop.permute.xlu1 %3865  ;;  %v7569_v40 = vsel %vm2174_vm14, %v4119_v44, %v3861_v63  ;;  %3955 = vrot.lane.b32.xlu2 %v7181_v18, %s5150_s17  ;;  %v4125_v2 = vsel %vm2174_vm14, %v4080_v22, %v7408_v56 }
 0x38c   : > { %v7575_v52 = vsel %vm2240_vm15, %v7457_v39, %v3866_v38  ;;  %v4422_v44 = vpack.c.b16 %v4401_v43, %v4400_v21  ;;  %v5012_v21 = vld [vmem:[%s8112_s3 + $0x20] sm:$0xf] }
 0x38d   : > { %v7577_v35 = vpop.permute.xlu2 %3879 }
 0x390   : > { %3990 = vrot.lane.b32.xlu0 %v7459_v58, %s5151_s21  ;;  %v7592_v58 = vld [vmem:[#allocation3 + $0xa8] sm:$0xff] }
 0x391   : > { %4025 = vrot.lane.b32.xlu1 %v7145_v1, %s5152_s22  ;;  %v4116_v9 = vsel %vm2108_vm10, %v7592_v58, %v3779_v54 }
 0x392   : > { %v3765_v10 = vpop.permute.xlu0 %3764 }
 0x393   : > { %v3845_v60 = vpop.permute.xlu1 %3844  ;;  %v4095_v18 = vsel %vm2108_vm10, %v7420_v11, %v3765_v10  ;;  %4060 = vrot.lane.b32.xlu2 %v7281_v30, %s5153_s23  ;;  %v4127_v10 = vsel %vm2174_vm14, %v4083_v13, %v7518_v15  ;;  %v8383_v15 = vld [vmem:[#allocation14_spill] sm:$0xff] }
 0x394   : > { %v7590_v39 = vsel %vm2174_vm14, %v4095_v18, %v3845_v60 }
 0x395   : > { %v3886_v63 = vpop.permute.xlu2 %3885 }
 0x396   : > { %v7596_v38 = vsel %vm2240_vm15, %v7496_v36, %v3886_v63  ;;  %v5076_v36 = vld [vmem:[%s8112_s3 + $0x20] sm:$0x30]  ;;  %v8384_v63 = vld [vmem:[#allocation15_spill] sm:$0xff] }
 0x397   : > { %v5013_v43 = vor.u32 %v5076_v36, %v5012_v21  ;;  %v4385_v22 = vunpack.c.l.b16 %v8384_v63 }
 0x398   : > { %4448 = vrot.lane.b32.xlu0 %v4422_v44, %s5154_s24  ;;  %v4384_v44 = vunpack.c.l.b16 %v8383_v15 }
 0x399   : > { %3904 = vrot.lane.b32.xlu1 %v6794_v24, %s5147_s29  ;;  %v7619_v24 = vsel %vm2174_vm14, %v4116_v9, %v7487_v53  ;;  %v4571_v56 = vsel %vm4569_vm11, %v5013_v43, 0  ;;  %v5075_v53 = vld [vmem:[%s8112_s3 + $0x18] sm:$0xff] }
 0x39a   : > { %v3870_v54 = vpop.permute.xlu0 %3869  ;;  %5080 = vmatpush.bf16.msra.mxu2 %v4571_v56  ;;  %4576 = vmatpush.bf16.msra.mxu1 %v4571_v56 }
 0x39b   : > { %v3872_v60 = vpop.permute.xlu1 %3871  ;;  %v7624_v18 = vsel %vm2240_vm15, %v4125_v2, %v3870_v54  ;;  %3939 = vrot.lane.b32.xlu2 %v6787_v20, %s5150_s17  ;;  %v5074_v20 = vld [vmem:[%s8112_s3 + $0x10] sm:$0xff]  ;;  %v5073_v2 = vld [vmem:[%s8112_s3 + $0x8] sm:$0xff] }
 0x39c   : > { %v7629_v51 = vsel %vm2240_vm15, %v4127_v10, %v3872_v60 }
 0x39d   : > { %v7631_v41 = vpop.permute.xlu2 %3768 }
 0x39e   : > { %5081 = vmatpush.bf16.msra.mxu2 %v5075_v53  ;;  %4577 = vmatpush.bf16.msra.mxu1 %v5075_v53  ;;  %v8386_v53 = vld [vmem:[#allocation36_spill] sm:$0xff] }
 0x39f   : > { %v4403_v15 = vunpack.c.l.b16 %v8386_v53 }
 0x3a0   : > { %3974 = vrot.lane.b32.xlu0 %v7388_v34, %s5151_s21  ;;  %v4414_v34 = vpack.c.b16 %v4385_v22, %v4384_v44 }
 0x3a1   : > { %4009 = vrot.lane.b32.xlu1 %v7073_v26, %s5152_s22 }
 0x3a2   : > { %v3876_v9 = vpop.permute.xlu0 %3875  ;;  %5082 = vmatpush.bf16.msra.mxu2 %v5074_v20  ;;  %4578 = vmatpush.bf16.msra.mxu1 %v5074_v20 }
 0x3a3   : > { %v3767_v21 = vpop.permute.xlu1 %3766  ;;  %v7646_v36 = vsel %vm2240_vm15, %v4131_v32, %v3876_v9  ;;  %4044 = vrot.lane.b32.xlu2 %v7082_v50, %s5153_s23  ;;  %v5072_v32 = vld [vmem:[%s8112_s3] sm:$0xff] }
 0x3a4   : > { %v4098_v9 = vsel %vm2108_vm10, %v7412_v42, %v3767_v21  ;;  %v8387_v21 = vld [vmem:[#allocation5_spill] sm:$0xff] }
 0x3a5   : > { %v3952_v13 = vpop.permute.xlu2 %3951 }
 0x3a6   : > { %5083 = vmatpush.bf16.msra.mxu2 %v5073_v2  ;;  %4579 = vmatpush.bf16.msra.mxu1 %v5073_v2 }
 0x3a8   : > { %4432 = vrot.lane.b32.xlu0 %v4414_v34, %s5154_s24 }
 0x3a9   : > { %3922 = vrot.lane.b32.xlu1 %v7145_v1, %s5147_s29  ;;  %v8385_v1 = vld [vmem:[#allocation35_spill] sm:$0xff] }
 0x3aa   : > { %v3882_v54 = vpop.permute.xlu0 %3881  ;;  %5084 = vmatpush.bf16.msra.mxu2 %v5072_v32  ;;  %4580 = vmatpush.bf16.msra.mxu1 %v5072_v32  ;;  %v4402_v56 = vunpack.c.l.b16 %v8385_v1  ;;  %v8388_v1 = vld [vmem:[#allocation6_spill] sm:$0xff] }
 0x3ab   : > { %v3878_v43 = vpop.permute.xlu1 %3877  ;;  %3957 = vrot.lane.b32.xlu2 %v7281_v30, %s5150_s17 }
 0x3ac   : > { %v7663_v10 = vsel %vm2240_vm15, %v7551_v7, %v3878_v43  ;;  %v7680_v7 = vsel %vm2240_vm15, %v7590_v39, %v7577_v35  ;;  %v4423_v63 = vpack.c.b16 %v4403_v15, %v4402_v56  ;;  %v4137_v39 = vsel %vm2174_vm14, %v4098_v9, %v7559_v12 }
 0x3ad   : > { %v4057_v60 = vpop.permute.xlu2 %4056  ;;  %v4169_v32 = vsel %vm2240_vm15, %v4137_v39, %v3882_v54  ;;  %v4386_v43 = vunpack.c.l.b16 %v8387_v21 }
 0x3b0   : > { %3992 = vrot.lane.b32.xlu0 %v7542_v4, %s5151_s21 }
 0x3b1   : > { %4027 = vrot.lane.b32.xlu1 %v7212_v5, %s5152_s22 }
 0x3b2   : > { %v7671_v44 = vpop.permute.xlu0 %3848 }
 0x3b3   : > { %v7673_v30 = vpop.permute.xlu1 %3883  ;;  %4062 = vrot.lane.b32.xlu2 %v7320_v46, %s5153_s23 }
 0x3b5   : > { %v3936_v22 = vpop.permute.xlu2 %3935 }
 0x3b8   : > { %4450 = vrot.lane.b32.xlu0 %v4423_v63, %s5154_s24 }
 0x3b9   : > { %3906 = vrot.lane.b32.xlu1 %v7073_v26, %s5147_s29 }
 0x3ba   : > { %v3888_v20 = vpop.permute.xlu0 %3887 }
 0x3bb   : > { %v3917_v34 = vpop.permute.xlu1 %3916  ;;  %v7689_v2 = vsel %vm2240_vm15, %v7468_v29, %v3888_v20  ;;  %3941 = vrot.lane.b32.xlu2 %v7082_v50, %s5150_s17  ;;  %v4387_v29 = vunpack.c.l.b16 %v8388_v1 }
 0x3bc   : > { %v4201_v26 = vsel %vm2306_vm6, %v4169_v32, %v3917_v34  ;;  %v8390_v32 = vld [vmem:[#allocation43_spill] sm:$0xff] }
 0x3bd   : > { %v4041_v35 = vpop.permute.xlu2 %4040  ;;  %v4234_v12 = vsel %vm4216_vm8, %v4201_v26, %v3952_v13  ;;  %v4405_v26 = vunpack.c.l.b16 %v8390_v32 }
 0x3c0   : > { %3976 = vrot.lane.b32.xlu0 %v7376_v31, %s5151_s21  ;;  %v4415_v31 = vpack.c.b16 %v4387_v29, %v4386_v43 }
 0x3c1   : > { %4011 = vrot.lane.b32.xlu1 %v7160_v3, %s5152_s22 }
 0x3c2   : > { %v3987_v50 = vpop.permute.xlu0 %3986 }
 0x3c3   : > { %v4022_v56 = vpop.permute.xlu1 %4021  ;;  %4046 = vrot.lane.b32.xlu2 %v7100_v28, %s5153_s23  ;;  %v4267_v54 = vsel %vm4249_vm12, %v4234_v12, %v3987_v50 }
 0x3c4   : > { %v4300_v15 = vsel %vm4282_vm3, %v4267_v54, %v4022_v56 }
 0x3c5   : > { %v3954_v53 = vpop.permute.xlu2 %3953  ;;  %v4333_v13 = vsel %vm4315_vm0, %v4300_v15, %v4057_v60 }
 0x3c8   : > { %4434 = vrot.lane.b32.xlu0 %v4415_v31, %s5154_s24 }
 0x3c9   : > { %3889 = vrot.lane.b32.xlu1 %v7542_v4, %s5148_s30  ;;  %v8389_v4 = vld [vmem:[#allocation42_spill] sm:$0xff] }
 0x3ca   : > { %v4445_v63 = vpop.permute.xlu0 %4444  ;;  %v4404_v60 = vunpack.c.l.b16 %v8389_v4 }
 0x3cb   : > { %v3901_v20 = vpop.permute.xlu1 %3900  ;;  %3924 = vrot.lane.b32.xlu2 %v7212_v5, %s5147_s29  ;;  %v4478_v9 = vsel %vm4460_vm2, %v4333_v13, %v4445_v63  ;;  %v8392_v13 = vld [vmem:[#allocation13_spill] sm:$0xff] }
 0x3cc   : > { %5022 = vmatmul.msk.bf16.vlgmr.msra.gmra.mxu2 %vm4536_vm7, %v4478_v9  ;;  %v4185_v39 = vsel %vm2306_vm6, %v7575_v52, %v3901_v20  ;;  %v4424_v29 = vpack.c.b16 %v4405_v26, %v4404_v60  ;;  %v4389_v20 = vunpack.c.l.b16 %v8392_v13 }
 0x3cd   : > { %v4059_v34 = vpop.permute.xlu2 %4058  ;;  %v4218_v43 = vsel %vm4216_vm8, %v4185_v39, %v3936_v22  ;;  %v4101_v22 = vsel %vm2108_vm10, %v7418_v0, %v7631_v41 }
 0x3ce   : > { %v4139_v31 = vsel %vm2174_vm14, %v4101_v22, %v7671_v44 }
 0x3cf   : > { %v4171_v63 = vsel %vm2240_vm15, %v4139_v31, %v7673_v30 }
 0x3d0   : > { %3959 = vrot.lane.b32.xlu0 %v7320_v46, %s5150_s17 }
 0x3d1   : > { %3994 = vrot.lane.b32.xlu1 %v7592_v58, %s5151_s21 }
 0x3d2   : > { %v3971_v21 = vpop.permute.xlu0 %3970 }
 0x3d3   : > { %v4006_v5 = vpop.permute.xlu1 %4005  ;;  %4029 = vrot.lane.b32.xlu2 %v7286_v45, %s5152_s22  ;;  %v4251_v1 = vsel %vm4249_vm12, %v4218_v43, %v3971_v21 }
 0x3d4   : > { %v4284_v46 = vsel %vm4282_vm3, %v4251_v1, %v4006_v5 }
 0x3d5   : > { %v3938_v52 = vpop.permute.xlu2 %3937  ;;  %v4317_v56 = vsel %vm4315_vm0, %v4284_v46, %v4041_v35  ;;  %v8394_v46 = vld [vmem:[#allocation41_spill] sm:$0xff] }
 0x3d8   : > { %4064 = vrot.lane.b32.xlu0 %v7263_v61, %s5153_s23 }
 0x3d9   : > { %4452 = vrot.lane.b32.xlu1 %v4424_v29, %s5154_s24 }
 0x3da   : > { %v4429_v50 = vpop.permute.xlu0 %4428 }
 0x3db   : > { %v3919_v12 = vpop.permute.xlu1 %3918  ;;  %3908 = vrot.lane.b32.xlu2 %v7160_v3, %s5147_s29  ;;  %v4462_v54 = vsel %vm4460_vm2, %v4317_v56, %v4429_v50  ;;  %v8391_v3 = vld [vmem:[#allocation12_spill] sm:$0xff]  ;;  %v4407_v50 = vunpack.c.l.b16 %v8394_v46 }
 0x3dc   : > { %5014 = vmatmul.msk.bf16.vlgmr.msra.gmra.mxu1 %vm4536_vm7, %v4462_v54  ;;  %v4203_v35 = vsel %vm2306_vm6, %v4171_v63, %v3919_v12  ;;  %v4388_v41 = vunpack.c.l.b16 %v8391_v3  ;;  %v3037_v63 = vld [vmem:[#allocation3 + $0xc4] sm:$0xf]  ;;  %v3036_v3 = vld [vmem:[#allocation3 + $0xc0] sm:$0xf] }
 0x3dd   : > { %v4043_v15 = vpop.permute.xlu2 %4042  ;;  %v4236_v39 = vsel %vm4216_vm8, %v4203_v35, %v3954_v53  ;;  %v3600_v13 = vshrl.u32 %v3037_v63, 16 }
 0x3de   : > { %v4416_v60 = vpack.c.b16 %v4389_v20, %v4388_v41  ;;  %v3596_v41 = vshll.u32 %v3037_v63, 16 }
 0x3e0   : > { %3943 = vrot.lane.b32.xlu0 %v7100_v28, %s5150_s17 }
 0x3e1   : > { %3978 = vrot.lane.b32.xlu1 %v7402_v8, %s5151_s21 }
 0x3e2   : > { %v3989_v9 = vpop.permute.xlu0 %3988 }
 0x3e3   : > { %v4024_v44 = vpop.permute.xlu1 %4023  ;;  %4013 = vrot.lane.b32.xlu2 %v7328_v27, %s5152_s22  ;;  %v4269_v30 = vsel %vm4249_vm12, %v4236_v39, %v3989_v9 }
 0x3e4   : > { %v4302_v28 = vsel %vm4282_vm3, %v4269_v30, %v4024_v44  ;;  %v8395_v44 = vld [vmem:[#allocation16_spill] sm:$0xff]  ;;  %v8396_v30 = vld [vmem:[#allocation17_spill] sm:$0xff] }
 0x3e5   : > { %v3956_v4 = vpop.permute.xlu2 %3955  ;;  %v4335_v32 = vsel %vm4315_vm0, %v4302_v28, %v4059_v34  ;;  %v4390_v39 = vunpack.c.l.b16 %v8395_v44  ;;  %v3590_v28 = vshll.u32 %v3036_v3, 16 }
 0x3e8   : > { %4048 = vrot.lane.b32.xlu0 %v7311_v23, %s5153_s23 }
 0x3e9   : > { %4436 = vrot.lane.b32.xlu1 %v4416_v60, %s5154_s24  ;;  %v3587_v60 = vshrl.u32 %v3036_v3, 16 }
 0x3ea   : > { %v4447_v8 = vpop.permute.xlu0 %4446 }
 0x3eb   : > { %v3903_v26 = vpop.permute.xlu1 %3902  ;;  %3891 = vrot.lane.b32.xlu2 %v7592_v58, %s5148_s30  ;;  %v4480_v53 = vsel %vm4460_vm2, %v4335_v32, %v4447_v8  ;;  %v8393_v58 = vld [vmem:[#allocation37_spill] sm:$0xff]  ;;  %v3598_v8 = vrot.slane %v3596_v41, 5  ;;  %v3602_v32 = vrot.slane %v3600_v13, 4  ;;  %v4920_v13 = vrot.slane %v3036_v3, 9 }
 0x3ec   : > { %5023 = vmatmul.msk.bf16.gmra.mxu2 %vm4536_vm7, %v4480_v53  ;;  %v4187_v5 = vsel %vm2306_vm6, %v7505_v62, %v3903_v26  ;;  %v4406_v29 = vunpack.c.l.b16 %v8393_v58 }
 0x3ed   : > { %v4061_v21 = vpop.permute.xlu2 %4060  ;;  %v4220_v1 = vsel %vm4216_vm8, %v4187_v5, %v3938_v52  ;;  %v3038_v5 = vld [vmem:[#allocation3 + $0xc8] sm:$0x1] }
 0x3ee   : > { %v4425_v22 = vpack.c.b16 %v4407_v50, %v4406_v29  ;;  %v3606_v58 = vshll.u32 %v3038_v5, 16  ;;  %v3615_v29 = vrot.slane %v3037_v63, 5  ;;  %v3618_v63 = vrot.slane %v3038_v5, 5 }
 0x3f0   : > { %3926 = vrot.lane.b32.xlu0 %v7286_v45, %s5147_s29 }
 0x3f1   : > { %3961 = vrot.lane.b32.xlu1 %v7263_v61, %s5150_s17 }
 0x3f2   : > { %v3973_v43 = vpop.permute.xlu0 %3972 }
 0x3f3   : > { %v4008_v34 = vpop.permute.xlu1 %4007  ;;  %3996 = vrot.lane.b32.xlu2 %v7561_v19, %s5151_s21  ;;  %v4253_v56 = vsel %vm4249_vm12, %v4220_v1, %v3973_v43  ;;  %v3603_v43 = vor.u32 %v3602_v32, %v3598_v8  ;;  %v8398_v32 = vld [vmem:[#allocation46_spill] sm:$0xff] }
 0x3f4   : > { %v4286_v45 = vsel %vm4282_vm3, %v4253_v56, %v4008_v34 }
 0x3f5   : > { %v7776_v62 = vpop.permute.xlu2 %3939  ;;  %v4319_v52 = vsel %vm4315_vm0, %v4286_v45, %v4043_v15  ;;  %v3604_v45 = vrot.slane %v3603_v43, 4 }
 0x3f8   : > { %4031 = vrot.lane.b32.xlu0 %v7362_v17, %s5152_s22 }
 0x3f9   : > { %4066 = vrot.lane.b32.xlu1 %v7346_v57, %s5153_s23 }
 0x3fa   : > { %v4431_v61 = vpop.permute.xlu0 %4430 }
 0x3fb   : > { %v3921_v12 = vpop.permute.xlu1 %3920  ;;  %4454 = vrot.lane.b32.xlu2 %v4425_v22, %s5154_s24  ;;  %v4464_v54 = vsel %vm4460_vm2, %v4319_v52, %v4431_v61  ;;  %v3608_v61 = vrot.slane %v3606_v58, 5  ;;  %v3617_v52 = vrot.slane %v3615_v29, 4 }
 0x3fc   : > { %5015 = vmatmul.msk.bf16.gmra.mxu1 %vm4536_vm7, %v4464_v54  ;;  %v4205_v35 = vsel %vm2306_vm6, %v7596_v38, %v3921_v12  ;;  %v4391_v38 = vunpack.c.l.b16 %v8396_v30  ;;  %v7835_v30 = vld [vmem:[#allocation3 + $0xc0] sm:$0xff] }
 0x3fd   : > { %v7787_v31 = vpop.permute.xlu2 %4044  ;;  %v4238_v9 = vsel %vm4216_vm8, %v4205_v35, %v3956_v4  ;;  %v3592_v4 = vrot.slane %v3590_v28, 5  ;;  %v3609_v54 = vsel %vm5290_vm13, %v3604_v45, %v3608_v61  ;;  %v8397_v28 = vld [vmem:[#allocation44_spill] sm:$0xff] }
 0x3fe   : > { %v4417_v53 = vpack.c.b16 %v4391_v38, %v4390_v39  ;;  %v410_v38 = vld [vmem:[#allocation3 + $0xcc] sm:$0x1] }
 0x400   : > { %3910 = vrot.lane.b32.xlu0 %v7328_v27, %s5147_s29 }
 0x401   : > { %3945 = vrot.lane.b32.xlu1 %v7311_v23, %s5150_s17 }
 0x402   : > { %v3991_v15 = vpop.permute.xlu0 %3990 }
 0x403   : > { %v4026_v20 = vpop.permute.xlu1 %4025  ;;  %3980 = vrot.lane.b32.xlu2 %v7420_v11, %s5151_s21  ;;  %v4271_v27 = vsel %vm4249_vm12, %v4238_v9, %v3991_v15  ;;  %v3589_v11 = vrot.slane %v3587_v60, 4  ;;  %v3619_v15 = vsel %vm5796_vm1, %v3617_v52, %v3618_v63 }
 0x404   : > { %v4304_v23 = vsel %vm4282_vm3, %v4271_v27, %v4026_v20  ;;  %v3898_v20 = vunpack.c.l.b16 %v3609_v54  ;;  %v3933_v3 = vunpack.c.l.b16 %v3619_v15 }
 0x405   : > { %v7801_v26 = vpop.permute.xlu2 %3957  ;;  %v4337_v1 = vsel %vm4315_vm0, %v4304_v23, %v4061_v21  ;;  %v3593_v56 = vor.u32 %v3592_v4, %v3589_v11  ;;  %v4409_v23 = vunpack.c.l.b16 %v8398_v32 }
 0x407   : > { %v3594_v21 = vrot.slane %v3593_v56, 4 }
 0x408   : > { %4015 = vrot.lane.b32.xlu0 %v7368_v48, %s5152_s22 }
 0x409   : > { %4050 = vrot.lane.b32.xlu1 %v7370_v55, %s5153_s23  ;;  %v3599_v41 = vsel %vm5290_vm13, %v3594_v21, %v3598_v8  ;;  %v4408_v8 = vunpack.c.l.b16 %v8397_v28 }
 0x40a   : > { %v4449_v34 = vpop.permute.xlu0 %4448  ;;  %v3897_v39 = vunpack.c.l.b16 %v3599_v41 }
 0x40b   : > { %v3905_v46 = vpop.permute.xlu1 %3904  ;;  %4438 = vrot.lane.b32.xlu2 %v4417_v53, %s5154_s24  ;;  %v4482_v50 = vsel %vm4460_vm2, %v4337_v1, %v4449_v34  ;;  %v4426_v43 = vpack.c.b16 %v4409_v23, %v4408_v8  ;;  %v465_v34 = vld [vmem:[#allocation3 + $0xd4] sm:$0x1]  ;;  %v3040_v1 = vld [vmem:[#allocation3 + $0xd0] sm:$0xf] }
 0x40c   : > { %5024 = vmatmul.msk.bf16.gmra.mxu2 %vm4536_vm7, %v4482_v50  ;;  %v4189_v12 = vsel %vm2306_vm6, %v7624_v18, %v3905_v46  ;;  %v7838_v27 = vpack.c.b16 %v3898_v20, %v3897_v39  ;;  %v3630_v50 = vshll.u32 %v3040_v1, 16  ;;  %v3634_v61 = vshrl.u32 %v3040_v1, 16 }
 0x40d   : > { %v7812_v22 = vpop.permute.xlu2 %4062  ;;  %v3649_v32 = vrot.slane %v3040_v1, 5 }
 0x40e   : > { %v3632_v21 = vrot.slane %v3630_v50, 5 }
 0x410   : > { %3893 = vrot.lane.b32.xlu0 %v7561_v19, %s5148_s30  ;;  %v4222_v19 = vsel %vm4216_vm8, %v4189_v12, %v7776_v62 }
 0x411   : > { %3928 = vrot.lane.b32.xlu1 %v7362_v17, %s5147_s29  ;;  %v3616_v17 = vsel %vm5796_vm1, %v4920_v13, %v3615_v29  ;;  %v466_v29 = vsel %vm6549_vm5, 0, %v465_v34 }
 0x412   : > { %v3975_v35 = vpop.permute.xlu0 %3974  ;;  %v3932_v62 = vunpack.c.l.b16 %v3616_v17  ;;  %467 = vst [vmem:[#allocation3 + $0xd4] sm:$0x1] %v466_v29 }
 0x413   : > { %v4010_v18 = vpop.permute.xlu1 %4009  ;;  %3963 = vrot.lane.b32.xlu2 %v7346_v57, %s5150_s17  ;;  %v4255_v9 = vsel %vm4249_vm12, %v4222_v19, %v3975_v35  ;;  %v411_v57 = vsel %vm6518_vm4, 0, %v410_v38  ;;  %v3636_v35 = vrot.slane %v3634_v61, 4  ;;  %v8401_v38 = vld [vmem:[#allocation60_spill] sm:$0xff]  ;;  %v8402_v61 = vld [vmem:[#allocation50_spill] sm:$0xff] }
 0x414   : > { %v4288_v60 = vsel %vm4282_vm3, %v4255_v9, %v4010_v18  ;;  %412 = vst [vmem:[#allocation3 + $0xcc] sm:$0x1] %v411_v57  ;;  %v7848_v53 = vpack.c.b16 %v3933_v3, %v3932_v62 }
 0x415   : > { %v7833_v44 = vpop.permute.xlu2 %3941  ;;  %v4321_v11 = vsel %vm4315_vm0, %v4288_v60, %v7787_v31 }
 0x418   : > { %3998 = vrot.lane.b32.xlu0 %v7835_v30, %s5151_s21 }
 0x419   : > { %4033 = vrot.lane.b32.xlu1 %v7838_v27, %s5152_s22  ;;  %v3041_v13 = vld [vmem:[#allocation3 + $0xd4] sm:$0x1] }
 0x41a   : > { %v4433_v5 = vpop.permute.xlu0 %4432  ;;  %v3640_v9 = vshll.u32 %v3041_v13, 16 }
 0x41b   : > { %v3923_v4 = vpop.permute.xlu1 %3922  ;;  %4068 = vrot.lane.b32.xlu2 %v7848_v53, %s5153_s23  ;;  %v4466_v25 = vsel %vm4460_vm2, %v4321_v11, %v4433_v5  ;;  %v3039_v46 = vld [vmem:[#allocation3 + $0xcc] sm:$0xf] }
 0x41c   : > { %5016 = vmatmul.msk.bf16.gmra.mxu1 %vm4536_vm7, %v4466_v25  ;;  %v4207_v31 = vsel %vm2306_vm6, %v7689_v2, %v3923_v4  ;;  %v3621_v56 = vshrl.u32 %v3039_v46, 16  ;;  %v3624_v45 = vshll.u32 %v3039_v46, 16  ;;  %v3642_v28 = vrot.slane %v3640_v9, 5 }
 0x41d   : > { %v7856_v58 = vpop.permute.xlu2 %4046  ;;  %v4240_v49 = vsel %vm4216_vm8, %v4207_v31, %v7801_v26  ;;  %v8400_v26 = vld [vmem:[#allocation24_spill] sm:$0xff]  ;;  %v4921_v11 = vrot.slane %v3039_v46, 9  ;;  %v3651_v4 = vrot.slane %v3649_v32, 4  ;;  %v3652_v25 = vrot.slane %v3041_v13, 5  ;;  %v5071_v31 = vld [vmem:[#allocation3 + $0xcc] sm:$0xff] }
 0x41e   : > { %v3623_v2 = vrot.slane %v3621_v56, 4  ;;  %v3626_v63 = vrot.slane %v3624_v45, 5  ;;  %v4393_v19 = vunpack.c.l.b16 %v8400_v26 }
 0x41f   : > { %v3653_v46 = vsel %vm5796_vm1, %v3651_v4, %v3652_v25 }
 0x420   : > { %4456 = vrot.lane.b32.xlu0 %v4426_v43, %s5154_s24  ;;  %v3627_v20 = vor.u32 %v3626_v63, %v3623_v2 }
 0x421   : > { %3912 = vrot.lane.b32.xlu1 %v7368_v48, %s5147_s29  ;;  %v8399_v48 = vld [vmem:[#allocation23_spill] sm:$0xff] }
 0x422   : > { %v3993_v52 = vpop.permute.xlu0 %3992  ;;  %v4392_v18 = vunpack.c.l.b16 %v8399_v48  ;;  %v3628_v62 = vrot.slane %v3627_v20, 4 }
 0x423   : > { %v4028_v12 = vpop.permute.xlu1 %4027  ;;  %3947 = vrot.lane.b32.xlu2 %v7370_v55, %s5150_s17  ;;  %v4273_v54 = vsel %vm4249_vm12, %v4240_v49, %v3993_v52  ;;  %v3637_v55 = vor.u32 %v3636_v35, %v3632_v21  ;;  %v4410_v52 = vunpack.c.l.b16 %v8402_v61 }
 0x424   : > { %v4306_v15 = vsel %vm4282_vm3, %v4273_v54, %v4028_v12  ;;  %v8403_v12 = vld [vmem:[#allocation51_spill] sm:$0xff] }
 0x425   : > { %v7870_v41 = vpop.permute.xlu2 %3924  ;;  %v4339_v39 = vsel %vm4315_vm0, %v4306_v15, %v7812_v22  ;;  %v3638_v57 = vrot.slane %v3637_v55, 4  ;;  %v3633_v22 = vsel %vm5290_vm13, %v3628_v62, %v3632_v21  ;;  %v4411_v49 = vunpack.c.l.b16 %v8403_v12  ;;  %v8405_v55 = vld [vmem:[#allocation22_spill] sm:$0xff] }
 0x426   : > { %v4395_v9 = vunpack.c.l.b16 %v8405_v55 }
 0x427   : > { %v3643_v5 = vsel %vm5290_vm13, %v3638_v57, %v3642_v28  ;;  %v4427_v63 = vpack.c.b16 %v4411_v49, %v4410_v52  ;;  %v8406_v57 = vld [vmem:[#allocation48_spill] sm:$0xff] }
 0x428   : > { %3982 = vrot.lane.b32.xlu0 %v7412_v42, %s5151_s21  ;;  %v4418_v42 = vpack.c.b16 %v4393_v19, %v4392_v18  ;;  %v4003_v29 = vunpack.c.l.b16 %v3643_v5  ;;  %v8404_v19 = vld [vmem:[#allocation21_spill] sm:$0xff] }
 0x429   : > { %4017 = vrot.lane.b32.xlu1 %v7404_v37, %s5152_s22  ;;  %v4394_v20 = vunpack.c.l.b16 %v8404_v19 }
 0x42a   : > { %v4451_v17 = vpop.permute.xlu0 %4450 }
 0x42b   : > { %v3907_v3 = vpop.permute.xlu1 %3906  ;;  %4052 = vrot.lane.b32.xlu2 %v8401_v38, %s5153_s23  ;;  %v4484_v60 = vsel %vm4460_vm2, %v4339_v39, %v4451_v17 }
 0x42c   : > { %5025 = vmatmul.msk.bf16.gmra.mxu2 %vm4536_vm7, %v4484_v60  ;;  %v4191_v23 = vsel %vm2306_vm6, %v7629_v51, %v3907_v3  ;;  %v4002_v51 = vunpack.c.l.b16 %v3633_v22 }
 0x42d   : > { %v4030_v8 = vpop.permute.xlu2 %4029  ;;  %v4224_v1 = vsel %vm4216_vm8, %v4191_v23, %v7833_v44 }
 0x42e   : > { %v4004_v45 = vpack.c.b16 %v4003_v29, %v4002_v51 }
 0x430   : > { %4440 = vrot.lane.b32.xlu0 %v4418_v42, %s5154_s24 }
 0x431   : > { %3895 = vrot.lane.b32.xlu1 %v7835_v30, %s5148_s30  ;;  %v3650_v30 = vsel %vm5796_vm1, %v4921_v11, %v3649_v32 }
 0x432   : > { %v3977_v43 = vpop.permute.xlu0 %3976  ;;  %v4037_v44 = vunpack.c.l.b16 %v3650_v30 }
 0x433   : > { %v4012_v34 = vpop.permute.xlu1 %4011  ;;  %3930 = vrot.lane.b32.xlu2 %v7838_v27, %s5147_s29  ;;  %v4257_v50 = vsel %vm4249_vm12, %v4224_v1, %v3977_v43  ;;  %v4038_v27 = vunpack.c.l.b16 %v3653_v46 }
 0x434   : > { %v4290_v56 = vsel %vm4282_vm3, %v4257_v50, %v4012_v34 }
 0x435   : > { %v3909_v6 = vpop.permute.xlu2 %3908  ;;  %v4323_v54 = vsel %vm4315_vm0, %v4290_v56, %v7856_v58 }
 0x436   : > { %v4193_v28 = vsel %vm2306_vm6, %v8406_v57, %v3909_v6 }
 0x438   : > { %3965 = vrot.lane.b32.xlu0 %v7848_v53, %s5150_s17  ;;  %v4039_v53 = vpack.c.b16 %v4038_v27, %v4037_v44 }
 0x439   : > { %4000 = vrot.lane.b32.xlu1 %v5071_v31, %s5151_s21 }
 0x43a   : > { %v4435_v21 = vpop.permute.xlu0 %4434 }
 0x43b   : > { %v3890_v16 = vpop.permute.xlu1 %3889  ;;  %4035 = vrot.lane.b32.xlu2 %v4004_v45, %s5152_s22  ;;  %v4468_v2 = vsel %vm4460_vm2, %v4323_v54, %v4435_v21 }
 0x43c   : > { %5017 = vmatmul.msk.bf16.gmra.mxu1 %vm4536_vm7, %v4468_v2  ;;  %v4177_v13 = vsel %vm2240_vm15, %v7529_v47, %v3890_v16 }
 0x43d   : > { %v4014_v35 = vpop.permute.xlu2 %4013  ;;  %v4209_v58 = vsel %vm2306_vm6, %v4177_v13, %v7870_v41 }
 0x440   : > { %4070 = vrot.lane.b32.xlu0 %v4039_v53, %s5153_s23 }
 0x441   : > { %4458 = vrot.lane.b32.xlu1 %v4427_v63, %s5154_s24 }
 0x442   : > { %v3960_v15 = vpop.permute.xlu0 %3959 }
 0x443   : > { %v3995_v48 = vpop.permute.xlu1 %3994  ;;  %3914 = vrot.lane.b32.xlu2 %v7404_v37, %s5147_s29  ;;  %v4242_v18 = vsel %vm4216_vm8, %v4209_v58, %v3960_v15 }
 0x444   : > { %v4275_v26 = vsel %vm4249_vm12, %v4242_v18, %v3995_v48 }
 0x445   : > { %v3892_v47 = vpop.permute.xlu2 %3891  ;;  %v4308_v41 = vsel %vm4282_vm3, %v4275_v26, %v4030_v8 }
 0x446   : > { %v4179_v56 = vsel %vm2240_vm15, %v7556_v14, %v3892_v47 }
 0x448   : > { %3949 = vrot.lane.b32.xlu0 %v8401_v38, %s5150_s17  ;;  %v7938_v38 = vld [vmem:[%s8113_s4] ss:$0 sm:$0xff] }
 0x449   : > { %3984 = vrot.lane.b32.xlu1 %v7418_v0, %s5151_s21  ;;  %v4419_v0 = vpack.c.b16 %v4395_v9, %v4394_v20 }
 0x44a   : > { %v4065_v17 = vpop.permute.xlu0 %4064 }
 0x44b   : > { %v4453_v37 = vpop.permute.xlu1 %4452  ;;  %v4341_v39 = vsel %vm4315_vm0, %v4308_v41, %v4065_v17  ;;  %4019 = vrot.lane.b32.xlu2 %v7452_v59, %s5152_s22 }
 0x44c   : > { %v4486_v3 = vsel %vm4460_vm2, %v4341_v39, %v4453_v37 }
 0x44d   : > { %5026 = vmatmul.msk.bf16.gmra.mxu2 %vm4536_vm7, %v4486_v3  ;;  %v3997_v8 = vpop.permute.xlu2 %3996 }
 0x44f   : > { %v4622_v60 = vpop.f32.mrf.mxu2 }
 0x450   : > { %v4623_v42 = vadd.f32 %v7938_v38, %v4622_v60  ;;  %4054 = vrot.lane.b32.xlu0 %v7441_v33, %s5153_s23 }
 0x451   : > { %4442 = vrot.lane.b32.xlu1 %v4419_v0, %s5154_s24 }
 0x452   : > { %v4678_v59 = vmax.f32 %v4623_v42, 0.0  ;;  %v3944_v62 = vpop.permute.xlu0 %3943 }
 0x453   : > { %v3979_v32 = vpop.permute.xlu1 %3978  ;;  %v4226_v33 = vsel %vm4216_vm8, %v4193_v28, %v3944_v62 }
 0x454   : > { %4710 = vst.msk [vmem:[%s7949_s16 + $0x80] sm:$0xff] %vm2108_vm10, %v4678_v59  ;;  %v4259_v23 = vsel %vm4249_vm12, %v4226_v33, %v3979_v32 }
 0x455   : > { %v4292_v43 = vsel %vm4282_vm3, %v4259_v23, %v4014_v35  ;;  %v4455_v6 = vpop.permute.xlu2 %4454 }
 0x457   : > { %v4624_v22 = vpop.f32.mrf.mxu2 }
 0x458   : > { %v4625_v5 = vadd.f32 %v7938_v38, %v4624_v22 }
 0x459   : > { %v4582_v11 = vpop.f32.mrf.mxu1 }
 0x45a   : > { %v4679_v4 = vmax.f32 %v4625_v5, 0.0  ;;  %v4583_v25 = vadd.f32 %v7938_v38, %v4582_v11  ;;  %v4049_v34 = vpop.permute.xlu0 %4048 }
 0x45b   : > { %v4437_v1 = vpop.permute.xlu1 %4436  ;;  %v4325_v51 = vsel %vm4315_vm0, %v4292_v43, %v4049_v34 }
 0x45c   : > { %4711 = vst.msk [vmem:[%s7949_s16 + $0x88] sm:$0xff] %vm2108_vm10, %v4679_v4  ;;  %v4662_v29 = vmax.f32 %v4583_v25, 0.0  ;;  %v4470_v50 = vsel %vm4460_vm2, %v4325_v51, %v4437_v1 }
 0x45d   : > { %5018 = vmatmul.msk.bf16.gmra.mxu1 %vm4536_vm7, %v4470_v50  ;;  %v3981_v61 = vpop.permute.xlu2 %3980 }
 0x45e   : > { %4694 = vst.msk [vmem:[%s7949_s16] sm:$0xff] %vm2108_vm10, %v4662_v29 }
 0x461   : > { %v4584_v31 = vpop.f32.mrf.mxu1 }
 0x462   : > { %v4585_v30 = vadd.f32 %v7938_v38, %v4584_v31  ;;  %v3927_v46 = vpop.permute.xlu0 %3926 }
 0x463   : > { %v3962_v45 = vpop.permute.xlu1 %3961  ;;  %v4211_v27 = vsel %vm2306_vm6, %v4179_v56, %v3927_v46 }
 0x464   : > { %v4663_v44 = vmax.f32 %v4585_v30, 0.0  ;;  %v4244_v52 = vsel %vm4216_vm8, %v4211_v27, %v3962_v45 }
 0x465   : > { %v4277_v12 = vsel %vm4249_vm12, %v4244_v52, %v3997_v8  ;;  %v4439_v63 = vpop.permute.xlu2 %4438 }
 0x466   : > { %4695 = vst.msk [vmem:[%s7949_s16 + $0x8] sm:$0xff] %vm2108_vm10, %v4663_v44 }
 0x46a   : > { %v4032_v49 = vpop.permute.xlu0 %4031 }
 0x46b   : > { %v4067_v21 = vpop.permute.xlu1 %4066  ;;  %v4310_v54 = vsel %vm4282_vm3, %v4277_v12, %v4032_v49 }
 0x46c   : > { %v4343_v16 = vsel %vm4315_vm0, %v4310_v54, %v4067_v21 }
 0x46d   : > { %v4488_v14 = vsel %vm4460_vm2, %v4343_v16, %v4455_v6  ;;  %v3964_v41 = vpop.permute.xlu2 %3963 }
 0x46e   : > { %5027 = vmatmul.msk.bf16.gmra.mxu2 %vm4536_vm7, %v4488_v14 }
 0x46f   : > { %v4627_v2 = vpop.f32.mrf.mxu2 }
 0x470   : > { %v4628_v53 = vadd.f32 %v7938_v38, %v4627_v2 }
 0x472   : > { %v4680_v35 = vmax.f32 %v4628_v53, 0.0  ;;  %v3911_v13 = vpop.permute.xlu0 %3910 }
 0x473   : > { %v3946_v15 = vpop.permute.xlu1 %3945  ;;  %v4195_v48 = vsel %vm2306_vm6, %v7646_v36, %v3911_v13 }
 0x474   : > { %4712 = vst.msk [vmem:[%s7949_s16 + $0x90] sm:$0xff] %vm2108_vm10, %v4680_v35  ;;  %v4228_v58 = vsel %vm4216_vm8, %v4195_v48, %v3946_v15 }
 0x475   : > { %v4261_v55 = vsel %vm4249_vm12, %v4228_v58, %v3981_v61  ;;  %v4069_v57 = vpop.permute.xlu2 %4068 }
 0x477   : > { %v4629_v18 = vpop.f32.mrf.mxu2 }
 0x478   : > { %v4630_v26 = vadd.f32 %v7938_v38, %v4629_v18 }
 0x479   : > { %v4587_v47 = vpop.f32.mrf.mxu1 }
 0x47a   : > { %v4681_v19 = vmax.f32 %v4630_v26, 0.0  ;;  %v4588_v20 = vadd.f32 %v7938_v38, %v4587_v47  ;;  %v4016_v9 = vpop.permute.xlu0 %4015 }
 0x47b   : > { %v4051_v17 = vpop.permute.xlu1 %4050  ;;  %v4294_v37 = vsel %vm4282_vm3, %v4261_v55, %v4016_v9 }
 0x47c   : > { %4713 = vst.msk [vmem:[%s7949_s16 + $0x98] sm:$0xff] %vm2108_vm10, %v4681_v19  ;;  %v4664_v36 = vmax.f32 %v4588_v20, 0.0  ;;  %v4327_v39 = vsel %vm4315_vm0, %v4294_v37, %v4051_v17 }
 0x47d   : > { %v4472_v3 = vsel %vm4460_vm2, %v4327_v39, %v4439_v63  ;;  %v3948_v5 = vpop.permute.xlu2 %3947 }
 0x47e   : > { %4696 = vst.msk [vmem:[%s7949_s16 + $0x10] sm:$0xff] %vm2108_vm10, %v4664_v36  ;;  %5019 = vmatmul.msk.bf16.gmra.mxu1 %vm4536_vm7, %v4472_v3 }
 0x481   : > { %v4589_v0 = vpop.f32.mrf.mxu1 }
 0x482   : > { %v4590_v60 = vadd.f32 %v7938_v38, %v4589_v0  ;;  %v3894_v42 = vpop.permute.xlu0 %3893 }
 0x483   : > { %v3929_v59 = vpop.permute.xlu1 %3928  ;;  %v4181_v28 = vsel %vm2240_vm15, %v7619_v24, %v3894_v42 }
 0x484   : > { %v4665_v62 = vmax.f32 %v4590_v60, 0.0  ;;  %v4213_v8 = vsel %vm2306_vm6, %v4181_v28, %v3929_v59 }
 0x485   : > { %v4246_v23 = vsel %vm4216_vm8, %v4213_v8, %v3964_v41  ;;  %v4053_v31 = vpop.permute.xlu2 %4052 }
 0x486   : > { %4697 = vst.msk [vmem:[%s7949_s16 + $0x18] sm:$0xff] %vm2108_vm10, %v4665_v62 }
 0x48a   : > { %v3999_v32 = vpop.permute.xlu0 %3998 }
 0x48b   : > { %v4034_v33 = vpop.permute.xlu1 %4033  ;;  %v4279_v22 = vsel %vm4249_vm12, %v4246_v23, %v3999_v32 }
 0x48c   : > { %v4312_v11 = vsel %vm4282_vm3, %v4279_v22, %v4034_v33 }
 0x48d   : > { %v4345_v24 = vsel %vm4315_vm0, %v4312_v11, %v4069_v57  ;;  %v3931_v16 = vpop.permute.xlu2 %3930 }
 0x48f   : > { %v4632_v4 = vpop.f32.mrf.mxu2 }
 0x490   : > { %v4633_v25 = vadd.f32 %v7938_v38, %v4632_v4 }
 0x492   : > { %v4682_v43 = vmax.f32 %v4633_v25, 0.0  ;;  %v4457_v34 = vpop.permute.xlu0 %4456 }
 0x493   : > { %v3913_v1 = vpop.permute.xlu1 %3912  ;;  %v4490_v51 = vsel %vm4460_vm2, %v4345_v24, %v4457_v34 }
 0x494   : > { %4714 = vst.msk [vmem:[%s7949_s16 + $0xa0] sm:$0xff] %vm2108_vm10, %v4682_v43  ;;  %5028 = vmatmul.msk.bf16.gmra.mxu2 %vm4536_vm7, %v4490_v51  ;;  %v4197_v50 = vsel %vm2306_vm6, %v7663_v10, %v3913_v1 }
 0x495   : > { %v4230_v27 = vsel %vm4216_vm8, %v4197_v50, %v3948_v5  ;;  %v4036_v58 = vpop.permute.xlu2 %4035 }
 0x497   : > { %v4634_v29 = vpop.f32.mrf.mxu2 }
 0x498   : > { %v4635_v6 = vadd.f32 %v7938_v38, %v4634_v29 }
 0x499   : > { %v4592_v30 = vpop.f32.mrf.mxu1 }
 0x49a   : > { %v4683_v46 = vmax.f32 %v4635_v6, 0.0  ;;  %v4593_v56 = vadd.f32 %v7938_v38, %v4592_v30  ;;  %v3983_v45 = vpop.permute.xlu0 %3982 }
 0x49b   : > { %v4018_v44 = vpop.permute.xlu1 %4017  ;;  %v4263_v52 = vsel %vm4249_vm12, %v4230_v27, %v3983_v45 }
 0x49c   : > { %4715 = vst.msk [vmem:[%s7949_s16 + $0xa8] sm:$0xff] %vm2108_vm10, %v4683_v46  ;;  %v4666_v61 = vmax.f32 %v4593_v56, 0.0  ;;  %v4296_v10 = vsel %vm4282_vm3, %v4263_v52, %v4018_v44 }
 0x49d   : > { %v4329_v54 = vsel %vm4315_vm0, %v4296_v10, %v4053_v31  ;;  %v3915_v17 = vpop.permute.xlu2 %3914 }
 0x49e   : > { %4698 = vst.msk [vmem:[%s7949_s16 + $0x20] sm:$0xff] %vm2108_vm10, %v4666_v61  ;;  %v4199_v42 = vsel %vm2306_vm6, %v7680_v7, %v3915_v17 }
 0x4a1   : > { %v4594_v12 = vpop.f32.mrf.mxu1 }
 0x4a2   : > { %v4595_v49 = vadd.f32 %v7938_v38, %v4594_v12  ;;  %v4441_v21 = vpop.permute.xlu0 %4440 }
 0x4a3   : > { %v3896_v14 = vpop.permute.xlu1 %3895  ;;  %v4474_v2 = vsel %vm4460_vm2, %v4329_v54, %v4441_v21 }
 0x4a4   : > { %v4667_v53 = vmax.f32 %v4595_v49, 0.0  ;;  %5020 = vmatmul.msk.bf16.gmra.mxu1 %vm4536_vm7, %v4474_v2  ;;  %v4183_v63 = vsel %vm2240_vm15, %v7569_v40, %v3896_v14 }
 0x4a5   : > { %v4215_v15 = vsel %vm2306_vm6, %v4183_v63, %v3931_v16  ;;  %v4020_v8 = vpop.permute.xlu2 %4019 }
 0x4a6   : > { %4699 = vst.msk [vmem:[%s7949_s16 + $0x28] sm:$0xff] %vm2108_vm10, %v4667_v53 }
 0x4aa   : > { %v3966_v35 = vpop.permute.xlu0 %3965 }
 0x4ab   : > { %v4001_v13 = vpop.permute.xlu1 %4000  ;;  %v4248_v48 = vsel %vm4216_vm8, %v4215_v15, %v3966_v35 }
 0x4ac   : > { %v4281_v18 = vsel %vm4249_vm12, %v4248_v48, %v4001_v13 }
 0x4ad   : > { %v4314_v20 = vsel %vm4282_vm3, %v4281_v18, %v4036_v58 }
 0x4af   : > { %v4637_v26 = vpop.f32.mrf.mxu2 }
 0x4b0   : > { %v4638_v47 = vadd.f32 %v7938_v38, %v4637_v26 }
 0x4b2   : > { %v4684_v19 = vmax.f32 %v4638_v47, 0.0  ;;  %v4071_v55 = vpop.permute.xlu0 %4070 }
 0x4b3   : > { %v4459_v9 = vpop.permute.xlu1 %4458  ;;  %v4347_v40 = vsel %vm4315_vm0, %v4314_v20, %v4071_v55 }
 0x4b4   : > { %4716 = vst.msk [vmem:[%s7949_s16 + $0xb0] sm:$0xff] %vm2108_vm10, %v4684_v19  ;;  %v4492_v41 = vsel %vm4460_vm2, %v4347_v40, %v4459_v9 }
 0x4b5   : > { %5029 = vmatmul.msk.bf16.gmra.mxu2 %vm4536_vm7, %v4492_v41 }
 0x4b7   : > { %v4639_v37 = vpop.f32.mrf.mxu2 }
 0x4b8   : > { %v4640_v36 = vadd.f32 %v7938_v38, %v4639_v37 }
 0x4b9   : > { %v4597_v39 = vpop.f32.mrf.mxu1 }
 0x4ba   : > { %v4685_v3 = vmax.f32 %v4640_v36, 0.0  ;;  %v4598_v0 = vadd.f32 %v7938_v38, %v4597_v39  ;;  %v3950_v60 = vpop.permute.xlu0 %3949 }
 0x4bb   : > { %v3985_v59 = vpop.permute.xlu1 %3984  ;;  %v4232_v57 = vsel %vm4216_vm8, %v4199_v42, %v3950_v60 }
 0x4bc   : > { %4717 = vst.msk [vmem:[%s7949_s16 + $0xb8] sm:$0xff] %vm2108_vm10, %v4685_v3  ;;  %v4668_v62 = vmax.f32 %v4598_v0, 0.0  ;;  %v4265_v28 = vsel %vm4249_vm12, %v4232_v57, %v3985_v59 }
 0x4bd   : > { %v4298_v23 = vsel %vm4282_vm3, %v4265_v28, %v4020_v8 }
 0x4be   : > { %4700 = vst.msk [vmem:[%s7949_s16 + $0x30] sm:$0xff] %vm2108_vm10, %v4668_v62 }
 0x4c1   : > { %v4599_v32 = vpop.f32.mrf.mxu1 }
 0x4c2   : > { %v4600_v33 = vadd.f32 %v7938_v38, %v4599_v32  ;;  %v4055_v22 = vpop.permute.xlu0 %4054 }
 0x4c3   : > { %v4331_v7 = vsel %vm4315_vm0, %v4298_v23, %v4055_v22  ;;  %v4443_v5 = vpop.permute.xlu1 %4442 }
 0x4c4   : > { %v4669_v11 = vmax.f32 %v4600_v33, 0.0  ;;  %v4476_v4 = vsel %vm4460_vm2, %v4331_v7, %v4443_v5 }
 0x4c5   : > { %5021 = vmatmul.msk.bf16.gmra.mxu1 %vm4536_vm7, %v4476_v4 }
 0x4c6   : > { %4701 = vst.msk [vmem:[%s7949_s16 + $0x38] sm:$0xff] %vm2108_vm10, %v4669_v11 }
 0x4d0   : > { %v4642_v25 = vpop.f32.mrf.mxu2 }
 0x4d1   : > { %v4643_v43 = vadd.f32 %v7938_v38, %v4642_v25 }
 0x4d3   : > { %v4686_v34 = vmax.f32 %v4643_v43, 0.0 }
 0x4d5   : > { %4718 = vst.msk [vmem:[%s7949_s16 + $0xc0] sm:$0xff] %vm2108_vm10, %v4686_v34 }
 0x4d8   : > { %v4644_v24 = vpop.f32.mrf.mxu2 }
 0x4d9   : > { %v4645_v1 = vadd.f32 %v7938_v38, %v4644_v24 }
 0x4da   : > { %v4602_v51 = vpop.f32.mrf.mxu1 }
 0x4db   : > { %v4687_v29 = vmax.f32 %v4645_v1, 0.0  ;;  %v4603_v50 = vadd.f32 %v7938_v38, %v4602_v51 }
 0x4dd   : > { %4719 = vst.msk [vmem:[%s7949_s16 + $0xc8] sm:$0xff] %vm2108_vm10, %v4687_v29  ;;  %v4670_v6 = vmax.f32 %v4603_v50, 0.0 }
 0x4df   : > { %4702 = vst.msk [vmem:[%s7949_s16 + $0x40] sm:$0xff] %vm2108_vm10, %v4670_v6 }
 0x4e2   : > { %v4604_v31 = vpop.f32.mrf.mxu1 }
 0x4e3   : > { %v4605_v30 = vadd.f32 %v7938_v38, %v4604_v31 }
 0x4e5   : > { %v4671_v46 = vmax.f32 %v4605_v30, 0.0 }
 0x4e7   : > { %4703 = vst.msk [vmem:[%s7949_s16 + $0x48] sm:$0xff] %vm2108_vm10, %v4671_v46 }
 0x4f1   : > { %v4647_v56 = vpop.f32.mrf.mxu2 }
 0x4f2   : > { %v4648_v45 = vadd.f32 %v7938_v38, %v4647_v56 }
 0x4f4   : > { %v4688_v44 = vmax.f32 %v4648_v45, 0.0 }
 0x4f6   : > { %4720 = vst.msk [vmem:[%s7949_s16 + $0xd0] sm:$0xff] %vm2108_vm10, %v4688_v44 }
 0x4f9   : > { %v4649_v27 = vpop.f32.mrf.mxu2 }
 0x4fa   : > { %v4650_v61 = vadd.f32 %v7938_v38, %v4649_v27 }
 0x4fb   : > { %v4607_v52 = vpop.f32.mrf.mxu1 }
 0x4fc   : > { %v4689_v10 = vmax.f32 %v4650_v61, 0.0  ;;  %v4608_v12 = vadd.f32 %v7938_v38, %v4607_v52 }
 0x4fe   : > { %4721 = vst.msk [vmem:[%s7949_s16 + $0xd8] sm:$0xff] %vm2108_vm10, %v4689_v10  ;;  %v4672_v49 = vmax.f32 %v4608_v12, 0.0 }
 0x500   : > { %4704 = vst.msk [vmem:[%s7949_s16 + $0x50] sm:$0xff] %vm2108_vm10, %v4672_v49 }
 0x503   : > { %v4609_v21 = vpop.f32.mrf.mxu1 }
 0x504   : > { %v4610_v54 = vadd.f32 %v7938_v38, %v4609_v21 }
 0x506   : > { %v4673_v16 = vmax.f32 %v4610_v54, 0.0 }
 0x508   : > { %4705 = vst.msk [vmem:[%s7949_s16 + $0x58] sm:$0xff] %vm2108_vm10, %v4673_v16 }
 0x517   : > { %v4652_v14 = vpop.f32.mrf.mxu2 }
 0x518   : > { %v4653_v2 = vadd.f32 %v7938_v38, %v4652_v14 }
 0x51a   : > { %v4690_v53 = vmax.f32 %v4653_v2, 0.0 }
 0x51c   : > { %4722 = vst.msk [vmem:[%s7949_s16 + $0xe0] sm:$0xff] %vm2108_vm10, %v4690_v53 }
 0x51f   : > { %v4654_v63 = vpop.f32.mrf.mxu2 }
 0x520   : > { %v4655_v35 = vadd.f32 %v7938_v38, %v4654_v63 }
 0x521   : > { %v4612_v13 = vpop.f32.mrf.mxu1 }
 0x522   : > { %v4691_v15 = vmax.f32 %v4655_v35, 0.0  ;;  %v4613_v48 = vadd.f32 %v7938_v38, %v4612_v13 }
 0x524   : > { %4723 = vst.msk [vmem:[%s7949_s16 + $0xe8] sm:$0xff] %vm2108_vm10, %v4691_v15  ;;  %v4674_v58 = vmax.f32 %v4613_v48, 0.0 }
 0x526   : > { %4706 = vst.msk [vmem:[%s7949_s16 + $0x60] sm:$0xff] %vm2108_vm10, %v4674_v58 }
 0x529   : > { %v4614_v18 = vpop.f32.mrf.mxu1 }
 0x52a   : > { %v4615_v26 = vadd.f32 %v7938_v38, %v4614_v18 }
 0x52c   : > { %v4675_v47 = vmax.f32 %v4615_v26, 0.0 }
 0x52e   : > { %4707 = vst.msk [vmem:[%s7949_s16 + $0x68] sm:$0xff] %vm2108_vm10, %v4675_v47 }
 0x538   : > { %v4657_v19 = vpop.f32.mrf.mxu2 }
 0x539   : > { %v4658_v20 = vadd.f32 %v7938_v38, %v4657_v19 }
 0x53b   : > { %v4692_v55 = vmax.f32 %v4658_v20, 0.0 }
 0x53d   : > { %4724 = vst.msk [vmem:[%s7949_s16 + $0xf0] sm:$0xff] %vm2108_vm10, %v4692_v55 }
 0x540   : > { %v4659_v9 = vpop.f32.mrf.mxu2 }
 0x541   : > { %v4660_v40 = vadd.f32 %v7938_v38, %v4659_v9 }
 0x542   : > { %v4617_v41 = vpop.f32.mrf.mxu1 }
 0x543   : > { %v4693_v17 = vmax.f32 %v4660_v40, 0.0  ;;  %v4618_v37 = vadd.f32 %v7938_v38, %v4617_v41 }
 0x545   : > { %4725 = vst.msk [vmem:[%s7949_s16 + $0xf8] sm:$0xff] %vm2108_vm10, %v4693_v17  ;;  %v4676_v36 = vmax.f32 %v4618_v37, 0.0 }
 0x547   : > { %4708 = vst.msk [vmem:[%s7949_s16 + $0x70] sm:$0xff] %vm2108_vm10, %v4676_v36 }
 0x54a   : > { %v4619_v39 = vpop.f32.mrf.mxu1 }
 0x54b   : > { %v4620_v3 = vadd.f32 %v7938_v38, %v4619_v39 }
 0x54d   : > { %v4677_v0 = vmax.f32 %v4620_v3, 0.0 }
 0x54f   : > { %4709 = vst.msk [vmem:[%s7949_s16 + $0x78] sm:$0xff] %vm2108_vm10, %v4677_v0 }
 0x550 PF: > { %s15_s18 = sadd.s32 1, %s5139_s18  }
 0x551   : > { %p12_p4 = scmp.ge.s32.totalorder %s15_s18, 4  }
 0x553   :  { %14 = sbr.rel (!%p12_p4) target bundleno = 1 (0x1), region = 74 }

</bundles_post_ra>
